<compile_context>
chip_gen: v7x
topology: tpu7x:2x2x1
jax: 0.10.0
libtpu: 0.0.40
codegen_flags: <defaults>
</compile_context>

<pallas_src>
from itertools import combinations

import numpy as np
import jax
import jax.numpy as jnp
from jax import lax
from jax.experimental import pallas as pl
from jax.experimental.pallas import tpu as pltpu

# ---------------------------------------------------------------------------
# Cl(1,3) tables (basis order: 1, e0..e3, e01..e23, e012..e123, e0123)
# ---------------------------------------------------------------------------
_METRIC = (1.0, -1.0, -1.0, -1.0)
_BASIS = ([()] + [(i,) for i in range(4)]
          + list(combinations(range(4), 2))
          + list(combinations(range(4), 3))
          + [(0, 1, 2, 3)])
GRADES = [len(b) for b in _BASIS]          # grade of each of the 16 components


def _blade_product(a, b):
    """Product of two basis blades: returns (sorted blade, sign*metric coeff)."""
    coeff = 1.0
    f = list(a) + list(b)
    changed = True
    while changed:
        changed = False
        i = 0
        while i < len(f) - 1:
            if f[i] == f[i + 1]:
                coeff *= _METRIC[f[i]]
                del f[i:i + 2]
                changed = True
            elif f[i] > f[i + 1]:
                f[i], f[i + 1] = f[i + 1], f[i]
                coeff = -coeff
                changed = True
            else:
                i += 1
    return tuple(f), coeff


_IDX = {b: i for i, b in enumerate(_BASIS)}
GP_TABLE = np.zeros((16, 16, 16), dtype=np.float32)
for _i, _a in enumerate(_BASIS):
    for _j, _b in enumerate(_BASIS):
        _blade, _c = _blade_product(_a, _b)
        GP_TABLE[_i, _j, _IDX[_blade]] += _c

# Every blade pair maps to exactly ONE output blade with coefficient +-1
# (true for Cl(1,3) with a +-1 metric).  Build the output-blade-major view used
# by the regrouped GP unroll: GP_BY_OUTPUT[k][i] = (j, sign) with i*j -> sign*k.
GP_BY_OUTPUT = [[None] * 16 for _ in range(16)]
for _i in range(16):
    for _j in range(16):
        _nz = np.nonzero(GP_TABLE[_i, _j])[0]
        assert _nz.size == 1 and abs(GP_TABLE[_i, _j, _nz[0]]) == 1.0, \
            "GP table is not single-blade / unit-coefficient"
        _k = int(_nz[0])
        assert GP_BY_OUTPUT[_k][_i] is None
        GP_BY_OUTPUT[_k][_i] = (_j, float(GP_TABLE[_i, _j, _k]))


def _round_up(x, m):
    return (x + m - 1) // m * m


# ---------------------------------------------------------------------------
# Pallas kernel: fused equi-linears, geometric product, both norms
# ---------------------------------------------------------------------------
def _geometric_bilinear_kernel(mv_ref, sT_ref, wlr_ref, wlrs_ref, wmvT_ref,
                               ws_ref, omv_ref, osT_ref, feat_ref):
    f32 = jnp.float32
    cdt = wlr_ref.dtype                     # MXU operand dtype (bf16 or f32)
    fdt = feat_ref.dtype
    bn = mv_ref.shape[0]
    h = wlrs_ref.shape[0] // 2              # hidden multivector channels
    s_in = sT_ref.shape[0]
    k_feat = feat_ref.shape[0]
    c_out = omv_ref.shape[1] // 16

    # ---- fused left|right equi-linear (one block-diagonal MXU matmul) ------
    # NT-form dot (contract the lane axis of both operands): no transpose of
    # the token-major mv tile; result is already tokens-on-lanes (2*16*h, bn).
    projT = lax.dot_general(
        wlr_ref[...], mv_ref[...].astype(cdt),
        dimension_numbers=(((1,), (1,)), ((), ())),
        preferred_element_type=f32)

    sT = sT_ref[...]
    # Tiny scalar -> grade-0 injection (only 2*h rows are nonzero).
    s_contrib = jnp.dot(wlrs_ref[...], sT.astype(cdt),
                        preferred_element_type=f32)          # (2h, bn)

    def left_slab(i):                                        # (h, bn), f32
        s = projT[i * h:(i + 1) * h, :]
        return s + s_contrib[0:h, :] if i == 0 else s

    def right_slab(j):                                       # (h, bn), f32
        s = projT[(16 + j) * h:(16 + j + 1) * h, :]
        return s + s_contrib[h:2 * h, :] if j == 0 else s

    # ---- feature slab = [16 GP blades | scalars | ones (bias) | zero pad] --
    feat_ref[16 * h:16 * h + s_in, :] = sT.astype(fdt)
    n_tail = k_feat - 16 * h - s_in                          # >= 1, first row=1
    feat_ref[16 * h + s_in:, :] = (
        lax.broadcasted_iota(jnp.int32, (n_tail, bn), 0) == 0).astype(fdt)

    # ---- geometric product, regrouped by OUTPUT blade (GROUP at a time) ----
    # Keeps register pressure at ~2*GROUP + 6 vregs (vs 32+ with all 16 blades
    # live), with completed blades streamed straight into the feature slab.
    GROUP = 4
    for g0 in range(0, 16, GROUP):
        accs = [None] * GROUP
        for i in range(16):
            li = left_slab(i)
            for gi in range(GROUP):
                j, sgn = GP_BY_OUTPUT[g0 + gi][i]
                term = li * right_slab(j)
                if accs[gi] is None:
                    accs[gi] = term if sgn > 0.0 else -term
                elif sgn > 0.0:
                    accs[gi] = accs[gi] + term
                else:
                    accs[gi] = accs[gi] - term
        feat_ref[g0 * h:(g0 + GROUP) * h, :] = (
            jnp.concatenate(accs, axis=0).astype(fdt))
    # TODO(synk): gatr_config.use_bivector defaults to True; if False, the
    # writes for output blades 5..10 should be replaced with zeros.

    feat = feat_ref[...]                                     # (k_feat, bn)

    # ---- linear_out: fused mv head (TN-form -> token-major) + scalar head --
    out_mv = lax.dot_general(
        feat, wmvT_ref[...],
        dimension_numbers=(((0,), (0,)), ((), ())),
        preferred_element_type=f32)                          # (bn, c_out*16)
    out_sT = jnp.dot(ws_ref[...], feat,
                     preferred_element_type=f32)             # (s_out, bn)

    # ---- EquiLayerNorm on multivectors (lane-axis reduction; XLU is idle) --
    sq = jnp.sum(out_mv * out_mv, axis=1, keepdims=True) * (1.0 / c_out)
    omv_ref[...] = out_mv * lax.rsqrt(sq + 0.01)             # lane-dense store

    # ---- standard (non-affine) LayerNorm on scalars ------------------------
    mu = jnp.mean(out_sT, axis=0, keepdims=True)
    ctr = out_sT - mu
    var = jnp.mean(ctr * ctr, axis=0, keepdims=True)
    osT_ref[...] = ctr * lax.rsqrt(var + 1e-5)


# ---------------------------------------------------------------------------
# Wrapper: weight packing (block-diagonal + fused output head), pallas_call
# ---------------------------------------------------------------------------
def geometric_bilinear(mv, scalars, params, *, block_n=256,
                       mxu_dtype=jnp.bfloat16):
    """Fused GeometricBilinear forward.

    block_n: tokens per grid step.  512-1024 is best on single-core chips
    (v5e/v6e); keep 256-512 on v7x so the 'parallel' grid axis has >=4 tiles
    to split across the two TensorCores.
    """
    *batch, c_in, _ = mv.shape
    n = int(np.prod(batch)) if batch else 1
    s_in = scalars.shape[-1]
    h = params["w_left"].shape[0]
    c_out = params["w_out"].shape[0]
    s_out = params["w_ss"].shape[1]
    assert (16 * c_in) % 128 == 0 and (16 * c_out) % 128 == 0, \
        "multivector channel counts must be multiples of 8 for this kernel"
    assert s_in % 8 == 0 and s_out % 8 == 0

    # fused-K of linear_out: [16*h GP rows | s_in scalar rows | bias row | pad]
    k_feat = 16 * h + _round_up(s_in + 1, 16)

    # ---- weight packing: pure function of params (constant-folds under jit;
    # ---- in a real model, pre-pack once and reuse across calls). ----------
    grades = jnp.asarray(GRADES)
    eye16 = jnp.eye(16, dtype=jnp.float32)

    def expand_lr(w):   # (h, c_in, 5) -> (16*h, c_in*16), rows j*h+hh
        wf = w[..., grades]                                     # (h, c_in, 16)
        a = jnp.transpose(wf, (2, 0, 1))[:, :, :, None] * eye16[:, None, None, :]
        return a.reshape(16 * w.shape[0], w.shape[1] * 16)

    def expand_out(w):  # (c_out, h, 5) -> (c_out*16, 16*h), rows c*16+j
        wf = w[..., grades]                                     # (c_out, h, 16)
        a = jnp.transpose(wf, (0, 2, 1))[:, :, None, :] * eye16[None, :, :, None]
        return a.reshape(w.shape[0] * 16, 16 * w.shape[1])

    wlr = jnp.concatenate([expand_lr(params["w_left"]),
                           expand_lr(params["w_right"])], axis=0)     # (2*16h, 16c_in)
    wlrs = jnp.concatenate([params["w_sl"].T, params["w_sr"].T], axis=0)  # (2h, s_in)

    # mv head of linear_out, pre-transposed to (k_feat, c_out*16) so the
    # kernel's token-major dot is the natively supported TN form; grade-0
    # scalar columns and the bias column are fused into the same K (bias=0).
    wmvT = jnp.zeros((k_feat, c_out * 16), jnp.float32)
    wmvT = wmvT.at[:16 * h, :].set(expand_out(params["w_out"]).T)
    wmvT = wmvT.at[16 * h:16 * h + s_in, 0::16].set(params["w_so"])   # grade-0 cols
    # scalar head of linear_out: [w_ms^T | 0 | w_ss^T | b_s | 0]
    ws = jnp.zeros((s_out, k_feat), jnp.float32)
    ws = ws.at[:, 0:h].set(params["w_ms"].T)
    ws = ws.at[:, 16 * h:16 * h + s_in].set(params["w_ss"].T)
    ws = ws.at[:, 16 * h + s_in].set(params["b_s"])

    wlr = wlr.astype(mxu_dtype)
    wlrs = wlrs.astype(mxu_dtype)
    wmvT = wmvT.astype(mxu_dtype)
    ws = ws.astype(mxu_dtype)

    # Big multivector tensor: pure reshape only (no HBM transpose); the tiny
    # scalar tensor is transposed on the XLA side (negligible traffic).
    mv2d = mv.reshape(n, c_in * 16)
    sT2d = scalars.reshape(n, s_in).T                                 # (s_in, n)

    n_pad = pl.cdiv(n, block_n) * block_n
    if n_pad != n:
        mv2d = jnp.pad(mv2d, ((0, n_pad - n), (0, 0)))
        sT2d = jnp.pad(sT2d, ((0, 0), (0, n_pad - n)))

    num_tiles = n_pad // block_n
    flops_per_tile = (
        2 * block_n * (16 * c_in) * (2 * 16 * h)        # fused left|right projection
        + 2 * block_n * s_in * (2 * h)                  # scalar -> grade-0 injection
        + 2 * 16 * 16 * h * block_n                     # geometric product (mul+add)
        + 2 * block_n * k_feat * (c_out * 16 + s_out))  # fused linear_out heads
    weight_bytes = int((wlr.size + wlrs.size + wmvT.size + ws.size)
                       * np.dtype(mxu_dtype).itemsize)
    cost = pl.CostEstimate(
        flops=int(flops_per_tile * num_tiles),
        transcendentals=int(2 * n_pad),
        bytes_accessed=int(4 * n_pad * (c_in * 16 + s_in + c_out * 16 + s_out)
                           + weight_bytes))

    omv, osT = pl.pallas_call(
        _geometric_bilinear_kernel,
        out_shape=(jax.ShapeDtypeStruct((n_pad, c_out * 16), jnp.float32),
                   jax.ShapeDtypeStruct((s_out, n_pad), jnp.float32)),
        grid_spec=pltpu.PrefetchScalarGridSpec(
            num_scalar_prefetch=0,
            grid=(num_tiles,),
            in_specs=[
                pl.BlockSpec((block_n, c_in * 16), lambda t: (t, 0)),
                pl.BlockSpec((s_in, block_n), lambda t: (0, t)),
                pl.BlockSpec((2 * 16 * h, c_in * 16), lambda t: (0, 0)),
                pl.BlockSpec((2 * h, s_in), lambda t: (0, 0)),
                pl.BlockSpec((k_feat, c_out * 16), lambda t: (0, 0)),
                pl.BlockSpec((s_out, k_feat), lambda t: (0, 0)),
            ],
            out_specs=[
                pl.BlockSpec((block_n, c_out * 16), lambda t: (t, 0)),
                pl.BlockSpec((s_out, block_n), lambda t: (0, t)),
            ],
            scratch_shapes=[pltpu.VMEM((k_feat, block_n), mxu_dtype)],
        ),
        compiler_params=pltpu.CompilerParams(
            dimension_semantics=("parallel",)),
        cost_estimate=cost,
    )(mv2d, sT2d, wlr, wlrs, wmvT, ws)

    out_mv = omv[:n].reshape(*batch, c_out, 16)        # pure reshape (cols c*16+j)
    out_s = osT[:, :n].T.reshape(*batch, s_out)        # tiny transpose
    return out_mv, out_s


# ---------------------------------------------------------------------------
# Pure-JAX reference (same math) for a sanity check
# ---------------------------------------------------------------------------
def reference(mv, scalars, params):
    grades = jnp.asarray(GRADES)
    g = jnp.asarray(GP_TABLE)

    def equi_linear(x, w):                       # w: (out, in, 5)
        wfull = w[..., grades]                   # (out, in, 16)
        return jnp.einsum("oij,...ij->...oj", wfull, x)

    left = equi_linear(mv, params["w_left"])
    left = left.at[..., 0].add(scalars @ params["w_sl"])
    right = equi_linear(mv, params["w_right"])
    right = right.at[..., 0].add(scalars @ params["w_sr"])
    gp = jnp.einsum("ijk,...i,...j->...k", g, left, right)
    out_mv = equi_linear(gp, params["w_out"])
    out_mv = out_mv.at[..., 0].add(scalars @ params["w_so"])
    out_s = gp[..., 0] @ params["w_ms"] + scalars @ params["w_ss"] + params["b_s"]
    sq = jnp.mean(jnp.sum(out_mv ** 2, axis=-1), axis=-1, keepdims=True)[..., None]
    out_mv = out_mv / jnp.sqrt(sq + 0.01)
    mu = out_s.mean(-1, keepdims=True)
    var = ((out_s - mu) ** 2).mean(-1, keepdims=True)
    out_s = (out_s - mu) / jnp.sqrt(var + 1e-5)
    return out_mv, out_s


if __name__ == "__main__":
    key = jax.random.PRNGKey(0)
    B, T = 2, 192                     # flattened token count N = 384 (pads to 512)
    C_IN, H, C_OUT = 8, 8, 8          # in / hidden / out multivector channels
    S_IN, S_OUT = 16, 16              # in / out scalar channels
    ks = jax.random.split(key, 11)

    mv = jax.random.normal(ks[0], (B, T, C_IN, 16), jnp.float32)
    scalars = jax.random.normal(ks[1], (B, T, S_IN), jnp.float32)

    def init(k, shape, scale=0.2):
        return scale * jax.random.normal(k, shape, jnp.float32)

    params = {
        "w_left": init(ks[2], (H, C_IN, 5)),
        "w_right": init(ks[3], (H, C_IN, 5)),
        "w_out": init(ks[4], (C_OUT, H, 5)),
        "w_sl": init(ks[5], (S_IN, H)),
        "w_sr": init(ks[6], (S_IN, H)),
        "w_so": init(ks[7], (S_IN, C_OUT)),
        "w_ms": init(ks[8], (H, S_OUT)),
        "w_ss": init(ks[9], (S_IN, S_OUT)),
        "b_s": init(ks[10], (S_OUT,)),
    }
    # deterministic stand-in for the 'almost_unit_scalar' init of linear_right:
    # bias the grade-0 basis coefficient toward 1.
    params["w_right"] = params["w_right"].at[..., 0].add(1.0)

    ref_mv, ref_s = reference(mv, scalars, params)

    # f32-MXU variant: verifies the fused math tightly against the reference.
    out_mv32, out_s32 = geometric_bilinear(mv, scalars, params,
                                           mxu_dtype=jnp.float32)
    out_mv32 = jax.block_until_ready(out_mv32)
    out_s32 = jax.block_until_ready(out_s32)
    assert out_mv32.shape == (B, T, C_OUT, 16) and out_s32.shape == (B, T, S_OUT)
    assert np.allclose(np.asarray(out_mv32), np.asarray(ref_mv), atol=2e-2, rtol=2e-2)
    assert np.allclose(np.asarray(out_s32), np.asarray(ref_s), atol=2e-2, rtol=2e-2)

    # Default bf16-MXU variant (f32 accumulation, f32 GP + norms): looser tol.
    out_mv, out_s = geometric_bilinear(mv, scalars, params)
    out_mv = jax.block_until_ready(out_mv)
    out_s = jax.block_until_ready(out_s)
    assert out_mv.shape == (B, T, C_OUT, 16) and out_s.shape == (B, T, S_OUT)
    assert np.allclose(np.asarray(out_mv), np.asarray(ref_mv), atol=6e-2, rtol=6e-2)
    assert np.allclose(np.asarray(out_s), np.asarray(ref_s), atol=6e-2, rtol=6e-2)

    print("KERNEL_OK")
</pallas_src>

<mosaic_0001>
module attributes {stable_mosaic.version = 11 : i64} {
  func.func @_geometric_bilinear_kernel(%arg0: i32, %arg1: memref<256x128xf32, #tpu.memory_space<vmem>>, %arg2: memref<16x256xf32, #tpu.memory_space<vmem>>, %arg3: memref<256x128xf32, #tpu.memory_space<vmem>>, %arg4: memref<16x16xf32, #tpu.memory_space<vmem>>, %arg5: memref<160x128xf32, #tpu.memory_space<vmem>>, %arg6: memref<16x160xf32, #tpu.memory_space<vmem>>, %arg7: memref<256x128xf32, #tpu.memory_space<vmem>>, %arg8: memref<16x256xf32, #tpu.memory_space<vmem>>, %arg9: memref<160x256xf32, #tpu.memory_space<vmem>>) attributes {dimension_semantics = [#tpu.dimension_semantics<parallel>], iteration_bounds = array<i64: 2>, scalar_prefetch = 0 : i64, scratch_operands = 1 : i64, tpu.core_type = #tpu.core_type<tc>, window_params = [{transform_indices = @transform_0, window_bounds = array<i64: 256, 128>}, {transform_indices = @transform_1, window_bounds = array<i64: 16, 256>}, {pipeline_mode = #tpu.pipeline_mode<synchronous>, transform_indices = @transform_2, window_bounds = array<i64: 256, 128>}, {pipeline_mode = #tpu.pipeline_mode<synchronous>, transform_indices = @transform_3, window_bounds = array<i64: 16, 16>}, {pipeline_mode = #tpu.pipeline_mode<synchronous>, transform_indices = @transform_4, window_bounds = array<i64: 160, 128>}, {pipeline_mode = #tpu.pipeline_mode<synchronous>, transform_indices = @transform_5, window_bounds = array<i64: 16, 160>}, {transform_indices = @transform_6, window_bounds = array<i64: 256, 128>}, {transform_indices = @transform_7, window_bounds = array<i64: 16, 256>}]} {
    %c0 = arith.constant 0 : index
    %c0_0 = arith.constant 0 : index
    %0 = vector.load %arg3[%c0, %c0_0] : memref<256x128xf32, #tpu.memory_space<vmem>>, vector<256x128xf32>
    %c0_1 = arith.constant 0 : index
    %c0_2 = arith.constant 0 : index
    %1 = vector.load %arg1[%c0_1, %c0_2] : memref<256x128xf32, #tpu.memory_space<vmem>>, vector<256x128xf32>
    %cst = arith.constant dense<0.000000e+00> : vector<256x256xf32>
    %2 = tpu.matmul %0, %1, %cst {dimension_numbers = #tpu.dot_dimension_numbers<[1], [1], [0], [0], [0, 0, 1, 0], [], []>} : vector<256x128xf32>, vector<256x128xf32>, vector<256x256xf32> -> vector<256x256xf32>
    %c0_3 = arith.constant 0 : index
    %c0_4 = arith.constant 0 : index
    %3 = vector.load %arg2[%c0_3, %c0_4] : memref<16x256xf32, #tpu.memory_space<vmem>>, vector<16x256xf32>
    %c0_5 = arith.constant 0 : index
    %c0_6 = arith.constant 0 : index
    %4 = vector.load %arg4[%c0_5, %c0_6] : memref<16x16xf32, #tpu.memory_space<vmem>>, vector<16x16xf32>
    %cst_7 = arith.constant dense<0.000000e+00> : vector<16x256xf32>
    %5 = tpu.matmul %4, %3, %cst_7 {dimension_numbers = #tpu.dot_dimension_numbers<[1], [0], [0], [1], [0, 0, 1, 1], [], []>} : vector<16x16xf32>, vector<16x256xf32>, vector<16x256xf32> -> vector<16x256xf32>
    %c128 = arith.constant 128 : index
    %c0_8 = arith.constant 0 : index
    %6 = vector.load %arg9[%c128, %c0_8] : memref<160x256xf32, #tpu.memory_space<vmem>>, vector<16x256xf32>
    tpu.vector_store %arg9[%c128, %c0_8], %3 {strides = array<i32>} : memref<160x256xf32, #tpu.memory_space<vmem>>, vector<16x256xf32>,
    %7 = tpu.iota {dimensions = array<i32: 0>} : vector<16x256xi32>
    %c0_i32 = arith.constant 0 : i32
    %8 = vector.broadcast %c0_i32 : i32 to vector<16x256xi32>
    %9 = arith.cmpi eq, %7, %8 : vector<16x256xi32>
    %10 = arith.extui %9 : vector<16x256xi1> to vector<16x256xi32>
    %11 = arith.sitofp %10 : vector<16x256xi32> to vector<16x256xf32>
    %c144 = arith.constant 144 : index
    %c0_9 = arith.constant 0 : index
    %12 = vector.load %arg9[%c144, %c0_9] : memref<160x256xf32, #tpu.memory_space<vmem>>, vector<16x256xf32>
    tpu.vector_store %arg9[%c144, %c0_9], %11 {strides = array<i32>} : memref<160x256xf32, #tpu.memory_space<vmem>>, vector<16x256xf32>,
    %13 = vector.extract_strided_slice %2 {offsets = [0, 0], sizes = [8, 256], strides = [1, 1]} : vector<256x256xf32> to vector<8x256xf32>
    %14 = vector.extract_strided_slice %5 {offsets = [0, 0], sizes = [8, 256], strides = [1, 1]} : vector<16x256xf32> to vector<8x256xf32>
    %15 = arith.addf %13, %14 : vector<8x256xf32>
    %16 = vector.extract_strided_slice %2 {offsets = [128, 0], sizes = [8, 256], strides = [1, 1]} : vector<256x256xf32> to vector<8x256xf32>
    %17 = vector.extract_strided_slice %5 {offsets = [8, 0], sizes = [8, 256], strides = [1, 1]} : vector<16x256xf32> to vector<8x256xf32>
    %18 = arith.addf %16, %17 : vector<8x256xf32>
    %19 = arith.mulf %15, %18 : vector<8x256xf32>
    %20 = vector.extract_strided_slice %2 {offsets = [136, 0], sizes = [8, 256], strides = [1, 1]} : vector<256x256xf32> to vector<8x256xf32>
    %21 = arith.mulf %15, %20 : vector<8x256xf32>
    %22 = vector.extract_strided_slice %2 {offsets = [144, 0], sizes = [8, 256], strides = [1, 1]} : vector<256x256xf32> to vector<8x256xf32>
    %23 = arith.mulf %15, %22 : vector<8x256xf32>
    %24 = vector.extract_strided_slice %2 {offsets = [152, 0], sizes = [8, 256], strides = [1, 1]} : vector<256x256xf32> to vector<8x256xf32>
    %25 = arith.mulf %15, %24 : vector<8x256xf32>
    %26 = vector.extract_strided_slice %2 {offsets = [8, 0], sizes = [8, 256], strides = [1, 1]} : vector<256x256xf32> to vector<8x256xf32>
    %27 = vector.extract_strided_slice %2 {offsets = [136, 0], sizes = [8, 256], strides = [1, 1]} : vector<256x256xf32> to vector<8x256xf32>
    %28 = arith.mulf %26, %27 : vector<8x256xf32>
    %29 = arith.addf %19, %28 : vector<8x256xf32>
    %30 = vector.extract_strided_slice %2 {offsets = [128, 0], sizes = [8, 256], strides = [1, 1]} : vector<256x256xf32> to vector<8x256xf32>
    %31 = vector.extract_strided_slice %5 {offsets = [8, 0], sizes = [8, 256], strides = [1, 1]} : vector<16x256xf32> to vector<8x256xf32>
    %32 = arith.addf %30, %31 : vector<8x256xf32>
    %33 = arith.mulf %26, %32 : vector<8x256xf32>
    %34 = arith.addf %21, %33 : vector<8x256xf32>
    %35 = vector.extract_strided_slice %2 {offsets = [168, 0], sizes = [8, 256], strides = [1, 1]} : vector<256x256xf32> to vector<8x256xf32>
    %36 = arith.mulf %26, %35 : vector<8x256xf32>
    %37 = arith.addf %23, %36 : vector<8x256xf32>
    %38 = vector.extract_strided_slice %2 {offsets = [176, 0], sizes = [8, 256], strides = [1, 1]} : vector<256x256xf32> to vector<8x256xf32>
    %39 = arith.mulf %26, %38 : vector<8x256xf32>
    %40 = arith.addf %25, %39 : vector<8x256xf32>
    %41 = vector.extract_strided_slice %2 {offsets = [16, 0], sizes = [8, 256], strides = [1, 1]} : vector<256x256xf32> to vector<8x256xf32>
    %42 = vector.extract_strided_slice %2 {offsets = [144, 0], sizes = [8, 256], strides = [1, 1]} : vector<256x256xf32> to vector<8x256xf32>
    %43 = arith.mulf %41, %42 : vector<8x256xf32>
    %44 = arith.subf %29, %43 : vector<8x256xf32>
    %45 = vector.extract_strided_slice %2 {offsets = [168, 0], sizes = [8, 256], strides = [1, 1]} : vector<256x256xf32> to vector<8x256xf32>
    %46 = arith.mulf %41, %45 : vector<8x256xf32>
    %47 = arith.addf %34, %46 : vector<8x256xf32>
    %48 = vector.extract_strided_slice %2 {offsets = [128, 0], sizes = [8, 256], strides = [1, 1]} : vector<256x256xf32> to vector<8x256xf32>
    %49 = vector.extract_strided_slice %5 {offsets = [8, 0], sizes = [8, 256], strides = [1, 1]} : vector<16x256xf32> to vector<8x256xf32>
    %50 = arith.addf %48, %49 : vector<8x256xf32>
    %51 = arith.mulf %41, %50 : vector<8x256xf32>
    %52 = arith.addf %37, %51 : vector<8x256xf32>
    %53 = vector.extract_strided_slice %2 {offsets = [192, 0], sizes = [8, 256], strides = [1, 1]} : vector<256x256xf32> to vector<8x256xf32>
    %54 = arith.mulf %41, %53 : vector<8x256xf32>
    %55 = arith.subf %40, %54 : vector<8x256xf32>
    %56 = vector.extract_strided_slice %2 {offsets = [24, 0], sizes = [8, 256], strides = [1, 1]} : vector<256x256xf32> to vector<8x256xf32>
    %57 = vector.extract_strided_slice %2 {offsets = [152, 0], sizes = [8, 256], strides = [1, 1]} : vector<256x256xf32> to vector<8x256xf32>
    %58 = arith.mulf %56, %57 : vector<8x256xf32>
    %59 = arith.subf %44, %58 : vector<8x256xf32>
    %60 = vector.extract_strided_slice %2 {offsets = [176, 0], sizes = [8, 256], strides = [1, 1]} : vector<256x256xf32> to vector<8x256xf32>
    %61 = arith.mulf %56, %60 : vector<8x256xf32>
    %62 = arith.addf %47, %61 : vector<8x256xf32>
    %63 = vector.extract_strided_slice %2 {offsets = [192, 0], sizes = [8, 256], strides = [1, 1]} : vector<256x256xf32> to vector<8x256xf32>
    %64 = arith.mulf %56, %63 : vector<8x256xf32>
    %65 = arith.addf %52, %64 : vector<8x256xf32>
    %66 = vector.extract_strided_slice %2 {offsets = [128, 0], sizes = [8, 256], strides = [1, 1]} : vector<256x256xf32> to vector<8x256xf32>
    %67 = vector.extract_strided_slice %5 {offsets = [8, 0], sizes = [8, 256], strides = [1, 1]} : vector<16x256xf32> to vector<8x256xf32>
    %68 = arith.addf %66, %67 : vector<8x256xf32>
    %69 = arith.mulf %56, %68 : vector<8x256xf32>
    %70 = arith.addf %55, %69 : vector<8x256xf32>
    %71 = vector.extract_strided_slice %2 {offsets = [32, 0], sizes = [8, 256], strides = [1, 1]} : vector<256x256xf32> to vector<8x256xf32>
    %72 = vector.extract_strided_slice %2 {offsets = [160, 0], sizes = [8, 256], strides = [1, 1]} : vector<256x256xf32> to vector<8x256xf32>
    %73 = arith.mulf %71, %72 : vector<8x256xf32>
    %74 = arith.subf %59, %73 : vector<8x256xf32>
    %75 = vector.extract_strided_slice %2 {offsets = [184, 0], sizes = [8, 256], strides = [1, 1]} : vector<256x256xf32> to vector<8x256xf32>
    %76 = arith.mulf %71, %75 : vector<8x256xf32>
    %77 = arith.addf %62, %76 : vector<8x256xf32>
    %78 = vector.extract_strided_slice %2 {offsets = [200, 0], sizes = [8, 256], strides = [1, 1]} : vector<256x256xf32> to vector<8x256xf32>
    %79 = arith.mulf %71, %78 : vector<8x256xf32>
    %80 = arith.addf %65, %79 : vector<8x256xf32>
    %81 = vector.extract_strided_slice %2 {offsets = [208, 0], sizes = [8, 256], strides = [1, 1]} : vector<256x256xf32> to vector<8x256xf32>
    %82 = arith.mulf %71, %81 : vector<8x256xf32>
    %83 = arith.addf %70, %82 : vector<8x256xf32>
    %84 = vector.extract_strided_slice %2 {offsets = [40, 0], sizes = [8, 256], strides = [1, 1]} : vector<256x256xf32> to vector<8x256xf32>
    %85 = vector.extract_strided_slice %2 {offsets = [168, 0], sizes = [8, 256], strides = [1, 1]} : vector<256x256xf32> to vector<8x256xf32>
    %86 = arith.mulf %84, %85 : vector<8x256xf32>
    %87 = arith.addf %74, %86 : vector<8x256xf32>
    %88 = vector.extract_strided_slice %2 {offsets = [144, 0], sizes = [8, 256], strides = [1, 1]} : vector<256x256xf32> to vector<8x256xf32>
    %89 = arith.mulf %84, %88 : vector<8x256xf32>
    %90 = arith.subf %77, %89 : vector<8x256xf32>
    %91 = vector.extract_strided_slice %2 {offsets = [136, 0], sizes = [8, 256], strides = [1, 1]} : vector<256x256xf32> to vector<8x256xf32>
    %92 = arith.mulf %84, %91 : vector<8x256xf32>
    %93 = arith.subf %80, %92 : vector<8x256xf32>
    %94 = vector.extract_strided_slice %2 {offsets = [216, 0], sizes = [8, 256], strides = [1, 1]} : vector<256x256xf32> to vector<8x256xf32>
    %95 = arith.mulf %84, %94 : vector<8x256xf32>
    %96 = arith.addf %83, %95 : vector<8x256xf32>
    %97 = vector.extract_strided_slice %2 {offsets = [48, 0], sizes = [8, 256], strides = [1, 1]} : vector<256x256xf32> to vector<8x256xf32>
    %98 = vector.extract_strided_slice %2 {offsets = [176, 0], sizes = [8, 256], strides = [1, 1]} : vector<256x256xf32> to vector<8x256xf32>
    %99 = arith.mulf %97, %98 : vector<8x256xf32>
    %100 = arith.addf %87, %99 : vector<8x256xf32>
    %101 = vector.extract_strided_slice %2 {offsets = [152, 0], sizes = [8, 256], strides = [1, 1]} : vector<256x256xf32> to vector<8x256xf32>
    %102 = arith.mulf %97, %101 : vector<8x256xf32>
    %103 = arith.subf %90, %102 : vector<8x256xf32>
    %104 = vector.extract_strided_slice %2 {offsets = [216, 0], sizes = [8, 256], strides = [1, 1]} : vector<256x256xf32> to vector<8x256xf32>
    %105 = arith.mulf %97, %104 : vector<8x256xf32>
    %106 = arith.subf %93, %105 : vector<8x256xf32>
    %107 = vector.extract_strided_slice %2 {offsets = [136, 0], sizes = [8, 256], strides = [1, 1]} : vector<256x256xf32> to vector<8x256xf32>
    %108 = arith.mulf %97, %107 : vector<8x256xf32>
    %109 = arith.subf %96, %108 : vector<8x256xf32>
    %110 = vector.extract_strided_slice %2 {offsets = [56, 0], sizes = [8, 256], strides = [1, 1]} : vector<256x256xf32> to vector<8x256xf32>
    %111 = vector.extract_strided_slice %2 {offsets = [184, 0], sizes = [8, 256], strides = [1, 1]} : vector<256x256xf32> to vector<8x256xf32>
    %112 = arith.mulf %110, %111 : vector<8x256xf32>
    %113 = arith.addf %100, %112 : vector<8x256xf32>
    %114 = vector.extract_strided_slice %2 {offsets = [160, 0], sizes = [8, 256], strides = [1, 1]} : vector<256x256xf32> to vector<8x256xf32>
    %115 = arith.mulf %110, %114 : vector<8x256xf32>
    %116 = arith.subf %103, %115 : vector<8x256xf32>
    %117 = vector.extract_strided_slice %2 {offsets = [224, 0], sizes = [8, 256], strides = [1, 1]} : vector<256x256xf32> to vector<8x256xf32>
    %118 = arith.mulf %110, %117 : vector<8x256xf32>
    %119 = arith.subf %106, %118 : vector<8x256xf32>
    %120 = vector.extract_strided_slice %2 {offsets = [232, 0], sizes = [8, 256], strides = [1, 1]} : vector<256x256xf32> to vector<8x256xf32>
    %121 = arith.mulf %110, %120 : vector<8x256xf32>
    %122 = arith.subf %109, %121 : vector<8x256xf32>
    %123 = vector.extract_strided_slice %2 {offsets = [64, 0], sizes = [8, 256], strides = [1, 1]} : vector<256x256xf32> to vector<8x256xf32>
    %124 = vector.extract_strided_slice %2 {offsets = [192, 0], sizes = [8, 256], strides = [1, 1]} : vector<256x256xf32> to vector<8x256xf32>
    %125 = arith.mulf %123, %124 : vector<8x256xf32>
    %126 = arith.subf %113, %125 : vector<8x256xf32>
    %127 = vector.extract_strided_slice %2 {offsets = [216, 0], sizes = [8, 256], strides = [1, 1]} : vector<256x256xf32> to vector<8x256xf32>
    %128 = arith.mulf %123, %127 : vector<8x256xf32>
    %129 = arith.subf %116, %128 : vector<8x256xf32>
    %130 = vector.extract_strided_slice %2 {offsets = [152, 0], sizes = [8, 256], strides = [1, 1]} : vector<256x256xf32> to vector<8x256xf32>
    %131 = arith.mulf %123, %130 : vector<8x256xf32>
    %132 = arith.subf %119, %131 : vector<8x256xf32>
    %133 = vector.extract_strided_slice %2 {offsets = [144, 0], sizes = [8, 256], strides = [1, 1]} : vector<256x256xf32> to vector<8x256xf32>
    %134 = arith.mulf %123, %133 : vector<8x256xf32>
    %135 = arith.addf %122, %134 : vector<8x256xf32>
    %136 = vector.extract_strided_slice %2 {offsets = [72, 0], sizes = [8, 256], strides = [1, 1]} : vector<256x256xf32> to vector<8x256xf32>
    %137 = vector.extract_strided_slice %2 {offsets = [200, 0], sizes = [8, 256], strides = [1, 1]} : vector<256x256xf32> to vector<8x256xf32>
    %138 = arith.mulf %136, %137 : vector<8x256xf32>
    %139 = arith.subf %126, %138 : vector<8x256xf32>
    %140 = vector.extract_strided_slice %2 {offsets = [224, 0], sizes = [8, 256], strides = [1, 1]} : vector<256x256xf32> to vector<8x256xf32>
    %141 = arith.mulf %136, %140 : vector<8x256xf32>
    %142 = arith.subf %129, %141 : vector<8x256xf32>
    %143 = vector.extract_strided_slice %2 {offsets = [160, 0], sizes = [8, 256], strides = [1, 1]} : vector<256x256xf32> to vector<8x256xf32>
    %144 = arith.mulf %136, %143 : vector<8x256xf32>
    %145 = arith.subf %132, %144 : vector<8x256xf32>
    %146 = vector.extract_strided_slice %2 {offsets = [240, 0], sizes = [8, 256], strides = [1, 1]} : vector<256x256xf32> to vector<8x256xf32>
    %147 = arith.mulf %136, %146 : vector<8x256xf32>
    %148 = arith.addf %135, %147 : vector<8x256xf32>
    %149 = vector.extract_strided_slice %2 {offsets = [80, 0], sizes = [8, 256], strides = [1, 1]} : vector<256x256xf32> to vector<8x256xf32>
    %150 = vector.extract_strided_slice %2 {offsets = [208, 0], sizes = [8, 256], strides = [1, 1]} : vector<256x256xf32> to vector<8x256xf32>
    %151 = arith.mulf %149, %150 : vector<8x256xf32>
    %152 = arith.subf %139, %151 : vector<8x256xf32>
    %153 = vector.extract_strided_slice %2 {offsets = [232, 0], sizes = [8, 256], strides = [1, 1]} : vector<256x256xf32> to vector<8x256xf32>
    %154 = arith.mulf %149, %153 : vector<8x256xf32>
    %155 = arith.subf %142, %154 : vector<8x256xf32>
    %156 = vector.extract_strided_slice %2 {offsets = [240, 0], sizes = [8, 256], strides = [1, 1]} : vector<256x256xf32> to vector<8x256xf32>
    %157 = arith.mulf %149, %156 : vector<8x256xf32>
    %158 = arith.subf %145, %157 : vector<8x256xf32>
    %159 = vector.extract_strided_slice %2 {offsets = [160, 0], sizes = [8, 256], strides = [1, 1]} : vector<256x256xf32> to vector<8x256xf32>
    %160 = arith.mulf %149, %159 : vector<8x256xf32>
    %161 = arith.subf %148, %160 : vector<8x256xf32>
    %162 = vector.extract_strided_slice %2 {offsets = [88, 0], sizes = [8, 256], strides = [1, 1]} : vector<256x256xf32> to vector<8x256xf32>
    %163 = vector.extract_strided_slice %2 {offsets = [216, 0], sizes = [8, 256], strides = [1, 1]} : vector<256x256xf32> to vector<8x256xf32>
    %164 = arith.mulf %162, %163 : vector<8x256xf32>
    %165 = arith.subf %152, %164 : vector<8x256xf32>
    %166 = vector.extract_strided_slice %2 {offsets = [192, 0], sizes = [8, 256], strides = [1, 1]} : vector<256x256xf32> to vector<8x256xf32>
    %167 = arith.mulf %162, %166 : vector<8x256xf32>
    %168 = arith.subf %155, %167 : vector<8x256xf32>
    %169 = vector.extract_strided_slice %2 {offsets = [176, 0], sizes = [8, 256], strides = [1, 1]} : vector<256x256xf32> to vector<8x256xf32>
    %170 = arith.mulf %162, %169 : vector<8x256xf32>
    %171 = arith.subf %158, %170 : vector<8x256xf32>
    %172 = vector.extract_strided_slice %2 {offsets = [168, 0], sizes = [8, 256], strides = [1, 1]} : vector<256x256xf32> to vector<8x256xf32>
    %173 = arith.mulf %162, %172 : vector<8x256xf32>
    %174 = arith.addf %161, %173 : vector<8x256xf32>
    %175 = vector.extract_strided_slice %2 {offsets = [96, 0], sizes = [8, 256], strides = [1, 1]} : vector<256x256xf32> to vector<8x256xf32>
    %176 = vector.extract_strided_slice %2 {offsets = [224, 0], sizes = [8, 256], strides = [1, 1]} : vector<256x256xf32> to vector<8x256xf32>
    %177 = arith.mulf %175, %176 : vector<8x256xf32>
    %178 = arith.subf %165, %177 : vector<8x256xf32>
    %179 = vector.extract_strided_slice %2 {offsets = [200, 0], sizes = [8, 256], strides = [1, 1]} : vector<256x256xf32> to vector<8x256xf32>
    %180 = arith.mulf %175, %179 : vector<8x256xf32>
    %181 = arith.subf %168, %180 : vector<8x256xf32>
    %182 = vector.extract_strided_slice %2 {offsets = [184, 0], sizes = [8, 256], strides = [1, 1]} : vector<256x256xf32> to vector<8x256xf32>
    %183 = arith.mulf %175, %182 : vector<8x256xf32>
    %184 = arith.subf %171, %183 : vector<8x256xf32>
    %185 = vector.extract_strided_slice %2 {offsets = [248, 0], sizes = [8, 256], strides = [1, 1]} : vector<256x256xf32> to vector<8x256xf32>
    %186 = arith.mulf %175, %185 : vector<8x256xf32>
    %187 = arith.addf %174, %186 : vector<8x256xf32>
    %188 = vector.extract_strided_slice %2 {offsets = [104, 0], sizes = [8, 256], strides = [1, 1]} : vector<256x256xf32> to vector<8x256xf32>
    %189 = vector.extract_strided_slice %2 {offsets = [232, 0], sizes = [8, 256], strides = [1, 1]} : vector<256x256xf32> to vector<8x256xf32>
    %190 = arith.mulf %188, %189 : vector<8x256xf32>
    %191 = arith.subf %178, %190 : vector<8x256xf32>
    %192 = vector.extract_strided_slice %2 {offsets = [208, 0], sizes = [8, 256], strides = [1, 1]} : vector<256x256xf32> to vector<8x256xf32>
    %193 = arith.mulf %188, %192 : vector<8x256xf32>
    %194 = arith.subf %181, %193 : vector<8x256xf32>
    %195 = vector.extract_strided_slice %2 {offsets = [248, 0], sizes = [8, 256], strides = [1, 1]} : vector<256x256xf32> to vector<8x256xf32>
    %196 = arith.mulf %188, %195 : vector<8x256xf32>
    %197 = arith.subf %184, %196 : vector<8x256xf32>
    %198 = vector.extract_strided_slice %2 {offsets = [184, 0], sizes = [8, 256], strides = [1, 1]} : vector<256x256xf32> to vector<8x256xf32>
    %199 = arith.mulf %188, %198 : vector<8x256xf32>
    %200 = arith.subf %187, %199 : vector<8x256xf32>
    %201 = vector.extract_strided_slice %2 {offsets = [112, 0], sizes = [8, 256], strides = [1, 1]} : vector<256x256xf32> to vector<8x256xf32>
    %202 = vector.extract_strided_slice %2 {offsets = [240, 0], sizes = [8, 256], strides = [1, 1]} : vector<256x256xf32> to vector<8x256xf32>
    %203 = arith.mulf %201, %202 : vector<8x256xf32>
    %204 = arith.addf %191, %203 : vector<8x256xf32>
    %205 = vector.extract_strided_slice %2 {offsets = [248, 0], sizes = [8, 256], strides = [1, 1]} : vector<256x256xf32> to vector<8x256xf32>
    %206 = arith.mulf %201, %205 : vector<8x256xf32>
    %207 = arith.subf %194, %206 : vector<8x256xf32>
    %208 = vector.extract_strided_slice %2 {offsets = [208, 0], sizes = [8, 256], strides = [1, 1]} : vector<256x256xf32> to vector<8x256xf32>
    %209 = arith.mulf %201, %208 : vector<8x256xf32>
    %210 = arith.subf %197, %209 : vector<8x256xf32>
    %211 = vector.extract_strided_slice %2 {offsets = [200, 0], sizes = [8, 256], strides = [1, 1]} : vector<256x256xf32> to vector<8x256xf32>
    %212 = arith.mulf %201, %211 : vector<8x256xf32>
    %213 = arith.addf %200, %212 : vector<8x256xf32>
    %214 = vector.extract_strided_slice %2 {offsets = [120, 0], sizes = [8, 256], strides = [1, 1]} : vector<256x256xf32> to vector<8x256xf32>
    %215 = vector.extract_strided_slice %2 {offsets = [248, 0], sizes = [8, 256], strides = [1, 1]} : vector<256x256xf32> to vector<8x256xf32>
    %216 = arith.mulf %214, %215 : vector<8x256xf32>
    %217 = arith.subf %204, %216 : vector<8x256xf32>
    %218 = vector.extract_strided_slice %2 {offsets = [240, 0], sizes = [8, 256], strides = [1, 1]} : vector<256x256xf32> to vector<8x256xf32>
    %219 = arith.mulf %214, %218 : vector<8x256xf32>
    %220 = arith.addf %207, %219 : vector<8x256xf32>
    %221 = vector.extract_strided_slice %2 {offsets = [232, 0], sizes = [8, 256], strides = [1, 1]} : vector<256x256xf32> to vector<8x256xf32>
    %222 = arith.mulf %214, %221 : vector<8x256xf32>
    %223 = arith.addf %210, %222 : vector<8x256xf32>
    %224 = vector.extract_strided_slice %2 {offsets = [224, 0], sizes = [8, 256], strides = [1, 1]} : vector<256x256xf32> to vector<8x256xf32>
    %225 = arith.mulf %214, %224 : vector<8x256xf32>
    %226 = arith.subf %213, %225 : vector<8x256xf32>
    %227 = tpu.concatenate %217, %220, %223, %226 in 0 : vector<8x256xf32>, vector<8x256xf32>, vector<8x256xf32>, vector<8x256xf32> -> vector<32x256xf32>
    %c0_10 = arith.constant 0 : index
    %c0_11 = arith.constant 0 : index
    %228 = vector.load %arg9[%c0_10, %c0_11] : memref<160x256xf32, #tpu.memory_space<vmem>>, vector<32x256xf32>
    tpu.vector_store %arg9[%c0_10, %c0_11], %227 {strides = array<i32>} : memref<160x256xf32, #tpu.memory_space<vmem>>, vector<32x256xf32>,
    %229 = vector.extract_strided_slice %2 {offsets = [0, 0], sizes = [8, 256], strides = [1, 1]} : vector<256x256xf32> to vector<8x256xf32>
    %230 = vector.extract_strided_slice %5 {offsets = [0, 0], sizes = [8, 256], strides = [1, 1]} : vector<16x256xf32> to vector<8x256xf32>
    %231 = arith.addf %229, %230 : vector<8x256xf32>
    %232 = vector.extract_strided_slice %2 {offsets = [160, 0], sizes = [8, 256], strides = [1, 1]} : vector<256x256xf32> to vector<8x256xf32>
    %233 = arith.mulf %231, %232 : vector<8x256xf32>
    %234 = vector.extract_strided_slice %2 {offsets = [168, 0], sizes = [8, 256], strides = [1, 1]} : vector<256x256xf32> to vector<8x256xf32>
    %235 = arith.mulf %231, %234 : vector<8x256xf32>
    %236 = vector.extract_strided_slice %2 {offsets = [176, 0], sizes = [8, 256], strides = [1, 1]} : vector<256x256xf32> to vector<8x256xf32>
    %237 = arith.mulf %231, %236 : vector<8x256xf32>
    %238 = vector.extract_strided_slice %2 {offsets = [184, 0], sizes = [8, 256], strides = [1, 1]} : vector<256x256xf32> to vector<8x256xf32>
    %239 = arith.mulf %231, %238 : vector<8x256xf32>
    %240 = vector.extract_strided_slice %2 {offsets = [8, 0], sizes = [8, 256], strides = [1, 1]} : vector<256x256xf32> to vector<8x256xf32>
    %241 = vector.extract_strided_slice %2 {offsets = [184, 0], sizes = [8, 256], strides = [1, 1]} : vector<256x256xf32> to vector<8x256xf32>
    %242 = arith.mulf %240, %241 : vector<8x256xf32>
    %243 = arith.addf %233, %242 : vector<8x256xf32>
    %244 = vector.extract_strided_slice %2 {offsets = [144, 0], sizes = [8, 256], strides = [1, 1]} : vector<256x256xf32> to vector<8x256xf32>
    %245 = arith.mulf %240, %244 : vector<8x256xf32>
    %246 = arith.addf %235, %245 : vector<8x256xf32>
    %247 = vector.extract_strided_slice %2 {offsets = [152, 0], sizes = [8, 256], strides = [1, 1]} : vector<256x256xf32> to vector<8x256xf32>
    %248 = arith.mulf %240, %247 : vector<8x256xf32>
    %249 = arith.addf %237, %248 : vector<8x256xf32>
    %250 = vector.extract_strided_slice %2 {offsets = [160, 0], sizes = [8, 256], strides = [1, 1]} : vector<256x256xf32> to vector<8x256xf32>
    %251 = arith.mulf %240, %250 : vector<8x256xf32>
    %252 = arith.addf %239, %251 : vector<8x256xf32>
    %253 = vector.extract_strided_slice %2 {offsets = [16, 0], sizes = [8, 256], strides = [1, 1]} : vector<256x256xf32> to vector<8x256xf32>
    %254 = vector.extract_strided_slice %2 {offsets = [200, 0], sizes = [8, 256], strides = [1, 1]} : vector<256x256xf32> to vector<8x256xf32>
    %255 = arith.mulf %253, %254 : vector<8x256xf32>
    %256 = arith.subf %243, %255 : vector<8x256xf32>
    %257 = vector.extract_strided_slice %2 {offsets = [136, 0], sizes = [8, 256], strides = [1, 1]} : vector<256x256xf32> to vector<8x256xf32>
    %258 = arith.mulf %253, %257 : vector<8x256xf32>
    %259 = arith.subf %246, %258 : vector<8x256xf32>
    %260 = vector.extract_strided_slice %2 {offsets = [216, 0], sizes = [8, 256], strides = [1, 1]} : vector<256x256xf32> to vector<8x256xf32>
    %261 = arith.mulf %253, %260 : vector<8x256xf32>
    %262 = arith.addf %249, %261 : vector<8x256xf32>
    %263 = vector.extract_strided_slice %2 {offsets = [224, 0], sizes = [8, 256], strides = [1, 1]} : vector<256x256xf32> to vector<8x256xf32>
    %264 = arith.mulf %253, %263 : vector<8x256xf32>
    %265 = arith.addf %252, %264 : vector<8x256xf32>
    %266 = vector.extract_strided_slice %2 {offsets = [24, 0], sizes = [8, 256], strides = [1, 1]} : vector<256x256xf32> to vector<8x256xf32>
    %267 = vector.extract_strided_slice %2 {offsets = [208, 0], sizes = [8, 256], strides = [1, 1]} : vector<256x256xf32> to vector<8x256xf32>
    %268 = arith.mulf %266, %267 : vector<8x256xf32>
    %269 = arith.subf %256, %268 : vector<8x256xf32>
    %270 = vector.extract_strided_slice %2 {offsets = [216, 0], sizes = [8, 256], strides = [1, 1]} : vector<256x256xf32> to vector<8x256xf32>
    %271 = arith.mulf %266, %270 : vector<8x256xf32>
    %272 = arith.subf %259, %271 : vector<8x256xf32>
    %273 = vector.extract_strided_slice %2 {offsets = [136, 0], sizes = [8, 256], strides = [1, 1]} : vector<256x256xf32> to vector<8x256xf32>
    %274 = arith.mulf %266, %273 : vector<8x256xf32>
    %275 = arith.subf %262, %274 : vector<8x256xf32>
    %276 = vector.extract_strided_slice %2 {offsets = [232, 0], sizes = [8, 256], strides = [1, 1]} : vector<256x256xf32> to vector<8x256xf32>
    %277 = arith.mulf %266, %276 : vector<8x256xf32>
    %278 = arith.addf %265, %277 : vector<8x256xf32>
    %279 = vector.extract_strided_slice %2 {offsets = [32, 0], sizes = [8, 256], strides = [1, 1]} : vector<256x256xf32> to vector<8x256xf32>
    %280 = vector.extract_strided_slice %2 {offsets = [128, 0], sizes = [8, 256], strides = [1, 1]} : vector<256x256xf32> to vector<8x256xf32>
    %281 = vector.extract_strided_slice %5 {offsets = [8, 0], sizes = [8, 256], strides = [1, 1]} : vector<16x256xf32> to vector<8x256xf32>
    %282 = arith.addf %280, %281 : vector<8x256xf32>
    %283 = arith.mulf %279, %282 : vector<8x256xf32>
    %284 = arith.addf %269, %283 : vector<8x256xf32>
    %285 = vector.extract_strided_slice %2 {offsets = [224, 0], sizes = [8, 256], strides = [1, 1]} : vector<256x256xf32> to vector<8x256xf32>
    %286 = arith.mulf %279, %285 : vector<8x256xf32>
    %287 = arith.subf %272, %286 : vector<8x256xf32>
    %288 = vector.extract_strided_slice %2 {offsets = [232, 0], sizes = [8, 256], strides = [1, 1]} : vector<256x256xf32> to vector<8x256xf32>
    %289 = arith.mulf %279, %288 : vector<8x256xf32>
    %290 = arith.subf %275, %289 : vector<8x256xf32>
    %291 = vector.extract_strided_slice %2 {offsets = [136, 0], sizes = [8, 256], strides = [1, 1]} : vector<256x256xf32> to vector<8x256xf32>
    %292 = arith.mulf %279, %291 : vector<8x256xf32>
    %293 = arith.subf %278, %292 : vector<8x256xf32>
    %294 = vector.extract_strided_slice %2 {offsets = [40, 0], sizes = [8, 256], strides = [1, 1]} : vector<256x256xf32> to vector<8x256xf32>
    %295 = vector.extract_strided_slice %2 {offsets = [224, 0], sizes = [8, 256], strides = [1, 1]} : vector<256x256xf32> to vector<8x256xf32>
    %296 = arith.mulf %294, %295 : vector<8x256xf32>
    %297 = arith.addf %284, %296 : vector<8x256xf32>
    %298 = vector.extract_strided_slice %2 {offsets = [128, 0], sizes = [8, 256], strides = [1, 1]} : vector<256x256xf32> to vector<8x256xf32>
    %299 = vector.extract_strided_slice %5 {offsets = [8, 0], sizes = [8, 256], strides = [1, 1]} : vector<16x256xf32> to vector<8x256xf32>
    %300 = arith.addf %298, %299 : vector<8x256xf32>
    %301 = arith.mulf %294, %300 : vector<8x256xf32>
    %302 = arith.addf %287, %301 : vector<8x256xf32>
    %303 = vector.extract_strided_slice %2 {offsets = [192, 0], sizes = [8, 256], strides = [1, 1]} : vector<256x256xf32> to vector<8x256xf32>
    %304 = arith.mulf %294, %303 : vector<8x256xf32>
    %305 = arith.subf %290, %304 : vector<8x256xf32>
    %306 = vector.extract_strided_slice %2 {offsets = [200, 0], sizes = [8, 256], strides = [1, 1]} : vector<256x256xf32> to vector<8x256xf32>
    %307 = arith.mulf %294, %306 : vector<8x256xf32>
    %308 = arith.subf %293, %307 : vector<8x256xf32>
    %309 = vector.extract_strided_slice %2 {offsets = [48, 0], sizes = [8, 256], strides = [1, 1]} : vector<256x256xf32> to vector<8x256xf32>
    %310 = vector.extract_strided_slice %2 {offsets = [232, 0], sizes = [8, 256], strides = [1, 1]} : vector<256x256xf32> to vector<8x256xf32>
    %311 = arith.mulf %309, %310 : vector<8x256xf32>
    %312 = arith.addf %297, %311 : vector<8x256xf32>
    %313 = vector.extract_strided_slice %2 {offsets = [192, 0], sizes = [8, 256], strides = [1, 1]} : vector<256x256xf32> to vector<8x256xf32>
    %314 = arith.mulf %309, %313 : vector<8x256xf32>
    %315 = arith.addf %302, %314 : vector<8x256xf32>
    %316 = vector.extract_strided_slice %2 {offsets = [128, 0], sizes = [8, 256], strides = [1, 1]} : vector<256x256xf32> to vector<8x256xf32>
    %317 = vector.extract_strided_slice %5 {offsets = [8, 0], sizes = [8, 256], strides = [1, 1]} : vector<16x256xf32> to vector<8x256xf32>
    %318 = arith.addf %316, %317 : vector<8x256xf32>
    %319 = arith.mulf %309, %318 : vector<8x256xf32>
    %320 = arith.addf %305, %319 : vector<8x256xf32>
    %321 = vector.extract_strided_slice %2 {offsets = [208, 0], sizes = [8, 256], strides = [1, 1]} : vector<256x256xf32> to vector<8x256xf32>
    %322 = arith.mulf %309, %321 : vector<8x256xf32>
    %323 = arith.subf %308, %322 : vector<8x256xf32>
    %324 = vector.extract_strided_slice %2 {offsets = [56, 0], sizes = [8, 256], strides = [1, 1]} : vector<256x256xf32> to vector<8x256xf32>
    %325 = vector.extract_strided_slice %2 {offsets = [136, 0], sizes = [8, 256], strides = [1, 1]} : vector<256x256xf32> to vector<8x256xf32>
    %326 = arith.mulf %324, %325 : vector<8x256xf32>
    %327 = arith.subf %312, %326 : vector<8x256xf32>
    %328 = vector.extract_strided_slice %2 {offsets = [200, 0], sizes = [8, 256], strides = [1, 1]} : vector<256x256xf32> to vector<8x256xf32>
    %329 = arith.mulf %324, %328 : vector<8x256xf32>
    %330 = arith.addf %315, %329 : vector<8x256xf32>
    %331 = vector.extract_strided_slice %2 {offsets = [208, 0], sizes = [8, 256], strides = [1, 1]} : vector<256x256xf32> to vector<8x256xf32>
    %332 = arith.mulf %324, %331 : vector<8x256xf32>
    %333 = arith.addf %320, %332 : vector<8x256xf32>
    %334 = vector.extract_strided_slice %2 {offsets = [128, 0], sizes = [8, 256], strides = [1, 1]} : vector<256x256xf32> to vector<8x256xf32>
    %335 = vector.extract_strided_slice %5 {offsets = [8, 0], sizes = [8, 256], strides = [1, 1]} : vector<16x256xf32> to vector<8x256xf32>
    %336 = arith.addf %334, %335 : vector<8x256xf32>
    %337 = arith.mulf %324, %336 : vector<8x256xf32>
    %338 = arith.addf %323, %337 : vector<8x256xf32>
    %339 = vector.extract_strided_slice %2 {offsets = [64, 0], sizes = [8, 256], strides = [1, 1]} : vector<256x256xf32> to vector<8x256xf32>
    %340 = vector.extract_strided_slice %2 {offsets = [240, 0], sizes = [8, 256], strides = [1, 1]} : vector<256x256xf32> to vector<8x256xf32>
    %341 = arith.mulf %339, %340 : vector<8x256xf32>
    %342 = arith.subf %327, %341 : vector<8x256xf32>
    %343 = vector.extract_strided_slice %2 {offsets = [176, 0], sizes = [8, 256], strides = [1, 1]} : vector<256x256xf32> to vector<8x256xf32>
    %344 = arith.mulf %339, %343 : vector<8x256xf32>
    %345 = arith.subf %330, %344 : vector<8x256xf32>
    %346 = vector.extract_strided_slice %2 {offsets = [168, 0], sizes = [8, 256], strides = [1, 1]} : vector<256x256xf32> to vector<8x256xf32>
    %347 = arith.mulf %339, %346 : vector<8x256xf32>
    %348 = arith.addf %333, %347 : vector<8x256xf32>
    %349 = vector.extract_strided_slice %2 {offsets = [248, 0], sizes = [8, 256], strides = [1, 1]} : vector<256x256xf32> to vector<8x256xf32>
    %350 = arith.mulf %339, %349 : vector<8x256xf32>
    %351 = arith.subf %338, %350 : vector<8x256xf32>
    %352 = vector.extract_strided_slice %2 {offsets = [72, 0], sizes = [8, 256], strides = [1, 1]} : vector<256x256xf32> to vector<8x256xf32>
    %353 = vector.extract_strided_slice %2 {offsets = [144, 0], sizes = [8, 256], strides = [1, 1]} : vector<256x256xf32> to vector<8x256xf32>
    %354 = arith.mulf %352, %353 : vector<8x256xf32>
    %355 = arith.addf %342, %354 : vector<8x256xf32>
    %356 = vector.extract_strided_slice %2 {offsets = [184, 0], sizes = [8, 256], strides = [1, 1]} : vector<256x256xf32> to vector<8x256xf32>
    %357 = arith.mulf %352, %356 : vector<8x256xf32>
    %358 = arith.subf %345, %357 : vector<8x256xf32>
    %359 = vector.extract_strided_slice %2 {offsets = [248, 0], sizes = [8, 256], strides = [1, 1]} : vector<256x256xf32> to vector<8x256xf32>
    %360 = arith.mulf %352, %359 : vector<8x256xf32>
    %361 = arith.addf %348, %360 : vector<8x256xf32>
    %362 = vector.extract_strided_slice %2 {offsets = [168, 0], sizes = [8, 256], strides = [1, 1]} : vector<256x256xf32> to vector<8x256xf32>
    %363 = arith.mulf %352, %362 : vector<8x256xf32>
    %364 = arith.addf %351, %363 : vector<8x256xf32>
    %365 = vector.extract_strided_slice %2 {offsets = [80, 0], sizes = [8, 256], strides = [1, 1]} : vector<256x256xf32> to vector<8x256xf32>
    %366 = vector.extract_strided_slice %2 {offsets = [152, 0], sizes = [8, 256], strides = [1, 1]} : vector<256x256xf32> to vector<8x256xf32>
    %367 = arith.mulf %365, %366 : vector<8x256xf32>
    %368 = arith.addf %355, %367 : vector<8x256xf32>
    %369 = vector.extract_strided_slice %2 {offsets = [248, 0], sizes = [8, 256], strides = [1, 1]} : vector<256x256xf32> to vector<8x256xf32>
    %370 = arith.mulf %365, %369 : vector<8x256xf32>
    %371 = arith.subf %358, %370 : vector<8x256xf32>
    %372 = vector.extract_strided_slice %2 {offsets = [184, 0], sizes = [8, 256], strides = [1, 1]} : vector<256x256xf32> to vector<8x256xf32>
    %373 = arith.mulf %365, %372 : vector<8x256xf32>
    %374 = arith.subf %361, %373 : vector<8x256xf32>
    %375 = vector.extract_strided_slice %2 {offsets = [176, 0], sizes = [8, 256], strides = [1, 1]} : vector<256x256xf32> to vector<8x256xf32>
    %376 = arith.mulf %365, %375 : vector<8x256xf32>
    %377 = arith.addf %364, %376 : vector<8x256xf32>
    %378 = vector.extract_strided_slice %2 {offsets = [88, 0], sizes = [8, 256], strides = [1, 1]} : vector<256x256xf32> to vector<8x256xf32>
    %379 = vector.extract_strided_slice %2 {offsets = [248, 0], sizes = [8, 256], strides = [1, 1]} : vector<256x256xf32> to vector<8x256xf32>
    %380 = arith.mulf %378, %379 : vector<8x256xf32>
    %381 = arith.subf %368, %380 : vector<8x256xf32>
    %382 = vector.extract_strided_slice %2 {offsets = [152, 0], sizes = [8, 256], strides = [1, 1]} : vector<256x256xf32> to vector<8x256xf32>
    %383 = arith.mulf %378, %382 : vector<8x256xf32>
    %384 = arith.subf %371, %383 : vector<8x256xf32>
    %385 = vector.extract_strided_slice %2 {offsets = [144, 0], sizes = [8, 256], strides = [1, 1]} : vector<256x256xf32> to vector<8x256xf32>
    %386 = arith.mulf %378, %385 : vector<8x256xf32>
    %387 = arith.addf %374, %386 : vector<8x256xf32>
    %388 = vector.extract_strided_slice %2 {offsets = [240, 0], sizes = [8, 256], strides = [1, 1]} : vector<256x256xf32> to vector<8x256xf32>
    %389 = arith.mulf %378, %388 : vector<8x256xf32>
    %390 = arith.subf %377, %389 : vector<8x256xf32>
    %391 = vector.extract_strided_slice %2 {offsets = [96, 0], sizes = [8, 256], strides = [1, 1]} : vector<256x256xf32> to vector<8x256xf32>
    %392 = vector.extract_strided_slice %2 {offsets = [168, 0], sizes = [8, 256], strides = [1, 1]} : vector<256x256xf32> to vector<8x256xf32>
    %393 = arith.mulf %391, %392 : vector<8x256xf32>
    %394 = arith.addf %381, %393 : vector<8x256xf32>
    %395 = vector.extract_strided_slice %2 {offsets = [160, 0], sizes = [8, 256], strides = [1, 1]} : vector<256x256xf32> to vector<8x256xf32>
    %396 = arith.mulf %391, %395 : vector<8x256xf32>
    %397 = arith.subf %384, %396 : vector<8x256xf32>
    %398 = vector.extract_strided_slice %2 {offsets = [240, 0], sizes = [8, 256], strides = [1, 1]} : vector<256x256xf32> to vector<8x256xf32>
    %399 = arith.mulf %391, %398 : vector<8x256xf32>
    %400 = arith.addf %387, %399 : vector<8x256xf32>
    %401 = vector.extract_strided_slice %2 {offsets = [144, 0], sizes = [8, 256], strides = [1, 1]} : vector<256x256xf32> to vector<8x256xf32>
    %402 = arith.mulf %391, %401 : vector<8x256xf32>
    %403 = arith.addf %390, %402 : vector<8x256xf32>
    %404 = vector.extract_strided_slice %2 {offsets = [104, 0], sizes = [8, 256], strides = [1, 1]} : vector<256x256xf32> to vector<8x256xf32>
    %405 = vector.extract_strided_slice %2 {offsets = [176, 0], sizes = [8, 256], strides = [1, 1]} : vector<256x256xf32> to vector<8x256xf32>
    %406 = arith.mulf %404, %405 : vector<8x256xf32>
    %407 = arith.addf %394, %406 : vector<8x256xf32>
    %408 = vector.extract_strided_slice %2 {offsets = [240, 0], sizes = [8, 256], strides = [1, 1]} : vector<256x256xf32> to vector<8x256xf32>
    %409 = arith.mulf %404, %408 : vector<8x256xf32>
    %410 = arith.subf %397, %409 : vector<8x256xf32>
    %411 = vector.extract_strided_slice %2 {offsets = [160, 0], sizes = [8, 256], strides = [1, 1]} : vector<256x256xf32> to vector<8x256xf32>
    %412 = arith.mulf %404, %411 : vector<8x256xf32>
    %413 = arith.subf %400, %412 : vector<8x256xf32>
    %414 = vector.extract_strided_slice %2 {offsets = [152, 0], sizes = [8, 256], strides = [1, 1]} : vector<256x256xf32> to vector<8x256xf32>
    %415 = arith.mulf %404, %414 : vector<8x256xf32>
    %416 = arith.addf %403, %415 : vector<8x256xf32>
    %417 = vector.extract_strided_slice %2 {offsets = [112, 0], sizes = [8, 256], strides = [1, 1]} : vector<256x256xf32> to vector<8x256xf32>
    %418 = vector.extract_strided_slice %2 {offsets = [192, 0], sizes = [8, 256], strides = [1, 1]} : vector<256x256xf32> to vector<8x256xf32>
    %419 = arith.mulf %417, %418 : vector<8x256xf32>
    %420 = arith.subf %407, %419 : vector<8x256xf32>
    %421 = vector.extract_strided_slice %2 {offsets = [232, 0], sizes = [8, 256], strides = [1, 1]} : vector<256x256xf32> to vector<8x256xf32>
    %422 = arith.mulf %417, %421 : vector<8x256xf32>
    %423 = arith.addf %410, %422 : vector<8x256xf32>
    %424 = vector.extract_strided_slice %2 {offsets = [224, 0], sizes = [8, 256], strides = [1, 1]} : vector<256x256xf32> to vector<8x256xf32>
    %425 = arith.mulf %417, %424 : vector<8x256xf32>
    %426 = arith.subf %413, %425 : vector<8x256xf32>
    %427 = vector.extract_strided_slice %2 {offsets = [216, 0], sizes = [8, 256], strides = [1, 1]} : vector<256x256xf32> to vector<8x256xf32>
    %428 = arith.mulf %417, %427 : vector<8x256xf32>
    %429 = arith.addf %416, %428 : vector<8x256xf32>
    %430 = vector.extract_strided_slice %2 {offsets = [120, 0], sizes = [8, 256], strides = [1, 1]} : vector<256x256xf32> to vector<8x256xf32>
    %431 = vector.extract_strided_slice %2 {offsets = [216, 0], sizes = [8, 256], strides = [1, 1]} : vector<256x256xf32> to vector<8x256xf32>
    %432 = arith.mulf %430, %431 : vector<8x256xf32>
    %433 = arith.addf %420, %432 : vector<8x256xf32>
    %434 = vector.extract_strided_slice %2 {offsets = [208, 0], sizes = [8, 256], strides = [1, 1]} : vector<256x256xf32> to vector<8x256xf32>
    %435 = arith.mulf %430, %434 : vector<8x256xf32>
    %436 = arith.subf %423, %435 : vector<8x256xf32>
    %437 = vector.extract_strided_slice %2 {offsets = [200, 0], sizes = [8, 256], strides = [1, 1]} : vector<256x256xf32> to vector<8x256xf32>
    %438 = arith.mulf %430, %437 : vector<8x256xf32>
    %439 = arith.addf %426, %438 : vector<8x256xf32>
    %440 = vector.extract_strided_slice %2 {offsets = [192, 0], sizes = [8, 256], strides = [1, 1]} : vector<256x256xf32> to vector<8x256xf32>
    %441 = arith.mulf %430, %440 : vector<8x256xf32>
    %442 = arith.subf %429, %441 : vector<8x256xf32>
    %443 = tpu.concatenate %433, %436, %439, %442 in 0 : vector<8x256xf32>, vector<8x256xf32>, vector<8x256xf32>, vector<8x256xf32> -> vector<32x256xf32>
    %c32 = arith.constant 32 : index
    %c0_12 = arith.constant 0 : index
    %444 = vector.load %arg9[%c32, %c0_12] : memref<160x256xf32, #tpu.memory_space<vmem>>, vector<32x256xf32>
    tpu.vector_store %arg9[%c32, %c0_12], %443 {strides = array<i32>} : memref<160x256xf32, #tpu.memory_space<vmem>>, vector<32x256xf32>,
    %445 = vector.extract_strided_slice %2 {offsets = [0, 0], sizes = [8, 256], strides = [1, 1]} : vector<256x256xf32> to vector<8x256xf32>
    %446 = vector.extract_strided_slice %5 {offsets = [0, 0], sizes = [8, 256], strides = [1, 1]} : vector<16x256xf32> to vector<8x256xf32>
    %447 = arith.addf %445, %446 : vector<8x256xf32>
    %448 = vector.extract_strided_slice %2 {offsets = [192, 0], sizes = [8, 256], strides = [1, 1]} : vector<256x256xf32> to vector<8x256xf32>
    %449 = arith.mulf %447, %448 : vector<8x256xf32>
    %450 = vector.extract_strided_slice %2 {offsets = [200, 0], sizes = [8, 256], strides = [1, 1]} : vector<256x256xf32> to vector<8x256xf32>
    %451 = arith.mulf %447, %450 : vector<8x256xf32>
    %452 = vector.extract_strided_slice %2 {offsets = [208, 0], sizes = [8, 256], strides = [1, 1]} : vector<256x256xf32> to vector<8x256xf32>
    %453 = arith.mulf %447, %452 : vector<8x256xf32>
    %454 = vector.extract_strided_slice %2 {offsets = [216, 0], sizes = [8, 256], strides = [1, 1]} : vector<256x256xf32> to vector<8x256xf32>
    %455 = arith.mulf %447, %454 : vector<8x256xf32>
    %456 = vector.extract_strided_slice %2 {offsets = [8, 0], sizes = [8, 256], strides = [1, 1]} : vector<256x256xf32> to vector<8x256xf32>
    %457 = vector.extract_strided_slice %2 {offsets = [216, 0], sizes = [8, 256], strides = [1, 1]} : vector<256x256xf32> to vector<8x256xf32>
    %458 = arith.mulf %456, %457 : vector<8x256xf32>
    %459 = arith.addf %449, %458 : vector<8x256xf32>
    %460 = vector.extract_strided_slice %2 {offsets = [224, 0], sizes = [8, 256], strides = [1, 1]} : vector<256x256xf32> to vector<8x256xf32>
    %461 = arith.mulf %456, %460 : vector<8x256xf32>
    %462 = arith.addf %451, %461 : vector<8x256xf32>
    %463 = vector.extract_strided_slice %2 {offsets = [232, 0], sizes = [8, 256], strides = [1, 1]} : vector<256x256xf32> to vector<8x256xf32>
    %464 = arith.mulf %456, %463 : vector<8x256xf32>
    %465 = arith.addf %453, %464 : vector<8x256xf32>
    %466 = vector.extract_strided_slice %2 {offsets = [192, 0], sizes = [8, 256], strides = [1, 1]} : vector<256x256xf32> to vector<8x256xf32>
    %467 = arith.mulf %456, %466 : vector<8x256xf32>
    %468 = arith.addf %455, %467 : vector<8x256xf32>
    %469 = vector.extract_strided_slice %2 {offsets = [16, 0], sizes = [8, 256], strides = [1, 1]} : vector<256x256xf32> to vector<8x256xf32>
    %470 = vector.extract_strided_slice %2 {offsets = [152, 0], sizes = [8, 256], strides = [1, 1]} : vector<256x256xf32> to vector<8x256xf32>
    %471 = arith.mulf %469, %470 : vector<8x256xf32>
    %472 = arith.addf %459, %471 : vector<8x256xf32>
    %473 = vector.extract_strided_slice %2 {offsets = [160, 0], sizes = [8, 256], strides = [1, 1]} : vector<256x256xf32> to vector<8x256xf32>
    %474 = arith.mulf %469, %473 : vector<8x256xf32>
    %475 = arith.addf %462, %474 : vector<8x256xf32>
    %476 = vector.extract_strided_slice %2 {offsets = [240, 0], sizes = [8, 256], strides = [1, 1]} : vector<256x256xf32> to vector<8x256xf32>
    %477 = arith.mulf %469, %476 : vector<8x256xf32>
    %478 = arith.subf %465, %477 : vector<8x256xf32>
    %479 = vector.extract_strided_slice %2 {offsets = [176, 0], sizes = [8, 256], strides = [1, 1]} : vector<256x256xf32> to vector<8x256xf32>
    %480 = arith.mulf %469, %479 : vector<8x256xf32>
    %481 = arith.subf %468, %480 : vector<8x256xf32>
    %482 = vector.extract_strided_slice %2 {offsets = [24, 0], sizes = [8, 256], strides = [1, 1]} : vector<256x256xf32> to vector<8x256xf32>
    %483 = vector.extract_strided_slice %2 {offsets = [144, 0], sizes = [8, 256], strides = [1, 1]} : vector<256x256xf32> to vector<8x256xf32>
    %484 = arith.mulf %482, %483 : vector<8x256xf32>
    %485 = arith.subf %472, %484 : vector<8x256xf32>
    %486 = vector.extract_strided_slice %2 {offsets = [240, 0], sizes = [8, 256], strides = [1, 1]} : vector<256x256xf32> to vector<8x256xf32>
    %487 = arith.mulf %482, %486 : vector<8x256xf32>
    %488 = arith.addf %475, %487 : vector<8x256xf32>
    %489 = vector.extract_strided_slice %2 {offsets = [160, 0], sizes = [8, 256], strides = [1, 1]} : vector<256x256xf32> to vector<8x256xf32>
    %490 = arith.mulf %482, %489 : vector<8x256xf32>
    %491 = arith.addf %478, %490 : vector<8x256xf32>
    %492 = vector.extract_strided_slice %2 {offsets = [168, 0], sizes = [8, 256], strides = [1, 1]} : vector<256x256xf32> to vector<8x256xf32>
    %493 = arith.mulf %482, %492 : vector<8x256xf32>
    %494 = arith.addf %481, %493 : vector<8x256xf32>
    %495 = vector.extract_strided_slice %2 {offsets = [32, 0], sizes = [8, 256], strides = [1, 1]} : vector<256x256xf32> to vector<8x256xf32>
    %496 = vector.extract_strided_slice %2 {offsets = [240, 0], sizes = [8, 256], strides = [1, 1]} : vector<256x256xf32> to vector<8x256xf32>
    %497 = arith.mulf %495, %496 : vector<8x256xf32>
    %498 = arith.subf %485, %497 : vector<8x256xf32>
    %499 = vector.extract_strided_slice %2 {offsets = [144, 0], sizes = [8, 256], strides = [1, 1]} : vector<256x256xf32> to vector<8x256xf32>
    %500 = arith.mulf %495, %499 : vector<8x256xf32>
    %501 = arith.subf %488, %500 : vector<8x256xf32>
    %502 = vector.extract_strided_slice %2 {offsets = [152, 0], sizes = [8, 256], strides = [1, 1]} : vector<256x256xf32> to vector<8x256xf32>
    %503 = arith.mulf %495, %502 : vector<8x256xf32>
    %504 = arith.subf %491, %503 : vector<8x256xf32>
    %505 = vector.extract_strided_slice %2 {offsets = [248, 0], sizes = [8, 256], strides = [1, 1]} : vector<256x256xf32> to vector<8x256xf32>
    %506 = arith.mulf %495, %505 : vector<8x256xf32>
    %507 = arith.addf %494, %506 : vector<8x256xf32>
    %508 = vector.extract_strided_slice %2 {offsets = [40, 0], sizes = [8, 256], strides = [1, 1]} : vector<256x256xf32> to vector<8x256xf32>
    %509 = vector.extract_strided_slice %2 {offsets = [176, 0], sizes = [8, 256], strides = [1, 1]} : vector<256x256xf32> to vector<8x256xf32>
    %510 = arith.mulf %508, %509 : vector<8x256xf32>
    %511 = arith.subf %498, %510 : vector<8x256xf32>
    %512 = vector.extract_strided_slice %2 {offsets = [184, 0], sizes = [8, 256], strides = [1, 1]} : vector<256x256xf32> to vector<8x256xf32>
    %513 = arith.mulf %508, %512 : vector<8x256xf32>
    %514 = arith.subf %501, %513 : vector<8x256xf32>
    %515 = vector.extract_strided_slice %2 {offsets = [248, 0], sizes = [8, 256], strides = [1, 1]} : vector<256x256xf32> to vector<8x256xf32>
    %516 = arith.mulf %508, %515 : vector<8x256xf32>
    %517 = arith.addf %504, %516 : vector<8x256xf32>
    %518 = vector.extract_strided_slice %2 {offsets = [152, 0], sizes = [8, 256], strides = [1, 1]} : vector<256x256xf32> to vector<8x256xf32>
    %519 = arith.mulf %508, %518 : vector<8x256xf32>
    %520 = arith.addf %507, %519 : vector<8x256xf32>
    %521 = vector.extract_strided_slice %2 {offsets = [48, 0], sizes = [8, 256], strides = [1, 1]} : vector<256x256xf32> to vector<8x256xf32>
    %522 = vector.extract_strided_slice %2 {offsets = [168, 0], sizes = [8, 256], strides = [1, 1]} : vector<256x256xf32> to vector<8x256xf32>
    %523 = arith.mulf %521, %522 : vector<8x256xf32>
    %524 = arith.addf %511, %523 : vector<8x256xf32>
    %525 = vector.extract_strided_slice %2 {offsets = [248, 0], sizes = [8, 256], strides = [1, 1]} : vector<256x256xf32> to vector<8x256xf32>
    %526 = arith.mulf %521, %525 : vector<8x256xf32>
    %527 = arith.subf %514, %526 : vector<8x256xf32>
    %528 = vector.extract_strided_slice %2 {offsets = [184, 0], sizes = [8, 256], strides = [1, 1]} : vector<256x256xf32> to vector<8x256xf32>
    %529 = arith.mulf %521, %528 : vector<8x256xf32>
    %530 = arith.subf %517, %529 : vector<8x256xf32>
    %531 = vector.extract_strided_slice %2 {offsets = [144, 0], sizes = [8, 256], strides = [1, 1]} : vector<256x256xf32> to vector<8x256xf32>
    %532 = arith.mulf %521, %531 : vector<8x256xf32>
    %533 = arith.subf %520, %532 : vector<8x256xf32>
    %534 = vector.extract_strided_slice %2 {offsets = [56, 0], sizes = [8, 256], strides = [1, 1]} : vector<256x256xf32> to vector<8x256xf32>
    %535 = vector.extract_strided_slice %2 {offsets = [248, 0], sizes = [8, 256], strides = [1, 1]} : vector<256x256xf32> to vector<8x256xf32>
    %536 = arith.mulf %534, %535 : vector<8x256xf32>
    %537 = arith.addf %524, %536 : vector<8x256xf32>
    %538 = vector.extract_strided_slice %2 {offsets = [168, 0], sizes = [8, 256], strides = [1, 1]} : vector<256x256xf32> to vector<8x256xf32>
    %539 = arith.mulf %534, %538 : vector<8x256xf32>
    %540 = arith.addf %527, %539 : vector<8x256xf32>
    %541 = vector.extract_strided_slice %2 {offsets = [176, 0], sizes = [8, 256], strides = [1, 1]} : vector<256x256xf32> to vector<8x256xf32>
    %542 = arith.mulf %534, %541 : vector<8x256xf32>
    %543 = arith.addf %530, %542 : vector<8x256xf32>
    %544 = vector.extract_strided_slice %2 {offsets = [240, 0], sizes = [8, 256], strides = [1, 1]} : vector<256x256xf32> to vector<8x256xf32>
    %545 = arith.mulf %534, %544 : vector<8x256xf32>
    %546 = arith.subf %533, %545 : vector<8x256xf32>
    %547 = vector.extract_strided_slice %2 {offsets = [64, 0], sizes = [8, 256], strides = [1, 1]} : vector<256x256xf32> to vector<8x256xf32>
    %548 = vector.extract_strided_slice %2 {offsets = [128, 0], sizes = [8, 256], strides = [1, 1]} : vector<256x256xf32> to vector<8x256xf32>
    %549 = vector.extract_strided_slice %5 {offsets = [8, 0], sizes = [8, 256], strides = [1, 1]} : vector<16x256xf32> to vector<8x256xf32>
    %550 = arith.addf %548, %549 : vector<8x256xf32>
    %551 = arith.mulf %547, %550 : vector<8x256xf32>
    %552 = arith.addf %537, %551 : vector<8x256xf32>
    %553 = vector.extract_strided_slice %2 {offsets = [208, 0], sizes = [8, 256], strides = [1, 1]} : vector<256x256xf32> to vector<8x256xf32>
    %554 = arith.mulf %547, %553 : vector<8x256xf32>
    %555 = arith.subf %540, %554 : vector<8x256xf32>
    %556 = vector.extract_strided_slice %2 {offsets = [200, 0], sizes = [8, 256], strides = [1, 1]} : vector<256x256xf32> to vector<8x256xf32>
    %557 = arith.mulf %547, %556 : vector<8x256xf32>
    %558 = arith.addf %543, %557 : vector<8x256xf32>
    %559 = vector.extract_strided_slice %2 {offsets = [136, 0], sizes = [8, 256], strides = [1, 1]} : vector<256x256xf32> to vector<8x256xf32>
    %560 = arith.mulf %547, %559 : vector<8x256xf32>
    %561 = arith.addf %546, %560 : vector<8x256xf32>
    %562 = vector.extract_strided_slice %2 {offsets = [72, 0], sizes = [8, 256], strides = [1, 1]} : vector<256x256xf32> to vector<8x256xf32>
    %563 = vector.extract_strided_slice %2 {offsets = [208, 0], sizes = [8, 256], strides = [1, 1]} : vector<256x256xf32> to vector<8x256xf32>
    %564 = arith.mulf %562, %563 : vector<8x256xf32>
    %565 = arith.addf %552, %564 : vector<8x256xf32>
    %566 = vector.extract_strided_slice %2 {offsets = [128, 0], sizes = [8, 256], strides = [1, 1]} : vector<256x256xf32> to vector<8x256xf32>
    %567 = vector.extract_strided_slice %5 {offsets = [8, 0], sizes = [8, 256], strides = [1, 1]} : vector<16x256xf32> to vector<8x256xf32>
    %568 = arith.addf %566, %567 : vector<8x256xf32>
    %569 = arith.mulf %562, %568 : vector<8x256xf32>
    %570 = arith.addf %555, %569 : vector<8x256xf32>
    %571 = vector.extract_strided_slice %2 {offsets = [192, 0], sizes = [8, 256], strides = [1, 1]} : vector<256x256xf32> to vector<8x256xf32>
    %572 = arith.mulf %562, %571 : vector<8x256xf32>
    %573 = arith.subf %558, %572 : vector<8x256xf32>
    %574 = vector.extract_strided_slice %2 {offsets = [232, 0], sizes = [8, 256], strides = [1, 1]} : vector<256x256xf32> to vector<8x256xf32>
    %575 = arith.mulf %562, %574 : vector<8x256xf32>
    %576 = arith.addf %561, %575 : vector<8x256xf32>
    %577 = vector.extract_strided_slice %2 {offsets = [80, 0], sizes = [8, 256], strides = [1, 1]} : vector<256x256xf32> to vector<8x256xf32>
    %578 = vector.extract_strided_slice %2 {offsets = [200, 0], sizes = [8, 256], strides = [1, 1]} : vector<256x256xf32> to vector<8x256xf32>
    %579 = arith.mulf %577, %578 : vector<8x256xf32>
    %580 = arith.subf %565, %579 : vector<8x256xf32>
    %581 = vector.extract_strided_slice %2 {offsets = [192, 0], sizes = [8, 256], strides = [1, 1]} : vector<256x256xf32> to vector<8x256xf32>
    %582 = arith.mulf %577, %581 : vector<8x256xf32>
    %583 = arith.addf %570, %582 : vector<8x256xf32>
    %584 = vector.extract_strided_slice %2 {offsets = [128, 0], sizes = [8, 256], strides = [1, 1]} : vector<256x256xf32> to vector<8x256xf32>
    %585 = vector.extract_strided_slice %5 {offsets = [8, 0], sizes = [8, 256], strides = [1, 1]} : vector<16x256xf32> to vector<8x256xf32>
    %586 = arith.addf %584, %585 : vector<8x256xf32>
    %587 = arith.mulf %577, %586 : vector<8x256xf32>
    %588 = arith.addf %573, %587 : vector<8x256xf32>
    %589 = vector.extract_strided_slice %2 {offsets = [224, 0], sizes = [8, 256], strides = [1, 1]} : vector<256x256xf32> to vector<8x256xf32>
    %590 = arith.mulf %577, %589 : vector<8x256xf32>
    %591 = arith.subf %576, %590 : vector<8x256xf32>
    %592 = vector.extract_strided_slice %2 {offsets = [88, 0], sizes = [8, 256], strides = [1, 1]} : vector<256x256xf32> to vector<8x256xf32>
    %593 = vector.extract_strided_slice %2 {offsets = [136, 0], sizes = [8, 256], strides = [1, 1]} : vector<256x256xf32> to vector<8x256xf32>
    %594 = arith.mulf %592, %593 : vector<8x256xf32>
    %595 = arith.addf %580, %594 : vector<8x256xf32>
    %596 = vector.extract_strided_slice %2 {offsets = [232, 0], sizes = [8, 256], strides = [1, 1]} : vector<256x256xf32> to vector<8x256xf32>
    %597 = arith.mulf %592, %596 : vector<8x256xf32>
    %598 = arith.subf %583, %597 : vector<8x256xf32>
    %599 = vector.extract_strided_slice %2 {offsets = [224, 0], sizes = [8, 256], strides = [1, 1]} : vector<256x256xf32> to vector<8x256xf32>
    %600 = arith.mulf %592, %599 : vector<8x256xf32>
    %601 = arith.addf %588, %600 : vector<8x256xf32>
    %602 = vector.extract_strided_slice %2 {offsets = [128, 0], sizes = [8, 256], strides = [1, 1]} : vector<256x256xf32> to vector<8x256xf32>
    %603 = vector.extract_strided_slice %5 {offsets = [8, 0], sizes = [8, 256], strides = [1, 1]} : vector<16x256xf32> to vector<8x256xf32>
    %604 = arith.addf %602, %603 : vector<8x256xf32>
    %605 = arith.mulf %592, %604 : vector<8x256xf32>
    %606 = arith.addf %591, %605 : vector<8x256xf32>
    %607 = vector.extract_strided_slice %2 {offsets = [96, 0], sizes = [8, 256], strides = [1, 1]} : vector<256x256xf32> to vector<8x256xf32>
    %608 = vector.extract_strided_slice %2 {offsets = [232, 0], sizes = [8, 256], strides = [1, 1]} : vector<256x256xf32> to vector<8x256xf32>
    %609 = arith.mulf %607, %608 : vector<8x256xf32>
    %610 = arith.addf %595, %609 : vector<8x256xf32>
    %611 = vector.extract_strided_slice %2 {offsets = [136, 0], sizes = [8, 256], strides = [1, 1]} : vector<256x256xf32> to vector<8x256xf32>
    %612 = arith.mulf %607, %611 : vector<8x256xf32>
    %613 = arith.addf %598, %612 : vector<8x256xf32>
    %614 = vector.extract_strided_slice %2 {offsets = [216, 0], sizes = [8, 256], strides = [1, 1]} : vector<256x256xf32> to vector<8x256xf32>
    %615 = arith.mulf %607, %614 : vector<8x256xf32>
    %616 = arith.subf %601, %615 : vector<8x256xf32>
    %617 = vector.extract_strided_slice %2 {offsets = [208, 0], sizes = [8, 256], strides = [1, 1]} : vector<256x256xf32> to vector<8x256xf32>
    %618 = arith.mulf %607, %617 : vector<8x256xf32>
    %619 = arith.addf %606, %618 : vector<8x256xf32>
    %620 = vector.extract_strided_slice %2 {offsets = [104, 0], sizes = [8, 256], strides = [1, 1]} : vector<256x256xf32> to vector<8x256xf32>
    %621 = vector.extract_strided_slice %2 {offsets = [224, 0], sizes = [8, 256], strides = [1, 1]} : vector<256x256xf32> to vector<8x256xf32>
    %622 = arith.mulf %620, %621 : vector<8x256xf32>
    %623 = arith.subf %610, %622 : vector<8x256xf32>
    %624 = vector.extract_strided_slice %2 {offsets = [216, 0], sizes = [8, 256], strides = [1, 1]} : vector<256x256xf32> to vector<8x256xf32>
    %625 = arith.mulf %620, %624 : vector<8x256xf32>
    %626 = arith.addf %613, %625 : vector<8x256xf32>
    %627 = vector.extract_strided_slice %2 {offsets = [136, 0], sizes = [8, 256], strides = [1, 1]} : vector<256x256xf32> to vector<8x256xf32>
    %628 = arith.mulf %620, %627 : vector<8x256xf32>
    %629 = arith.addf %616, %628 : vector<8x256xf32>
    %630 = vector.extract_strided_slice %2 {offsets = [200, 0], sizes = [8, 256], strides = [1, 1]} : vector<256x256xf32> to vector<8x256xf32>
    %631 = arith.mulf %620, %630 : vector<8x256xf32>
    %632 = arith.subf %619, %631 : vector<8x256xf32>
    %633 = vector.extract_strided_slice %2 {offsets = [112, 0], sizes = [8, 256], strides = [1, 1]} : vector<256x256xf32> to vector<8x256xf32>
    %634 = vector.extract_strided_slice %2 {offsets = [160, 0], sizes = [8, 256], strides = [1, 1]} : vector<256x256xf32> to vector<8x256xf32>
    %635 = arith.mulf %633, %634 : vector<8x256xf32>
    %636 = arith.subf %623, %635 : vector<8x256xf32>
    %637 = vector.extract_strided_slice %2 {offsets = [152, 0], sizes = [8, 256], strides = [1, 1]} : vector<256x256xf32> to vector<8x256xf32>
    %638 = arith.mulf %633, %637 : vector<8x256xf32>
    %639 = arith.addf %626, %638 : vector<8x256xf32>
    %640 = vector.extract_strided_slice %2 {offsets = [144, 0], sizes = [8, 256], strides = [1, 1]} : vector<256x256xf32> to vector<8x256xf32>
    %641 = arith.mulf %633, %640 : vector<8x256xf32>
    %642 = arith.subf %629, %641 : vector<8x256xf32>
    %643 = vector.extract_strided_slice %2 {offsets = [184, 0], sizes = [8, 256], strides = [1, 1]} : vector<256x256xf32> to vector<8x256xf32>
    %644 = arith.mulf %633, %643 : vector<8x256xf32>
    %645 = arith.addf %632, %644 : vector<8x256xf32>
    %646 = vector.extract_strided_slice %2 {offsets = [120, 0], sizes = [8, 256], strides = [1, 1]} : vector<256x256xf32> to vector<8x256xf32>
    %647 = vector.extract_strided_slice %2 {offsets = [184, 0], sizes = [8, 256], strides = [1, 1]} : vector<256x256xf32> to vector<8x256xf32>
    %648 = arith.mulf %646, %647 : vector<8x256xf32>
    %649 = arith.addf %636, %648 : vector<8x256xf32>
    %650 = vector.extract_strided_slice %2 {offsets = [176, 0], sizes = [8, 256], strides = [1, 1]} : vector<256x256xf32> to vector<8x256xf32>
    %651 = arith.mulf %646, %650 : vector<8x256xf32>
    %652 = arith.subf %639, %651 : vector<8x256xf32>
    %653 = vector.extract_strided_slice %2 {offsets = [168, 0], sizes = [8, 256], strides = [1, 1]} : vector<256x256xf32> to vector<8x256xf32>
    %654 = arith.mulf %646, %653 : vector<8x256xf32>
    %655 = arith.addf %642, %654 : vector<8x256xf32>
    %656 = vector.extract_strided_slice %2 {offsets = [160, 0], sizes = [8, 256], strides = [1, 1]} : vector<256x256xf32> to vector<8x256xf32>
    %657 = arith.mulf %646, %656 : vector<8x256xf32>
    %658 = arith.subf %645, %657 : vector<8x256xf32>
    %659 = tpu.concatenate %649, %652, %655, %658 in 0 : vector<8x256xf32>, vector<8x256xf32>, vector<8x256xf32>, vector<8x256xf32> -> vector<32x256xf32>
    %c64 = arith.constant 64 : index
    %c0_13 = arith.constant 0 : index
    %660 = vector.load %arg9[%c64, %c0_13] : memref<160x256xf32, #tpu.memory_space<vmem>>, vector<32x256xf32>
    tpu.vector_store %arg9[%c64, %c0_13], %659 {strides = array<i32>} : memref<160x256xf32, #tpu.memory_space<vmem>>, vector<32x256xf32>,
    %661 = vector.extract_strided_slice %2 {offsets = [0, 0], sizes = [8, 256], strides = [1, 1]} : vector<256x256xf32> to vector<8x256xf32>
    %662 = vector.extract_strided_slice %5 {offsets = [0, 0], sizes = [8, 256], strides = [1, 1]} : vector<16x256xf32> to vector<8x256xf32>
    %663 = arith.addf %661, %662 : vector<8x256xf32>
    %664 = vector.extract_strided_slice %2 {offsets = [224, 0], sizes = [8, 256], strides = [1, 1]} : vector<256x256xf32> to vector<8x256xf32>
    %665 = arith.mulf %663, %664 : vector<8x256xf32>
    %666 = vector.extract_strided_slice %2 {offsets = [232, 0], sizes = [8, 256], strides = [1, 1]} : vector<256x256xf32> to vector<8x256xf32>
    %667 = arith.mulf %663, %666 : vector<8x256xf32>
    %668 = vector.extract_strided_slice %2 {offsets = [240, 0], sizes = [8, 256], strides = [1, 1]} : vector<256x256xf32> to vector<8x256xf32>
    %669 = arith.mulf %663, %668 : vector<8x256xf32>
    %670 = vector.extract_strided_slice %2 {offsets = [248, 0], sizes = [8, 256], strides = [1, 1]} : vector<256x256xf32> to vector<8x256xf32>
    %671 = arith.mulf %663, %670 : vector<8x256xf32>
    %672 = vector.extract_strided_slice %2 {offsets = [8, 0], sizes = [8, 256], strides = [1, 1]} : vector<256x256xf32> to vector<8x256xf32>
    %673 = vector.extract_strided_slice %2 {offsets = [200, 0], sizes = [8, 256], strides = [1, 1]} : vector<256x256xf32> to vector<8x256xf32>
    %674 = arith.mulf %672, %673 : vector<8x256xf32>
    %675 = arith.addf %665, %674 : vector<8x256xf32>
    %676 = vector.extract_strided_slice %2 {offsets = [208, 0], sizes = [8, 256], strides = [1, 1]} : vector<256x256xf32> to vector<8x256xf32>
    %677 = arith.mulf %672, %676 : vector<8x256xf32>
    %678 = arith.addf %667, %677 : vector<8x256xf32>
    %679 = vector.extract_strided_slice %2 {offsets = [248, 0], sizes = [8, 256], strides = [1, 1]} : vector<256x256xf32> to vector<8x256xf32>
    %680 = arith.mulf %672, %679 : vector<8x256xf32>
    %681 = arith.addf %669, %680 : vector<8x256xf32>
    %682 = vector.extract_strided_slice %2 {offsets = [240, 0], sizes = [8, 256], strides = [1, 1]} : vector<256x256xf32> to vector<8x256xf32>
    %683 = arith.mulf %672, %682 : vector<8x256xf32>
    %684 = arith.addf %671, %683 : vector<8x256xf32>
    %685 = vector.extract_strided_slice %2 {offsets = [16, 0], sizes = [8, 256], strides = [1, 1]} : vector<256x256xf32> to vector<8x256xf32>
    %686 = vector.extract_strided_slice %2 {offsets = [184, 0], sizes = [8, 256], strides = [1, 1]} : vector<256x256xf32> to vector<8x256xf32>
    %687 = arith.mulf %685, %686 : vector<8x256xf32>
    %688 = arith.subf %675, %687 : vector<8x256xf32>
    %689 = vector.extract_strided_slice %2 {offsets = [248, 0], sizes = [8, 256], strides = [1, 1]} : vector<256x256xf32> to vector<8x256xf32>
    %690 = arith.mulf %685, %689 : vector<8x256xf32>
    %691 = arith.addf %678, %690 : vector<8x256xf32>
    %692 = vector.extract_strided_slice %2 {offsets = [208, 0], sizes = [8, 256], strides = [1, 1]} : vector<256x256xf32> to vector<8x256xf32>
    %693 = arith.mulf %685, %692 : vector<8x256xf32>
    %694 = arith.addf %681, %693 : vector<8x256xf32>
    %695 = vector.extract_strided_slice %2 {offsets = [232, 0], sizes = [8, 256], strides = [1, 1]} : vector<256x256xf32> to vector<8x256xf32>
    %696 = arith.mulf %685, %695 : vector<8x256xf32>
    %697 = arith.subf %684, %696 : vector<8x256xf32>
    %698 = vector.extract_strided_slice %2 {offsets = [24, 0], sizes = [8, 256], strides = [1, 1]} : vector<256x256xf32> to vector<8x256xf32>
    %699 = vector.extract_strided_slice %2 {offsets = [248, 0], sizes = [8, 256], strides = [1, 1]} : vector<256x256xf32> to vector<8x256xf32>
    %700 = arith.mulf %698, %699 : vector<8x256xf32>
    %701 = arith.subf %688, %700 : vector<8x256xf32>
    %702 = vector.extract_strided_slice %2 {offsets = [184, 0], sizes = [8, 256], strides = [1, 1]} : vector<256x256xf32> to vector<8x256xf32>
    %703 = arith.mulf %698, %702 : vector<8x256xf32>
    %704 = arith.subf %691, %703 : vector<8x256xf32>
    %705 = vector.extract_strided_slice %2 {offsets = [200, 0], sizes = [8, 256], strides = [1, 1]} : vector<256x256xf32> to vector<8x256xf32>
    %706 = arith.mulf %698, %705 : vector<8x256xf32>
    %707 = arith.subf %694, %706 : vector<8x256xf32>
    %708 = vector.extract_strided_slice %2 {offsets = [224, 0], sizes = [8, 256], strides = [1, 1]} : vector<256x256xf32> to vector<8x256xf32>
    %709 = arith.mulf %698, %708 : vector<8x256xf32>
    %710 = arith.addf %697, %709 : vector<8x256xf32>
    %711 = vector.extract_strided_slice %2 {offsets = [32, 0], sizes = [8, 256], strides = [1, 1]} : vector<256x256xf32> to vector<8x256xf32>
    %712 = vector.extract_strided_slice %2 {offsets = [168, 0], sizes = [8, 256], strides = [1, 1]} : vector<256x256xf32> to vector<8x256xf32>
    %713 = arith.mulf %711, %712 : vector<8x256xf32>
    %714 = arith.addf %701, %713 : vector<8x256xf32>
    %715 = vector.extract_strided_slice %2 {offsets = [176, 0], sizes = [8, 256], strides = [1, 1]} : vector<256x256xf32> to vector<8x256xf32>
    %716 = arith.mulf %711, %715 : vector<8x256xf32>
    %717 = arith.addf %704, %716 : vector<8x256xf32>
    %718 = vector.extract_strided_slice %2 {offsets = [192, 0], sizes = [8, 256], strides = [1, 1]} : vector<256x256xf32> to vector<8x256xf32>
    %719 = arith.mulf %711, %718 : vector<8x256xf32>
    %720 = arith.addf %707, %719 : vector<8x256xf32>
    %721 = vector.extract_strided_slice %2 {offsets = [216, 0], sizes = [8, 256], strides = [1, 1]} : vector<256x256xf32> to vector<8x256xf32>
    %722 = arith.mulf %711, %721 : vector<8x256xf32>
    %723 = arith.subf %710, %722 : vector<8x256xf32>
    %724 = vector.extract_strided_slice %2 {offsets = [40, 0], sizes = [8, 256], strides = [1, 1]} : vector<256x256xf32> to vector<8x256xf32>
    %725 = vector.extract_strided_slice %2 {offsets = [160, 0], sizes = [8, 256], strides = [1, 1]} : vector<256x256xf32> to vector<8x256xf32>
    %726 = arith.mulf %724, %725 : vector<8x256xf32>
    %727 = arith.addf %714, %726 : vector<8x256xf32>
    %728 = vector.extract_strided_slice %2 {offsets = [240, 0], sizes = [8, 256], strides = [1, 1]} : vector<256x256xf32> to vector<8x256xf32>
    %729 = arith.mulf %724, %728 : vector<8x256xf32>
    %730 = arith.subf %717, %729 : vector<8x256xf32>
    %731 = vector.extract_strided_slice %2 {offsets = [232, 0], sizes = [8, 256], strides = [1, 1]} : vector<256x256xf32> to vector<8x256xf32>
    %732 = arith.mulf %724, %731 : vector<8x256xf32>
    %733 = arith.subf %720, %732 : vector<8x256xf32>
    %734 = vector.extract_strided_slice %2 {offsets = [208, 0], sizes = [8, 256], strides = [1, 1]} : vector<256x256xf32> to vector<8x256xf32>
    %735 = arith.mulf %724, %734 : vector<8x256xf32>
    %736 = arith.addf %723, %735 : vector<8x256xf32>
    %737 = vector.extract_strided_slice %2 {offsets = [48, 0], sizes = [8, 256], strides = [1, 1]} : vector<256x256xf32> to vector<8x256xf32>
    %738 = vector.extract_strided_slice %2 {offsets = [240, 0], sizes = [8, 256], strides = [1, 1]} : vector<256x256xf32> to vector<8x256xf32>
    %739 = arith.mulf %737, %738 : vector<8x256xf32>
    %740 = arith.addf %727, %739 : vector<8x256xf32>
    %741 = vector.extract_strided_slice %2 {offsets = [160, 0], sizes = [8, 256], strides = [1, 1]} : vector<256x256xf32> to vector<8x256xf32>
    %742 = arith.mulf %737, %741 : vector<8x256xf32>
    %743 = arith.addf %730, %742 : vector<8x256xf32>
    %744 = vector.extract_strided_slice %2 {offsets = [224, 0], sizes = [8, 256], strides = [1, 1]} : vector<256x256xf32> to vector<8x256xf32>
    %745 = arith.mulf %737, %744 : vector<8x256xf32>
    %746 = arith.addf %733, %745 : vector<8x256xf32>
    %747 = vector.extract_strided_slice %2 {offsets = [200, 0], sizes = [8, 256], strides = [1, 1]} : vector<256x256xf32> to vector<8x256xf32>
    %748 = arith.mulf %737, %747 : vector<8x256xf32>
    %749 = arith.subf %736, %748 : vector<8x256xf32>
    %750 = vector.extract_strided_slice %2 {offsets = [56, 0], sizes = [8, 256], strides = [1, 1]} : vector<256x256xf32> to vector<8x256xf32>
    %751 = vector.extract_strided_slice %2 {offsets = [144, 0], sizes = [8, 256], strides = [1, 1]} : vector<256x256xf32> to vector<8x256xf32>
    %752 = arith.mulf %750, %751 : vector<8x256xf32>
    %753 = arith.subf %740, %752 : vector<8x256xf32>
    %754 = vector.extract_strided_slice %2 {offsets = [152, 0], sizes = [8, 256], strides = [1, 1]} : vector<256x256xf32> to vector<8x256xf32>
    %755 = arith.mulf %750, %754 : vector<8x256xf32>
    %756 = arith.subf %743, %755 : vector<8x256xf32>
    %757 = vector.extract_strided_slice %2 {offsets = [216, 0], sizes = [8, 256], strides = [1, 1]} : vector<256x256xf32> to vector<8x256xf32>
    %758 = arith.mulf %750, %757 : vector<8x256xf32>
    %759 = arith.subf %746, %758 : vector<8x256xf32>
    %760 = vector.extract_strided_slice %2 {offsets = [192, 0], sizes = [8, 256], strides = [1, 1]} : vector<256x256xf32> to vector<8x256xf32>
    %761 = arith.mulf %750, %760 : vector<8x256xf32>
    %762 = arith.addf %749, %761 : vector<8x256xf32>
    %763 = vector.extract_strided_slice %2 {offsets = [64, 0], sizes = [8, 256], strides = [1, 1]} : vector<256x256xf32> to vector<8x256xf32>
    %764 = vector.extract_strided_slice %2 {offsets = [232, 0], sizes = [8, 256], strides = [1, 1]} : vector<256x256xf32> to vector<8x256xf32>
    %765 = arith.mulf %763, %764 : vector<8x256xf32>
    %766 = arith.subf %753, %765 : vector<8x256xf32>
    %767 = vector.extract_strided_slice %2 {offsets = [224, 0], sizes = [8, 256], strides = [1, 1]} : vector<256x256xf32> to vector<8x256xf32>
    %768 = arith.mulf %763, %767 : vector<8x256xf32>
    %769 = arith.addf %756, %768 : vector<8x256xf32>
    %770 = vector.extract_strided_slice %2 {offsets = [160, 0], sizes = [8, 256], strides = [1, 1]} : vector<256x256xf32> to vector<8x256xf32>
    %771 = arith.mulf %763, %770 : vector<8x256xf32>
    %772 = arith.addf %759, %771 : vector<8x256xf32>
    %773 = vector.extract_strided_slice %2 {offsets = [184, 0], sizes = [8, 256], strides = [1, 1]} : vector<256x256xf32> to vector<8x256xf32>
    %774 = arith.mulf %763, %773 : vector<8x256xf32>
    %775 = arith.addf %762, %774 : vector<8x256xf32>
    %776 = vector.extract_strided_slice %2 {offsets = [72, 0], sizes = [8, 256], strides = [1, 1]} : vector<256x256xf32> to vector<8x256xf32>
    %777 = vector.extract_strided_slice %2 {offsets = [136, 0], sizes = [8, 256], strides = [1, 1]} : vector<256x256xf32> to vector<8x256xf32>
    %778 = arith.mulf %776, %777 : vector<8x256xf32>
    %779 = arith.addf %766, %778 : vector<8x256xf32>
    %780 = vector.extract_strided_slice %2 {offsets = [216, 0], sizes = [8, 256], strides = [1, 1]} : vector<256x256xf32> to vector<8x256xf32>
    %781 = arith.mulf %776, %780 : vector<8x256xf32>
    %782 = arith.subf %769, %781 : vector<8x256xf32>
    %783 = vector.extract_strided_slice %2 {offsets = [152, 0], sizes = [8, 256], strides = [1, 1]} : vector<256x256xf32> to vector<8x256xf32>
    %784 = arith.mulf %776, %783 : vector<8x256xf32>
    %785 = arith.subf %772, %784 : vector<8x256xf32>
    %786 = vector.extract_strided_slice %2 {offsets = [176, 0], sizes = [8, 256], strides = [1, 1]} : vector<256x256xf32> to vector<8x256xf32>
    %787 = arith.mulf %776, %786 : vector<8x256xf32>
    %788 = arith.subf %775, %787 : vector<8x256xf32>
    %789 = vector.extract_strided_slice %2 {offsets = [80, 0], sizes = [8, 256], strides = [1, 1]} : vector<256x256xf32> to vector<8x256xf32>
    %790 = vector.extract_strided_slice %2 {offsets = [216, 0], sizes = [8, 256], strides = [1, 1]} : vector<256x256xf32> to vector<8x256xf32>
    %791 = arith.mulf %789, %790 : vector<8x256xf32>
    %792 = arith.addf %779, %791 : vector<8x256xf32>
    %793 = vector.extract_strided_slice %2 {offsets = [136, 0], sizes = [8, 256], strides = [1, 1]} : vector<256x256xf32> to vector<8x256xf32>
    %794 = arith.mulf %789, %793 : vector<8x256xf32>
    %795 = arith.addf %782, %794 : vector<8x256xf32>
    %796 = vector.extract_strided_slice %2 {offsets = [144, 0], sizes = [8, 256], strides = [1, 1]} : vector<256x256xf32> to vector<8x256xf32>
    %797 = arith.mulf %789, %796 : vector<8x256xf32>
    %798 = arith.addf %785, %797 : vector<8x256xf32>
    %799 = vector.extract_strided_slice %2 {offsets = [168, 0], sizes = [8, 256], strides = [1, 1]} : vector<256x256xf32> to vector<8x256xf32>
    %800 = arith.mulf %789, %799 : vector<8x256xf32>
    %801 = arith.addf %788, %800 : vector<8x256xf32>
    %802 = vector.extract_strided_slice %2 {offsets = [88, 0], sizes = [8, 256], strides = [1, 1]} : vector<256x256xf32> to vector<8x256xf32>
    %803 = vector.extract_strided_slice %2 {offsets = [208, 0], sizes = [8, 256], strides = [1, 1]} : vector<256x256xf32> to vector<8x256xf32>
    %804 = arith.mulf %802, %803 : vector<8x256xf32>
    %805 = arith.subf %792, %804 : vector<8x256xf32>
    %806 = vector.extract_strided_slice %2 {offsets = [200, 0], sizes = [8, 256], strides = [1, 1]} : vector<256x256xf32> to vector<8x256xf32>
    %807 = arith.mulf %802, %806 : vector<8x256xf32>
    %808 = arith.addf %795, %807 : vector<8x256xf32>
    %809 = vector.extract_strided_slice %2 {offsets = [184, 0], sizes = [8, 256], strides = [1, 1]} : vector<256x256xf32> to vector<8x256xf32>
    %810 = arith.mulf %802, %809 : vector<8x256xf32>
    %811 = arith.addf %798, %810 : vector<8x256xf32>
    %812 = vector.extract_strided_slice %2 {offsets = [160, 0], sizes = [8, 256], strides = [1, 1]} : vector<256x256xf32> to vector<8x256xf32>
    %813 = arith.mulf %802, %812 : vector<8x256xf32>
    %814 = arith.addf %801, %813 : vector<8x256xf32>
    %815 = vector.extract_strided_slice %2 {offsets = [96, 0], sizes = [8, 256], strides = [1, 1]} : vector<256x256xf32> to vector<8x256xf32>
    %816 = vector.extract_strided_slice %2 {offsets = [128, 0], sizes = [8, 256], strides = [1, 1]} : vector<256x256xf32> to vector<8x256xf32>
    %817 = vector.extract_strided_slice %5 {offsets = [8, 0], sizes = [8, 256], strides = [1, 1]} : vector<16x256xf32> to vector<8x256xf32>
    %818 = arith.addf %816, %817 : vector<8x256xf32>
    %819 = arith.mulf %815, %818 : vector<8x256xf32>
    %820 = arith.addf %805, %819 : vector<8x256xf32>
    %821 = vector.extract_strided_slice %2 {offsets = [192, 0], sizes = [8, 256], strides = [1, 1]} : vector<256x256xf32> to vector<8x256xf32>
    %822 = arith.mulf %815, %821 : vector<8x256xf32>
    %823 = arith.subf %808, %822 : vector<8x256xf32>
    %824 = vector.extract_strided_slice %2 {offsets = [176, 0], sizes = [8, 256], strides = [1, 1]} : vector<256x256xf32> to vector<8x256xf32>
    %825 = arith.mulf %815, %824 : vector<8x256xf32>
    %826 = arith.subf %811, %825 : vector<8x256xf32>
    %827 = vector.extract_strided_slice %2 {offsets = [152, 0], sizes = [8, 256], strides = [1, 1]} : vector<256x256xf32> to vector<8x256xf32>
    %828 = arith.mulf %815, %827 : vector<8x256xf32>
    %829 = arith.subf %814, %828 : vector<8x256xf32>
    %830 = vector.extract_strided_slice %2 {offsets = [104, 0], sizes = [8, 256], strides = [1, 1]} : vector<256x256xf32> to vector<8x256xf32>
    %831 = vector.extract_strided_slice %2 {offsets = [192, 0], sizes = [8, 256], strides = [1, 1]} : vector<256x256xf32> to vector<8x256xf32>
    %832 = arith.mulf %830, %831 : vector<8x256xf32>
    %833 = arith.addf %820, %832 : vector<8x256xf32>
    %834 = vector.extract_strided_slice %2 {offsets = [128, 0], sizes = [8, 256], strides = [1, 1]} : vector<256x256xf32> to vector<8x256xf32>
    %835 = vector.extract_strided_slice %5 {offsets = [8, 0], sizes = [8, 256], strides = [1, 1]} : vector<16x256xf32> to vector<8x256xf32>
    %836 = arith.addf %834, %835 : vector<8x256xf32>
    %837 = arith.mulf %830, %836 : vector<8x256xf32>
    %838 = arith.addf %823, %837 : vector<8x256xf32>
    %839 = vector.extract_strided_slice %2 {offsets = [168, 0], sizes = [8, 256], strides = [1, 1]} : vector<256x256xf32> to vector<8x256xf32>
    %840 = arith.mulf %830, %839 : vector<8x256xf32>
    %841 = arith.addf %826, %840 : vector<8x256xf32>
    %842 = vector.extract_strided_slice %2 {offsets = [144, 0], sizes = [8, 256], strides = [1, 1]} : vector<256x256xf32> to vector<8x256xf32>
    %843 = arith.mulf %830, %842 : vector<8x256xf32>
    %844 = arith.addf %829, %843 : vector<8x256xf32>
    %845 = vector.extract_strided_slice %2 {offsets = [112, 0], sizes = [8, 256], strides = [1, 1]} : vector<256x256xf32> to vector<8x256xf32>
    %846 = vector.extract_strided_slice %2 {offsets = [176, 0], sizes = [8, 256], strides = [1, 1]} : vector<256x256xf32> to vector<8x256xf32>
    %847 = arith.mulf %845, %846 : vector<8x256xf32>
    %848 = arith.subf %833, %847 : vector<8x256xf32>
    %849 = vector.extract_strided_slice %2 {offsets = [168, 0], sizes = [8, 256], strides = [1, 1]} : vector<256x256xf32> to vector<8x256xf32>
    %850 = arith.mulf %845, %849 : vector<8x256xf32>
    %851 = arith.addf %838, %850 : vector<8x256xf32>
    %852 = vector.extract_strided_slice %2 {offsets = [128, 0], sizes = [8, 256], strides = [1, 1]} : vector<256x256xf32> to vector<8x256xf32>
    %853 = vector.extract_strided_slice %5 {offsets = [8, 0], sizes = [8, 256], strides = [1, 1]} : vector<16x256xf32> to vector<8x256xf32>
    %854 = arith.addf %852, %853 : vector<8x256xf32>
    %855 = arith.mulf %845, %854 : vector<8x256xf32>
    %856 = arith.addf %841, %855 : vector<8x256xf32>
    %857 = vector.extract_strided_slice %2 {offsets = [136, 0], sizes = [8, 256], strides = [1, 1]} : vector<256x256xf32> to vector<8x256xf32>
    %858 = arith.mulf %845, %857 : vector<8x256xf32>
    %859 = arith.subf %844, %858 : vector<8x256xf32>
    %860 = vector.extract_strided_slice %2 {offsets = [120, 0], sizes = [8, 256], strides = [1, 1]} : vector<256x256xf32> to vector<8x256xf32>
    %861 = vector.extract_strided_slice %2 {offsets = [152, 0], sizes = [8, 256], strides = [1, 1]} : vector<256x256xf32> to vector<8x256xf32>
    %862 = arith.mulf %860, %861 : vector<8x256xf32>
    %863 = arith.addf %848, %862 : vector<8x256xf32>
    %864 = vector.extract_strided_slice %2 {offsets = [144, 0], sizes = [8, 256], strides = [1, 1]} : vector<256x256xf32> to vector<8x256xf32>
    %865 = arith.mulf %860, %864 : vector<8x256xf32>
    %866 = arith.subf %851, %865 : vector<8x256xf32>
    %867 = vector.extract_strided_slice %2 {offsets = [136, 0], sizes = [8, 256], strides = [1, 1]} : vector<256x256xf32> to vector<8x256xf32>
    %868 = arith.mulf %860, %867 : vector<8x256xf32>
    %869 = arith.subf %856, %868 : vector<8x256xf32>
    %870 = vector.extract_strided_slice %2 {offsets = [128, 0], sizes = [8, 256], strides = [1, 1]} : vector<256x256xf32> to vector<8x256xf32>
    %871 = vector.extract_strided_slice %5 {offsets = [8, 0], sizes = [8, 256], strides = [1, 1]} : vector<16x256xf32> to vector<8x256xf32>
    %872 = arith.addf %870, %871 : vector<8x256xf32>
    %873 = arith.mulf %860, %872 : vector<8x256xf32>
    %874 = arith.addf %859, %873 : vector<8x256xf32>
    %875 = tpu.concatenate %863, %866, %869, %874 in 0 : vector<8x256xf32>, vector<8x256xf32>, vector<8x256xf32>, vector<8x256xf32> -> vector<32x256xf32>
    %c96 = arith.constant 96 : index
    %c0_14 = arith.constant 0 : index
    %876 = vector.load %arg9[%c96, %c0_14] : memref<160x256xf32, #tpu.memory_space<vmem>>, vector<32x256xf32>
    tpu.vector_store %arg9[%c96, %c0_14], %875 {strides = array<i32>} : memref<160x256xf32, #tpu.memory_space<vmem>>, vector<32x256xf32>,
    %c0_15 = arith.constant 0 : index
    %c0_16 = arith.constant 0 : index
    %877 = vector.load %arg9[%c0_15, %c0_16] : memref<160x256xf32, #tpu.memory_space<vmem>>, vector<160x256xf32>
    %c0_17 = arith.constant 0 : index
    %c0_18 = arith.constant 0 : index
    %878 = vector.load %arg5[%c0_17, %c0_18] : memref<160x128xf32, #tpu.memory_space<vmem>>, vector<160x128xf32>
    %cst_19 = arith.constant dense<0.000000e+00> : vector<256x128xf32>
    %879 = tpu.matmul %877, %878, %cst_19 {dimension_numbers = #tpu.dot_dimension_numbers<[0], [0], [1], [1], [0, 1, 1, 1], [], []>} : vector<160x256xf32>, vector<160x128xf32>, vector<256x128xf32> -> vector<256x128xf32>
    %c0_20 = arith.constant 0 : index
    %c0_21 = arith.constant 0 : index
    %880 = vector.load %arg6[%c0_20, %c0_21] : memref<16x160xf32, #tpu.memory_space<vmem>>, vector<16x160xf32>
    %cst_22 = arith.constant dense<0.000000e+00> : vector<16x256xf32>
    %881 = tpu.matmul %880, %877, %cst_22 {dimension_numbers = #tpu.dot_dimension_numbers<[1], [0], [0], [1], [0, 0, 1, 1], [], []>} : vector<16x160xf32>, vector<160x256xf32>, vector<16x256xf32> -> vector<16x256xf32>
    %882 = arith.mulf %879, %879 : vector<256x128xf32>
    %cst_23 = arith.constant dense<0.000000e+00> : vector<256xf32>
    %883 = vector.multi_reduction <add>, %882, %cst_23 [1] : vector<256x128xf32> to vector<256xf32>
    %884 = vector.shape_cast %883 : vector<256xf32> to vector<256x1xf32>
    %cst_24 = arith.constant 1.250000e-01 : f32
    %885 = vector.broadcast %cst_24 : f32 to vector<256x1xf32>
    %886 = arith.mulf %884, %885 : vector<256x1xf32>
    %cst_25 = arith.constant 0.00999999977 : f32
    %887 = vector.broadcast %cst_25 : f32 to vector<256x1xf32>
    %888 = arith.addf %886, %887 : vector<256x1xf32>
    %889 = math.rsqrt %888 : vector<256x1xf32>
    %890 = vector.broadcast %889 : vector<256x1xf32> to vector<256x128xf32>
    %891 = arith.mulf %879, %890 : vector<256x128xf32>
    %c0_26 = arith.constant 0 : index
    %c0_27 = arith.constant 0 : index
    %892 = vector.load %arg7[%c0_26, %c0_27] : memref<256x128xf32, #tpu.memory_space<vmem>>, vector<256x128xf32>
    tpu.vector_store %arg7[%c0_26, %c0_27], %891 {strides = array<i32>} : memref<256x128xf32, #tpu.memory_space<vmem>>, vector<256x128xf32>,
    %cst_28 = arith.constant dense<0.000000e+00> : vector<256xf32>
    %893 = vector.multi_reduction <add>, %881, %cst_28 [0] : vector<16x256xf32> to vector<256xf32>
    %894 = vector.shape_cast %893 : vector<256xf32> to vector<1x256xf32>
    %cst_29 = arith.constant 1.600000e+01 : f32
    %895 = vector.broadcast %cst_29 : f32 to vector<1x256xf32>
    %896 = arith.divf %894, %895 : vector<1x256xf32>
    %897 = vector.broadcast %896 : vector<1x256xf32> to vector<16x256xf32>
    %898 = arith.subf %881, %897 : vector<16x256xf32>
    %899 = arith.mulf %898, %898 : vector<16x256xf32>
    %cst_30 = arith.constant dense<0.000000e+00> : vector<256xf32>
    %900 = vector.multi_reduction <add>, %899, %cst_30 [0] : vector<16x256xf32> to vector<256xf32>
    %901 = vector.shape_cast %900 : vector<256xf32> to vector<1x256xf32>
    %cst_31 = arith.constant 1.600000e+01 : f32
    %902 = vector.broadcast %cst_31 : f32 to vector<1x256xf32>
    %903 = arith.divf %901, %902 : vector<1x256xf32>
    %cst_32 = arith.constant 9.99999974E-6 : f32
    %904 = vector.broadcast %cst_32 : f32 to vector<1x256xf32>
    %905 = arith.addf %903, %904 : vector<1x256xf32>
    %906 = math.rsqrt %905 : vector<1x256xf32>
    %907 = vector.broadcast %906 : vector<1x256xf32> to vector<16x256xf32>
    %908 = arith.mulf %898, %907 : vector<16x256xf32>
    %c0_33 = arith.constant 0 : index
    %c0_34 = arith.constant 0 : index
    %909 = vector.load %arg8[%c0_33, %c0_34] : memref<16x256xf32, #tpu.memory_space<vmem>>, vector<16x256xf32>
    tpu.vector_store %arg8[%c0_33, %c0_34], %908 {strides = array<i32>} : memref<16x256xf32, #tpu.memory_space<vmem>>, vector<16x256xf32>,
    return
  }
  func.func @transform_0(%arg0: i32) -> (i32, i32) {
    %c0_i32 = arith.constant 0 : i32
    %c0_i32_0 = arith.constant 0 : i32
    return %arg0, %c0_i32 : i32, i32
  }
  func.func @transform_1(%arg0: i32) -> (i32, i32) {
    %c0_i32 = arith.constant 0 : i32
    %c0_i32_0 = arith.constant 0 : i32
    return %c0_i32, %arg0 : i32, i32
  }
  func.func @transform_2(%arg0: i32) -> (i32, i32) {
    %c0_i32 = arith.constant 0 : i32
    %c0_i32_0 = arith.constant 0 : i32
    %c0_i32_1 = arith.constant 0 : i32
    return %c0_i32, %c0_i32_0 : i32, i32
  }
  func.func @transform_3(%arg0: i32) -> (i32, i32) {
    %c0_i32 = arith.constant 0 : i32
    %c0_i32_0 = arith.constant 0 : i32
    %c0_i32_1 = arith.constant 0 : i32
    return %c0_i32, %c0_i32_0 : i32, i32
  }
  func.func @transform_4(%arg0: i32) -> (i32, i32) {
    %c0_i32 = arith.constant 0 : i32
    %c0_i32_0 = arith.constant 0 : i32
    %c0_i32_1 = arith.constant 0 : i32
    return %c0_i32, %c0_i32_0 : i32, i32
  }
  func.func @transform_5(%arg0: i32) -> (i32, i32) {
    %c0_i32 = arith.constant 0 : i32
    %c0_i32_0 = arith.constant 0 : i32
    %c0_i32_1 = arith.constant 0 : i32
    return %c0_i32, %c0_i32_0 : i32, i32
  }
  func.func @transform_6(%arg0: i32) -> (i32, i32) {
    %c0_i32 = arith.constant 0 : i32
    %c0_i32_0 = arith.constant 0 : i32
    return %arg0, %c0_i32 : i32, i32
  }
  func.func @transform_7(%arg0: i32) -> (i32, i32) {
    %c0_i32 = arith.constant 0 : i32
    %c0_i32_0 = arith.constant 0 : i32
    return %c0_i32, %arg0 : i32, i32
  }
}

</mosaic_0001>

<bundles_post_ra>
// kernel: tpu_custom_call.1
= control target key start
LH: loop header
LB: loop body
LE: loop exit
PB: predicated region body
PF: predicated region fallthrough
CT: control target
= control target key end

     0   :  { %s6452_s0 = inlined_call_operand.hbm [shape: f32[512,128], index: 0, kind: input, shape index: {}]   ;;  %s6453_s1 = inlined_call_operand.hbm [shape: f32[16,512], index: 1, kind: input, shape index: {}]   ;;  %s6454_s2 = inlined_call_operand.hbm [shape: f32[256,128], index: 2, kind: input, shape index: {}]   ;;  %s6455_s3 = inlined_call_operand.hbm [shape: f32[16,16], index: 3, kind: input, shape index: {}]   ;;  %s6456_s4 = inlined_call_operand.hbm [shape: f32[160,128], index: 4, kind: input, shape index: {}]   ;;  %s6457_s5 = inlined_call_operand.hbm [shape: f32[16,160], index: 5, kind: input, shape index: {}]   ;;  %s6458_s6 = inlined_call_operand.hbm [shape: f32[512,128], index: 6, kind: output, shape index: {0}]   ;;  %s6459_s7 = inlined_call_operand.hbm [shape: f32[16,512], index: 7, kind: output, shape index: {1}]  }
   0x1   :  { %6590 = sst [smem:[#allocation117_spill]] %s6452_s0 }
   0x2   :  { %6591 = sst [smem:[#allocation118_spill]] %s6454_s2 }
   0x3   :  { %6592 = sst [smem:[#allocation119_spill]] %s6455_s3 }
   0x4   :  { %6593 = sst [smem:[#allocation120_spill]] %s6456_s4 }
   0x5   :  { %13 = vsyncpa [#allocation4], 0 }
   0x6   :  { %15 = vsyncpa [#allocation4 + $0x1], 0 }
   0x7   :  { %16 = vsyncpa [#allocation7], 0 }
   0x8   :  { %18 = vsyncpa [#allocation7 + $0x1], 0 }
   0x9   :  { %19 = vsyncpa [#allocation10], 0 }
   0xa   :  { %20 = vsyncpa [#allocation13], 0 }
   0xb   :  { %21 = vsyncpa [#allocation5], 0 }
   0xc   :  { %23 = vsyncpa [#allocation5 + $0x1], 0 }
   0xd   :  { %24 = vsyncpa [#allocation16], 0 }
   0xe   :  { %26 = vsyncpa [#allocation16 + $0x1], 0  ;;  %s3775_s24 = smov 0   ;;  %s3777_s25 = smov 0  }
   0xf   :  { %s3779_s26 = smov 0   ;;  %s3781_s27 = smov 0  }
  0x10 LB: > { %s3796_s28 = sadd.s32 4294967295, %s3712_s27   ;;  %s2973_s29 = sadd.s32 4294967294, %s3712_s27   ;;  %s3712_s27 = sphi %s3781_s27, %s6992_s27   ;;  %s3708_s26 = sphi %s3779_s26, %s6991_s26   ;;  %s3704_s25 = sphi %s3777_s25, %s6990_s25   ;;  %s3700_s24 = sphi %s3775_s24, %s6989_s24  }
  0x11   : > { %p52_p0 = scmp.ne.s32.totalorder %s3704_s25, %s3700_s24  ;;  %p6460_p1 = scmp.eq.s32.totalorder %s3796_s28, 0 }
  0x12   : > { %p192_p3 = scmp.eq.s32.totalorder %s2973_s29, 1  ;;  %p2974_p5 = scmp.ge.s32.totalorder %s3712_s27, 1 }
  0x13   : > { %p3805_p4 = por %p6460_p1, %p52_p0  ;;  %p225_p7 = scmp.lt.s32.totalorder %s3712_s27, 3 }
  0x14   : > { %p3810_p6 = por %p192_p3, %p52_p0  ;;  %s3714_s10 = smov [#allocation8]  }
  0x15   : > { %s6594_s30 = scalar_select %p3805_p4, 1, 0 }
  0x16   : > { %s6595_s8 = scalar_select %p3810_p6, 1, 0 }
  0x17   : > { %p3815_p8 = pnand %p2974_p5, %p225_p7  ;;  %s237_s11 = sshll.u32 %s3714_s10, 4  ;;  %s3819_s11 = int_to_ptr.vmem [resolvable:$true] %s237_s11 }
  0x18   : > { %6596 = sst [smem:[#allocation24_spill]] %s6595_s8  ;;  %s3715_s13 = smov [#allocation9]  }
  0x19   : > { %s6597_s9 = scalar_select %p3815_p8, 1, 0 }
  0x1a   : > { %p3272_p9 = pneg %p3815_p8  ;;  %s250_s14 = sshll.u32 %s3715_s13, 4  ;;  %s3830_s14 = int_to_ptr.vmem [resolvable:$true] %s250_s14 }
  0x1b   : > { %s3716_s15 = smov [#allocation11]   ;;  %s6599_s2 = sld [smem:[#allocation118_spill]] }
  0x1c   : > { %p3826_p11 = pnand %p3272_p9, %p6460_p1  ;;  %s3832_s16 = sshll.u32 %s3716_s15, 4  ;;  %s264_s16 = int_to_ptr.vmem [resolvable:$true] %s3832_s16 }
  0x1e   : > { %p3842_p13 = pneg %p3826_p11 }
  0x21   : > { %s3426_s19 = scalar_lea.hbm %s6599_s2, 4096 }
  0x22   : > { %p3427_p12 = scmp.ne.s32.totalorder %s6599_s2, %s3426_s19  ;;  %p3433_p5 = scmp.lt.u32.totalorder %s3426_s19, %s6599_s2 }
  0x24   : > { %p3429_p0 = pnand %p3842_p13, %p3427_p12 }
  0x26   : > { %p3430_p3 = pneg %p3429_p0 }
  0x28   : > { %p3435_p7 = pnand %p3433_p5, %p3430_p3 }
  0x2a   : > { %3438 = shalt.err (!%p3435_p7)
}
  0x2b   : > { %s3439_s10 = scalar_lea.vmem %s3819_s11, 4096  ;;  %p3447_p2 = scmp.lt.s32.totalorder %s3819_s11, %s3819_s11 }
  0x2c   : > { %p3440_p9 = scmp.ne.s32.totalorder %s3819_s11, %s3439_s10  ;;  %p3448_p6 = scmp.lt.s32.totalorder %s3439_s10, %s3439_s10 }
  0x2e   : > { %p3442_p10 = pnand %p3440_p9, %p3842_p13  ;;  %p3449_p12 = por %p3448_p6, %p3447_p2 }
  0x30   : > { %p3443_p1 = pneg %p3442_p10 }
  0x32   : > { %p3450_p0 = pnand %p3449_p12, %p3443_p1 }
  0x34   : > { %3453 = shalt.err (!%p3450_p0)
}
  0x35   : > { %s6466_s13 = smov 128   ;;  %s6467_s15 = smov 8  }
  0x36   : > { %3275 = dma.hbm_to_vmem [thread:$0]  (!%p3826_p11), %s6599_s2, 4096, %s3819_s11, [#allocation7], %s6466_s13, %s6466_s13, %s6467_s15  }
  0x37   : > { %s6601_s3 = sld [smem:[#allocation119_spill]] }
  0x3d   : > { %s3454_s21 = scalar_lea.hbm %s6601_s3, 256 }
  0x3e   : > { %p3455_p1 = scmp.ne.s32.totalorder %s6601_s3, %s3454_s21  ;;  %p3461_p10 = scmp.lt.u32.totalorder %s3454_s21, %s6601_s3 }
  0x40   : > { %p3457_p2 = pnand %p3455_p1, %p3842_p13 }
  0x42   : > { %p3458_p6 = pneg %p3457_p2 }
  0x44   : > { %p3463_p3 = pnand %p3461_p10, %p3458_p6 }
  0x46   : > { %3466 = shalt.err (!%p3463_p3)
}
  0x47   : > { %s3467_s11 = scalar_lea.vmem %s3830_s14, 256  ;;  %p3475_p12 = scmp.lt.s32.totalorder %s3830_s14, %s3830_s14 }
  0x48   : > { %p3468_p5 = scmp.ne.s32.totalorder %s3830_s14, %s3467_s11  ;;  %p3476_p0 = scmp.lt.s32.totalorder %s3467_s11, %s3467_s11 }
  0x4a   : > { %p3470_p7 = pnand %p3468_p5, %p3842_p13  ;;  %p3477_p1 = por %p3476_p0, %p3475_p12 }
  0x4c   : > { %p3471_p9 = pneg %p3470_p7 }
  0x4e   : > { %p3478_p2 = pnand %p3477_p1, %p3471_p9 }
  0x50   : > { %3481 = shalt.err (!%p3478_p2)
}
  0x51   : > { %3278 = dma.hbm_to_vmem [thread:$0]  (!%p3826_p11), %s6601_s3, 256, %s3830_s14, [#allocation10], %s6466_s13, %s6466_s13, %s6467_s15  }
  0x52   : > { %s6602_s4 = sld [smem:[#allocation120_spill]] }
  0x58   : > { %s3482_s20 = scalar_lea.hbm %s6602_s4, 2560 }
  0x59   : > { %p3483_p6 = scmp.ne.s32.totalorder %s6602_s4, %s3482_s20  ;;  %p3489_p5 = scmp.lt.u32.totalorder %s3482_s20, %s6602_s4 }
  0x5b   : > { %p3485_p10 = pnand %p3483_p6, %p3842_p13 }
  0x5d   : > { %p3486_p3 = pneg %p3485_p10 }
  0x5f   : > { %p3491_p7 = pnand %p3489_p5, %p3486_p3 }
  0x61   : > { %3494 = shalt.err (!%p3491_p7)
}
  0x62   : > { %s3495_s11 = scalar_lea.vmem %s264_s16, 2560  ;;  %p3503_p1 = scmp.lt.s32.totalorder %s264_s16, %s264_s16 }
  0x63   : > { %p3496_p9 = scmp.ne.s32.totalorder %s264_s16, %s3495_s11  ;;  %p3504_p2 = scmp.lt.s32.totalorder %s3495_s11, %s3495_s11 }
  0x65   : > { %p3498_p12 = pnand %p3496_p9, %p3842_p13  ;;  %p3505_p4 = por %p3504_p2, %p3503_p1 }
  0x67   : > { %p3499_p0 = pneg %p3498_p12 }
  0x69   : > { %p3506_p8 = pnand %p3505_p4, %p3499_p0 }
  0x6b   : > { %3509 = shalt.err (!%p3506_p8)
}
  0x6c   : > { %3281 = dma.hbm_to_vmem [thread:$0]  (!%p3826_p11), %s6602_s4, 2560, %s264_s16, [#allocation10], %s6466_s13, %s6466_s13, %s6467_s15  }
  0x6d   : > { %s3719_s17 = smov [#allocation12]   ;;  %s3510_s21 = scalar_lea.hbm %s6457_s5, 512 }
  0x6e   : > { %s276_s18 = sshll.u32 %s3719_s17, 4  ;;  %p3511_p4 = scmp.ne.s32.totalorder %s6457_s5, %s3510_s21  ;;  %s277_s18 = int_to_ptr.vmem [resolvable:$true] %s276_s18 }
  0x6f   : > { %p3517_p10 = scmp.lt.u32.totalorder %s3510_s21, %s6457_s5 }
  0x70   : > { %p3513_p8 = pnand %p3511_p4, %p3842_p13 }
  0x72   : > { %p3514_p6 = pneg %p3513_p8 }
  0x74   : > { %p3519_p3 = pnand %p3517_p10, %p3514_p6 }
  0x76   : > { %3522 = shalt.err (!%p3519_p3)
}
  0x77   : > { %s3523_s16 = scalar_lea.vmem %s277_s18, 512  ;;  %p3531_p12 = scmp.lt.s32.totalorder %s277_s18, %s277_s18 }
  0x78   : > { %p3524_p5 = scmp.ne.s32.totalorder %s277_s18, %s3523_s16  ;;  %p3532_p0 = scmp.lt.s32.totalorder %s3523_s16, %s3523_s16 }
  0x7a   : > { %p3526_p7 = pnand %p3524_p5, %p3842_p13  ;;  %p3533_p1 = por %p3532_p0, %p3531_p12 }
  0x7c   : > { %p3527_p9 = pneg %p3526_p7 }
  0x7e   : > { %p3534_p2 = pnand %p3533_p1, %p3527_p9 }
  0x80   : > { %3537 = shalt.err (!%p3534_p2)
}
  0x81   : > { %s6464_s14 = smov 256   ;;  %s6465_s22 = smov 16  }
  0x82   : > { %3284 = dma.hbm_to_vmem [thread:$0]  (!%p3826_p11), %s6457_s5, 512, %s277_s18, [#allocation13], %s6464_s14, %s6464_s14, %s6465_s22  }
  0x83   : > { %s3936_s19 = sadd.s32 1, %s3712_s27   ;;  %s39_s21 = sadd.s32 1, %s3708_s26 }
  0x84   : > { %s36_s20 = ssub.s32 %s3712_s27, %s3936_s19  ;;  %p46_p4 = scmp.ne.s32.totalorder %s3708_s26, %s3704_s25 }
  0x85   : > { %p37_p13 = scmp.eq.s32.totalorder %s36_s20, 0  ;;  %p47_p8 = scmp.eq.s32.totalorder %s3712_s27, 0 }
  0x86   : > { %p6603_p10 = scmp.eq.s32.totalorder %s3796_s28, 1  ;;  %p3303_p5 = scmp.lt.s32.totalorder %s3712_s27, 2 }
  0x87   : > { %s3945_s23 = scalar_select %p37_p13, %s3708_s26, %s39_s21  }
  0x88   : > { %p48_p6 = por %p47_p8, %p46_p4  ;;  %p3949_p3 = por %p6603_p10, %p46_p4 }
  0x89   : > { %s3955_s29 = sand.u32 1, %s3708_s26   ;;  %s3040_s10 = sshll.u32 %s3712_s27, 12 }
  0x8a   : > { %s2980_s18 = sshll.u32 %s3955_s29, 8  ;;  %s6605_s0 = sld [smem:[#allocation117_spill]] }
  0x8b   : > { %s294_s17 = scalar_lea.vmem [#allocation3], %s2980_s18  ;;  %p3966_p11 = pnand %p3303_p5, %p48_p6 }
  0x8c   : > { %s301_s20 = sshll.u32 %s294_s17, 4  ;;  %s2983_s14 = sshll.u32 %s3955_s29, 5  ;;  %s3964_s20 = int_to_ptr.vmem [resolvable:$true] %s301_s20 }
  0x8d   : > { %s291_s13 = scalar_lea.sflag [#allocation4], %s3955_s29  ;;  %p3540_p9 = pneg %p3966_p11 }
  0x90   : > { %s3962_s8 = scalar_lea.hbm %s6605_s0, %s3040_s10  ;;  %s3543_s16 = scalar_lea.hbm %s6605_s0, 8192 }
  0x91   : > { %s3538_s11 = scalar_lea.hbm %s3962_s8, 4096  ;;  %p3544_p1 = scmp.lt.u32.totalorder %s3962_s8, %s6605_s0 }
  0x92   : > { %p3539_p7 = scmp.ne.s32.totalorder %s3962_s8, %s3538_s11  ;;  %p3545_p2 = scmp.lt.u32.totalorder %s3543_s16, %s3538_s11 }
  0x93   : > { %p3547_p4 = scmp.lt.u32.totalorder %s3538_s11, %s3962_s8 }
  0x94   : > { %p3541_p12 = pnand %p3540_p9, %p3539_p7  ;;  %p3546_p13 = por %p3545_p2, %p3544_p1 }
  0x96   : > { %p3542_p0 = pneg %p3541_p12  ;;  %p3548_p8 = por %p3547_p4, %p3546_p13 }
  0x98   : > { %p3549_p6 = pnand %p3548_p8, %p3542_p0 }
  0x9a   : > { %3552 = shalt.err (!%p3549_p6)
}
  0x9b   : > { %s3553_s22 = scalar_lea.vmem %s3964_s20, 4096  ;;  %s3722_s18 = smov [#allocation3]  }
  0x9c   : > { %p3554_p10 = scmp.ne.s32.totalorder %s3964_s20, %s3553_s22  ;;  %s3558_s10 = sshll.u32 %s3722_s18, 4  ;;  %s3559_s10 = int_to_ptr.vmem [resolvable:$false] %s3558_s10 }
  0x9d   : > { %s3560_s15 = scalar_lea.vmem %s3559_s10, 8192  ;;  %p3561_p12 = scmp.lt.s32.totalorder %s3964_s20, %s3559_s10 }
  0x9e   : > { %p3556_p5 = pnand %p3554_p10, %p3540_p9  ;;  %p3562_p1 = scmp.lt.s32.totalorder %s3560_s15, %s3553_s22 }
  0xa0   : > { %p3557_p7 = pneg %p3556_p5  ;;  %p3563_p2 = por %p3562_p1, %p3561_p12 }
  0xa2   : > { %p3564_p13 = pnand %p3563_p2, %p3557_p7 }
  0xa4   : > { %3567 = shalt.err (!%p3564_p13)
}
  0xa5   : > { %s6607_s11 = smov 8   ;;  %s6608_s16 = smov 128  }
  0xa6   : > { %3288 = dma.hbm_to_vmem [thread:$0]  (!%p3966_p11), %s3962_s8, 4096, %s3964_s20, %s291_s13, %s6608_s16, %s6608_s16, %s6607_s11  }
  0xa7   : > { %s315_s17 = scalar_lea.vmem [#allocation6], %s2983_s14  ;;  %s3041_s18 = sshll.u32 %s3712_s27, 8 }
  0xa8   : > { %s322_s22 = sshll.u32 %s315_s17, 4  ;;  %s4011_s0 = scalar_lea.hbm %s6453_s1, %s3041_s18  ;;  %s4005_s22 = int_to_ptr.vmem [resolvable:$true] %s322_s22 }
  0xa9   : > { %s6609_s2 = sand.u32 1, %s3712_s27   ;;  %s3568_s4 = scalar_lea.hbm %s4011_s0, 512 }
  0xaa   : > { %s4015_s3 = scalar_lea.sflag [#allocation7], %s6609_s2  ;;  %p3569_p0 = scmp.ne.s32.totalorder %s4011_s0, %s3568_s4 }
  0xab   : > { %s3573_s29 = scalar_lea.hbm %s6453_s1, 1024  ;;  %p3574_p6 = scmp.lt.u32.totalorder %s4011_s0, %s6453_s1 }
  0xac   : > { %p3571_p4 = pnand %p3569_p0, %p3540_p9  ;;  %p3575_p10 = scmp.lt.u32.totalorder %s3573_s29, %s3568_s4 }
  0xad   : > { %p3577_p7 = scmp.lt.u32.totalorder %s3568_s4, %s4011_s0 }
  0xae   : > { %p3572_p8 = pneg %p3571_p4  ;;  %p3576_p5 = por %p3575_p10, %p3574_p6 }
  0xb0   : > { %p3578_p12 = por %p3577_p7, %p3576_p5 }
  0xb2   : > { %p3579_p1 = pnand %p3578_p12, %p3572_p8 }
  0xb4   : > { %3582 = shalt.err (!%p3579_p1)
}
  0xb5   : > { %s3583_s2 = scalar_lea.vmem %s4005_s22, 512  ;;  %s3723_s11 = smov [#allocation6]  }
  0xb6   : > { %p3584_p2 = scmp.ne.s32.totalorder %s4005_s22, %s3583_s2  ;;  %s3588_s16 = sshll.u32 %s3723_s11, 4  ;;  %s3589_s16 = int_to_ptr.vmem [resolvable:$false] %s3588_s16 }
  0xb7   : > { %s3590_s17 = scalar_lea.vmem %s3589_s16, 1024  ;;  %p3591_p4 = scmp.lt.s32.totalorder %s4005_s22, %s3589_s16 }
  0xb8   : > { %p3586_p13 = pnand %p3584_p2, %p3540_p9  ;;  %p3592_p6 = scmp.lt.s32.totalorder %s3590_s17, %s3583_s2 }
  0xba   : > { %p3587_p0 = pneg %p3586_p13  ;;  %p3593_p10 = por %p3592_p6, %p3591_p4 }
  0xbc   : > { %p3594_p5 = pnand %p3593_p10, %p3587_p0 }
  0xbe   : > { %3597 = shalt.err (!%p3594_p5)
}
  0xbf   : > { %s3724_s4 = smov 512   ;;  %s6610_s18 = smov 16  }
  0xc0   : > { %s6611_s10 = smov 256   ;;  %p6612_p9 = scmp.ne.s32.totalorder %s6597_s9, 0 }
  0xc1   : > { %3291 = dma.hbm_to_vmem [thread:$0]  (!%p3966_p11), %s4011_s0, 512, %s4005_s22, %s4015_s3, %s3724_s4, %s6611_s10, %s6610_s18  }
  0xc2   : > { %334 = sbr.rel (%p6612_p9) target bundleno = 1361 (0x551), region = 44 }
  0xc9   : > { %s4046_s15 = sand.u32 1, %s3704_s25   ;;  %p6613_p8 = scmp.ne.s32.totalorder %s6594_s30, 0 }
  0xca   : > { %s2987_s13 = sshll.u32 %s4046_s15, 8  ;;  %s337_s14 = scalar_lea.sflag [#allocation4], %s4046_s15 }
  0xcb   : > { %s4052_s21 = scalar_lea.vmem [#allocation3], %s2987_s13 }
  0xcc   : > { %3671 = dma.done.wait (%p6613_p8), %s337_s14, 4096  }
  0xcd   : > { %3673 = vsyncadd (%p6613_p8), %s337_s14, 4294963200  ;;  %s345_s0 = sand.u32 1, %s3796_s28   ;;  %s2988_s3 = sshll.u32 %s4046_s15, 5 }
  0xce   : > { %s346_s9 = scalar_lea.sflag [#allocation7], %s345_s0  ;;  %s4062_s22 = scalar_lea.vmem [#allocation6], %s2988_s3 }
  0xcf   : > { %3675 = dma.done.wait (%p6613_p8), %s346_s9, 512  }
  0xd0   : > { %3677 = vsyncadd (%p6613_p8), %s346_s9, 4294966784  ;;  %p6614_p11 = scmp.eq.s32.totalorder %s3796_s28, 0 }
  0xd2   : > { %3679 = dma.done.wait (%p6614_p11), [#allocation7], 4096   ;;  %p6615_p7 = pmov %p6614_p11 }
  0xd4   : > { %3681 = vsyncadd (%p6615_p7), [#allocation7], 4294963200  ;;  %p6616_p12 = pmov %p6615_p7 }
  0xd5   : > { %p6617_p1 = pmov %p6615_p7 }
  0xd6   : > { %3683 = dma.done.wait (%p6616_p12), [#allocation10], 2816  }
  0xd7   : > { %3685 = vsyncadd (%p6617_p1), [#allocation10], 4294964480  ;;  %p6618_p2 = pmov %p6617_p1 }
  0xd8   : > { %p6619_p13 = pmov %p6617_p1 }
  0xd9   : > { %3687 = dma.done.wait (%p6618_p2), [#allocation13], 512  }
  0xda   : > { %3689 = vsyncadd (%p6619_p13), [#allocation13], 4294966784  ;;  %v3725_v0 = vmov 0.0   ;;  %v458_v1 = vld [vmem:[%s4052_s21 + $0x80] sm:$0xff]  ;;  %v459_v2 = vld [vmem:[%s4052_s21 + $0x88] sm:$0xff]  ;;  %vm737_vm0 = vcmask 130048  }
  0xdb   : > { %808 = vmatprep.mubr.f32.mxu1 %v3725_v0  ;;  %v442_v3 = vld [vmem:[%s4052_s21] sm:$0xff]  ;;  %v3142_v4 = vpack.c.bf16 %v459_v2, %v458_v1  ;;  %v443_v5 = vld [vmem:[%s4052_s21 + $0x8] sm:$0xff]  ;;  %v460_v6 = vld [vmem:[%s4052_s21 + $0x90] sm:$0xff]  ;;  %vm2054_vm2 = vcmask 261120   ;;  %s6282_s30 = scalar_lea.vmem [#allocation14], %s2987_s13  ;;  %s405_s29 = scalar_lea.vmem [#allocation15], %s2988_s3 }
  0xdc   : > { %v461_v7 = vld [vmem:[%s4052_s21 + $0x98] sm:$0xff]  ;;  %v3144_v8 = vpack.c.bf16 %v443_v5, %v442_v3  ;;  %v444_v10 = vld [vmem:[%s4052_s21 + $0x10] sm:$0xff]  ;;  %v462_v12 = vld [vmem:[%s4052_s21 + $0xa0] sm:$0xff]  ;;  %s2807_s8 = sshll.u32 %s405_s29, 4  ;;  %s3043_s20 = sshll.u32 %s3796_s28, 8  ;;  %s6326_s8 = int_to_ptr.vmem [resolvable:$true] %s2807_s8 }
  0xdd   : > { %v3146_v9 = vpack.c.bf16 %v461_v7, %v460_v6  ;;  %3143 = vmatprep.subr.bf16.mxu0 %v3142_v4  ;;  %v445_v11 = vld [vmem:[%s4052_s21 + $0x18] sm:$0xff]  ;;  %v463_v13 = vld [vmem:[%s4052_s21 + $0xa8] sm:$0xff]  ;;  %v731_v18 = vld [vmem:[%s4062_s22] sm:$0xff]  ;;  %s6334_s16 = scalar_lea.hbm %s6459_s7, %s3043_s20  ;;  %s2778_s17 = scalar_lea.sflag [#allocation16], %s4046_s15 }
  0xde   : > { %3145 = vmatpush3.bf16.xpose.msra.mxu0 %v3144_v8  ;;  %v3148_v14 = vpack.c.bf16 %v445_v11, %v444_v10  ;;  %v3150_v15 = vpack.c.bf16 %v463_v13, %v462_v12  ;;  %v4092_v16 = vld [vmem:[%s4062_s22 + $0x8] sm:$0xff]  ;;  %v4095_v17 = vld [vmem:[%s4062_s22 + $0x18] sm:$0xff]  ;;  %v733_v19 = vld [vmem:[%s4062_s22 + $0x10] sm:$0xff]  ;;  %1990 = vxpose.xlu0.b32.start [1/3] (short) %v731_v18, 128  ;;  %s3598_s4 = scalar_lea.vmem %s6326_s8, 512  ;;  %s3728_s18 = smov [#allocation15]  }
  0xdf   : > { %3147 = vmatprep.subr.bf16.mxu0 %v3146_v9  ;;  %v4101_v20 = vpack.c.bf16 %v4095_v17, %v4092_v16  ;;  %v4103_v21 = vpack.c.bf16 %v733_v19, %v731_v18  ;;  %v410_v22 = vld [vmem:[#allocation8] sm:$0xff]  ;;  %v447_v24 = vld [vmem:[%s4052_s21 + $0x28] sm:$0xff]  ;;  %v464_v25 = vld [vmem:[%s4052_s21 + $0xb0] sm:$0xff]  ;;  %p3599_p0 = scmp.ne.s32.totalorder %s6326_s8, %s3598_s4  ;;  %s3602_s10 = sshll.u32 %s3728_s18, 4  ;;  %s3603_s10 = int_to_ptr.vmem [resolvable:$false] %s3602_s10 }
  0xe0   : > { %v446_v23 = vld [vmem:[%s4052_s21 + $0x20] sm:$0xff]  ;;  %3078 = vmatprep.mubr.f32.mxu0 %v410_v22  ;;  %v465_v26 = vld [vmem:[%s4052_s21 + $0xb8] sm:$0xff]  ;;  %v736_v30 = vld [vmem:[#allocation9 + $0x8] sm:$0xff]  ;;  %s3604_s13 = scalar_lea.vmem %s3603_s10, 1024  ;;  %p3605_p10 = scmp.lt.s32.totalorder %s6326_s8, %s3603_s10 }
  0xe1   : > { %6620 = vst [vmem:[#allocation25_spill] sm:$0xff] %v4101_v20  ;;  %6621 = vst [vmem:[#allocation26_spill] sm:$0xff] %v4103_v21  ;;  %3175 = vmatprep.subr.bf16.mxu1 %v4101_v20  ;;  %v735_v27 = vld [vmem:[#allocation9] sm:$0xff]  ;;  %v3152_v28 = vpack.c.bf16 %v447_v24, %v446_v23  ;;  %v3154_v29 = vpack.c.bf16 %v465_v26, %v464_v25  ;;  %v448_v31 = vld [vmem:[%s4052_s21 + $0x30] sm:$0xff]  ;;  %p3600_p4 = pnand %p3599_p0, %p3949_p3  ;;  %p3606_p5 = scmp.lt.s32.totalorder %s3604_s13, %s3598_s4 }
  0xe2   : > { %3177 = vmatpush1.bf16.msra.mxu1 %v4103_v21  ;;  %1991 = vxpose.xlu0.b32.cont [2/3] (short) %v733_v19, 128  ;;  %v449_v32 = vld [vmem:[%s4052_s21 + $0x38] sm:$0xff]  ;;  %v466_v33 = vld [vmem:[%s4052_s21 + $0xc0] sm:$0xff]  ;;  %v467_v34 = vld [vmem:[%s4052_s21 + $0xc8] sm:$0xff] }
  0xe3   : > { %v3156_v35 = vpack.c.bf16 %v449_v32, %v448_v31  ;;  %v3158_v36 = vpack.c.bf16 %v467_v34, %v466_v33  ;;  %v450_v37 = vld [vmem:[%s4052_s21 + $0x40] sm:$0xff]  ;;  %v451_v38 = vld [vmem:[%s4052_s21 + $0x48] sm:$0xff]  ;;  %v468_v39 = vld [vmem:[%s4052_s21 + $0xd0] sm:$0xff]  ;;  %p3601_p6 = pneg %p3600_p4  ;;  %p3607_p9 = por %p3606_p5, %p3605_p10 }
  0xe4   : > { %v469_v40 = vld [vmem:[%s4052_s21 + $0xd8] sm:$0xff]  ;;  %v3160_v41 = vpack.c.bf16 %v451_v38, %v450_v37  ;;  %v452_v43 = vld [vmem:[%s4052_s21 + $0x50] sm:$0xff]  ;;  %v470_v45 = vld [vmem:[%s4052_s21 + $0xe0] sm:$0xff]  ;;  %v3726_v37 = vmov 0.0|0.0  }
  0xe5   : > { %2995 = vmatmul.mubr.msk.f32.vlgmr.msra.gmra.mrb[0].mxu1 %vm737_vm0, %v735_v27  ;;  %v3162_v42 = vpack.c.bf16 %v469_v40, %v468_v39  ;;  %v453_v44 = vld [vmem:[%s4052_s21 + $0x58] sm:$0xff]  ;;  %v471_v46 = vld [vmem:[%s4052_s21 + $0xe8] sm:$0xff]  ;;  %v454_v49 = vld [vmem:[%s4052_s21 + $0x60] sm:$0xff]  ;;  %3178 = vmatprep.subr.bf16.mxu1 %v3726_v37  ;;  %p3608_p8 = pnand %p3607_p9, %p3601_p6 }
  0xe6   : > { %3149 = vmatpush3.bf16.xpose.msra.mxu0 %v3148_v14  ;;  %814 = vmatprep.mubr.f32.mxu1 %v3725_v0  ;;  %v3164_v47 = vpack.c.bf16 %v453_v44, %v452_v43  ;;  %v3166_v48 = vpack.c.bf16 %v471_v46, %v470_v45  ;;  %v455_v50 = vld [vmem:[%s4052_s21 + $0x68] sm:$0xff]  ;;  %v472_v51 = vld [vmem:[%s4052_s21 + $0xf0] sm:$0xff]  ;;  %v473_v52 = vld [vmem:[%s4052_s21 + $0xf8] sm:$0xff] }
  0xe7   : > { %3151 = vmatprep.subr.bf16.mxu0 %v3150_v15  ;;  %v3168_v53 = vpack.c.bf16 %v455_v50, %v454_v49  ;;  %v3170_v54 = vpack.c.bf16 %v473_v52, %v472_v51  ;;  %v456_v55 = vld [vmem:[%s4052_s21 + $0x70] sm:$0xff]  ;;  %v457_v56 = vld [vmem:[%s4052_s21 + $0x78] sm:$0xff]  ;;  %v411_v58 = vld [vmem:[#allocation8 + $0x8] sm:$0xff] }
  0xe8   : > { %v3172_v57 = vpack.c.bf16 %v457_v56, %v456_v55  ;;  %v412_v59 = vld [vmem:[#allocation8 + $0x10] sm:$0xff]  ;;  %v413_v60 = vld [vmem:[#allocation8 + $0x18] sm:$0xff]  ;;  %v414_v61 = vld [vmem:[#allocation8 + $0x20] sm:$0xff] }
  0xe9   : > { %2996 = vmatmul.mubr.msk.f32.gmra.mrb[2].mxu1 %vm737_vm0, %v736_v30  ;;  %v415_v62 = vld [vmem:[#allocation8 + $0x28] sm:$0xff]  ;;  %v416_v63 = vld [vmem:[#allocation8 + $0x30] sm:$0xff]  ;;  %v417_v1 = vld [vmem:[#allocation8 + $0x38] sm:$0xff] }
  0xea   : > { %v418_v2 = vld [vmem:[#allocation8 + $0x40] sm:$0xff]  ;;  %v419_v3 = vld [vmem:[#allocation8 + $0x48] sm:$0xff]  ;;  %v420_v4 = vld [vmem:[#allocation8 + $0x50] sm:$0xff] }
  0xeb   : > { %v421_v5 = vld [vmem:[#allocation8 + $0x58] sm:$0xff]  ;;  %v422_v6 = vld [vmem:[#allocation8 + $0x60] sm:$0xff]  ;;  %v423_v7 = vld [vmem:[#allocation8 + $0x68] sm:$0xff] }
  0xec   : > { %v424_v8 = vld [vmem:[#allocation8 + $0x70] sm:$0xff]  ;;  %v425_v9 = vld [vmem:[#allocation8 + $0x78] sm:$0xff]  ;;  %v426_v10 = vld [vmem:[#allocation8 + $0x80] sm:$0xff] }
  0xed   : > { %v427_v11 = vld [vmem:[#allocation8 + $0x88] sm:$0xff]  ;;  %v428_v12 = vld [vmem:[#allocation8 + $0x90] sm:$0xff]  ;;  %v429_v13 = vld [vmem:[#allocation8 + $0x98] sm:$0xff] }
  0xee   : > { %3153 = vmatpush3.bf16.xpose.msra.mxu0 %v3152_v28  ;;  %v430_v14 = vld [vmem:[#allocation8 + $0xa0] sm:$0xff]  ;;  %v431_v15 = vld [vmem:[#allocation8 + $0xa8] sm:$0xff]  ;;  %v432_v18 = vld [vmem:[#allocation8 + $0xb0] sm:$0xff] }
  0xef   : > { %3155 = vmatprep.subr.bf16.mxu0 %v3154_v29  ;;  %v433_v19 = vld [vmem:[#allocation8 + $0xb8] sm:$0xff]  ;;  %v435_v23 = vld [vmem:[#allocation8 + $0xc8] sm:$0xff]  ;;  %v436_v24 = vld [vmem:[#allocation8 + $0xd0] sm:$0xff] }
  0xf0   : > { %v437_v25 = vld [vmem:[#allocation8 + $0xd8] sm:$0xff]  ;;  %v438_v26 = vld [vmem:[#allocation8 + $0xe0] sm:$0xff]  ;;  %v439_v27 = vld [vmem:[#allocation8 + $0xe8] sm:$0xff] }
  0xf1   : > { %v440_v28 = vld [vmem:[#allocation8 + $0xf0] sm:$0xff]  ;;  %v441_v29 = vld [vmem:[#allocation8 + $0xf8] sm:$0xff]  ;;  %v1908_v38 = vld [vmem:[#allocation11 + $0x10] sm:$0xff] }
  0xf2   : > { %v1906_v34 = vld [vmem:[#allocation11] sm:$0xff]  ;;  %v1909_v39 = vld [vmem:[#allocation11 + $0x18] sm:$0xff]  ;;  %v1912_v44 = vld [vmem:[#allocation11 + $0x30] sm:$0xff] }
  0xf3   : > { %v3182_v40 = vpack.c.bf16 %v1909_v39, %v1908_v38  ;;  %v1913_v45 = vld [vmem:[#allocation11 + $0x38] sm:$0xff]  ;;  %v1916_v50 = vld [vmem:[#allocation11 + $0x50] sm:$0xff] }
  0xf4   : > { %v3188_v46 = vpack.c.bf16 %v1913_v45, %v1912_v44  ;;  %v1917_v51 = vld [vmem:[#allocation11 + $0x58] sm:$0xff]  ;;  %v1920_v56 = vld [vmem:[#allocation11 + $0x70] sm:$0xff] }
  0xf5   : > { %v3194_v52 = vpack.c.bf16 %v1917_v51, %v1916_v50 }
  0xf6   : > { %3157 = vmatpush3.bf16.xpose.msra.mxu0 %v3156_v35  ;;  %v1907_v35 = vld [vmem:[#allocation11 + $0x8] sm:$0xff] }
  0xf7   : > { %3159 = vmatprep.subr.bf16.mxu0 %v3158_v36  ;;  %v3179_v36 = vpack.c.bf16 %v1907_v35, %v1906_v34 }
  0xf9   : > { %3180 = vmatpush1.bf16.msra.mxu1 %v3179_v36 }
  0xfa   : > { %3181 = vmatprep.subr.bf16.mxu1 %v3726_v37 }
  0xfd   : > { %3183 = vmatpush1.bf16.msra.mxu1 %v3182_v40 }
  0xfe   : > { %3161 = vmatpush3.bf16.xpose.msra.mxu0 %v3160_v41  ;;  %3184 = vmatprep.subr.bf16.mxu1 %v3726_v37  ;;  %v1910_v41 = vld [vmem:[#allocation11 + $0x20] sm:$0xff] }
  0xff   : > { %3163 = vmatprep.subr.bf16.mxu0 %v3162_v42  ;;  %v1911_v42 = vld [vmem:[#allocation11 + $0x28] sm:$0xff] }
 0x100   : > { %v3185_v43 = vpack.c.bf16 %v1911_v42, %v1910_v41 }
 0x102   : > { %3186 = vmatpush1.bf16.msra.mxu1 %v3185_v43 }
 0x103   : > { %3187 = vmatprep.subr.bf16.mxu1 %v3726_v37 }
 0x106   : > { %3165 = vmatpush3.bf16.xpose.msra.mxu0 %v3164_v47  ;;  %3189 = vmatpush1.bf16.msra.mxu1 %v3188_v46  ;;  %v1914_v47 = vld [vmem:[#allocation11 + $0x40] sm:$0xff] }
 0x107   : > { %3167 = vmatprep.subr.bf16.mxu0 %v3166_v48  ;;  %3190 = vmatprep.subr.bf16.mxu1 %v3726_v37  ;;  %v1915_v48 = vld [vmem:[#allocation11 + $0x48] sm:$0xff] }
 0x108   : > { %v3191_v49 = vpack.c.bf16 %v1915_v48, %v1914_v47 }
 0x10a   : > { %3192 = vmatpush1.bf16.msra.mxu1 %v3191_v49 }
 0x10b   : > { %3193 = vmatprep.subr.bf16.mxu1 %v3726_v37 }
 0x10e   : > { %3169 = vmatpush3.bf16.xpose.msra.mxu0 %v3168_v53  ;;  %3195 = vmatpush1.bf16.msra.mxu1 %v3194_v52  ;;  %v1918_v53 = vld [vmem:[#allocation11 + $0x60] sm:$0xff] }
 0x10f   : > { %3171 = vmatprep.subr.bf16.mxu0 %v3170_v54  ;;  %3196 = vmatprep.subr.bf16.mxu1 %v3726_v37  ;;  %v1919_v54 = vld [vmem:[#allocation11 + $0x68] sm:$0xff] }
 0x110   : > { %v3197_v55 = vpack.c.bf16 %v1919_v54, %v1918_v53 }
 0x112   : > { %3198 = vmatpush1.bf16.msra.mxu1 %v3197_v55 }
 0x113   : > { %3199 = vmatprep.subr.bf16.mxu1 %v3726_v37 }
 0x116   : > { %3173 = vmatpush3.bf16.xpose.msra.mxu0 %v3172_v57  ;;  %v1921_v57 = vld [vmem:[#allocation11 + $0x78] sm:$0xff] }
 0x11d   : > { %3079 = vmatmul.mubr.f32.vlgmr.msra.gmra.mrb[0].mxu0 %v410_v22  ;;  %v434_v22 = vld [vmem:[#allocation8 + $0xc0] sm:$0xff] }
 0x11e   : > { %3080 = vmatprep.mubr.f32.mxu0 %v411_v58 }
 0x121   : > { %3081 = vmatmul.mubr.f32.gmra.mrb[2].mxu0 %v411_v58  ;;  %v3200_v58 = vpack.c.bf16 %v1921_v57, %v1920_v56 }
 0x122   : > { %3082 = vmatprep.mubr.f32.mxu0 %v412_v59 }
 0x123   : > { %3201 = vmatpush1.bf16.msra.mxu1 %v3200_v58 }
 0x124   : > { %3202 = vmatprep.subr.bf16.mxu1 %v3726_v37 }
 0x125   : > { %3083 = vmatmul.mubr.f32.gmra.mrb[4].mxu0 %v412_v59  ;;  %v1922_v59 = vld [vmem:[#allocation11 + $0x80] sm:$0xff] }
 0x126   : > { %3084 = vmatprep.mubr.f32.mxu0 %v413_v60 }
 0x129   : > { %3085 = vmatmul.mubr.f32.gmra.mrb[6].mxu0 %v413_v60  ;;  %v1923_v60 = vld [vmem:[#allocation11 + $0x88] sm:$0xff] }
 0x12a   : > { %3086 = vmatprep.mubr.f32.mxu0 %v414_v61 }
 0x12d   : > { %3087 = vmatmul.mubr.f32.gmra.mrb[8].mxu0 %v414_v61  ;;  %v3203_v61 = vpack.c.bf16 %v1923_v60, %v1922_v59 }
 0x12e   : > { %3088 = vmatprep.mubr.f32.mxu0 %v415_v62 }
 0x12f   : > { %3204 = vmatpush1.bf16.msra.mxu1 %v3203_v61 }
 0x130   : > { %3205 = vmatprep.subr.bf16.mxu1 %v3726_v37 }
 0x131   : > { %3089 = vmatmul.mubr.f32.gmra.mrb[10].mxu0 %v415_v62 }
 0x132   : > { %3090 = vmatprep.mubr.f32.mxu0 %v416_v63 }
 0x135   : > { %3091 = vmatmul.mubr.f32.gmra.mrb[12].mxu0 %v416_v63 }
 0x136   : > { %3092 = vmatprep.mubr.f32.mxu0 %v417_v1 }
 0x139   : > { %3093 = vmatmul.mubr.f32.gmra.mrb[14].mxu0 %v417_v1 }
 0x13a   : > { %3094 = vmatprep.mubr.f32.mxu0 %v418_v2 }
 0x13d   : > { %3095 = vmatmul.mubr.f32.gmra.mrb[16].mxu0 %v418_v2  ;;  %v1924_v2 = vld [vmem:[#allocation11 + $0x90] sm:$0xff] }
 0x13e   : > { %3096 = vmatprep.mubr.f32.mxu0 %v419_v3 }
 0x141   : > { %3097 = vmatmul.mubr.f32.gmra.mrb[18].mxu0 %v419_v3  ;;  %v1925_v3 = vld [vmem:[#allocation11 + $0x98] sm:$0xff] }
 0x142   : > { %3098 = vmatprep.mubr.f32.mxu0 %v420_v4 }
 0x145   : > { %3099 = vmatmul.mubr.f32.gmra.mrb[20].mxu0 %v420_v4 }
 0x146   : > { %3100 = vmatprep.mubr.f32.mxu0 %v421_v5 }
 0x149   : > { %3101 = vmatmul.mubr.f32.gmra.mrb[22].mxu0 %v421_v5  ;;  %v3206_v5 = vpack.c.bf16 %v1925_v3, %v1924_v2 }
 0x14a   : > { %3102 = vmatprep.mubr.f32.mxu0 %v422_v6 }
 0x14b   : > { %3207 = vmatpush1.bf16.msra.mxu1 %v3206_v5 }
 0x14d   : > { %3103 = vmatmul.mubr.f32.gmra.mrb[24].mxu0 %v422_v6  ;;  %v825_v6 = vlaneseq }
 0x14e   : > { %3104 = vmatprep.mubr.f32.mxu0 %v423_v7 }
 0x151   : > { %3105 = vmatmul.mubr.f32.gmra.mrb[26].mxu0 %v423_v7 }
 0x152   : > { %3106 = vmatprep.mubr.f32.mxu0 %v424_v8 }
 0x155   : > { %3107 = vmatmul.mubr.f32.gmra.mrb[28].mxu0 %v424_v8  ;;  %v4140_v8 = vshrl.u32 %v825_v6, 7 }
 0x156   : > { %3108 = vmatprep.mubr.f32.mxu0 %v425_v9 }
 0x157   : > { %6625 = vst [vmem:[#allocation30_spill] sm:$0xff] %v4140_v8  ;;  %vm828_vm1 = vcmp.eq.s32.totalorder %v4140_v8, 0 }
 0x159   : > { %3109 = vmatmul.mubr.f32.gmra.mrb[30].mxu0 %v425_v9 }
 0x15a   : > { %3110 = vmatprep.mubr.f32.mxu0 %v426_v10 }
 0x15d   : > { %3111 = vmatmul.mubr.f32.gmra.mrb[32].mxu0 %v426_v10  ;;  %v2997_v10 = vsel %vm828_vm1, 1.0, %v3725_v0 }
 0x15e   : > { %3112 = vmatprep.mubr.f32.mxu0 %v427_v11  ;;  %1992 = vxpose.xlu0.b32.end [3/3] (short) %v2997_v10, 128 }
 0x161   : > { %3113 = vmatmul.mubr.f32.gmra.mrb[34].mxu0 %v427_v11 }
 0x162   : > { %3114 = vmatprep.mubr.f32.mxu0 %v428_v12 }
 0x165   : > { %3115 = vmatmul.mubr.f32.gmra.mrb[36].mxu0 %v428_v12 }
 0x166   : > { %3116 = vmatprep.mubr.f32.mxu0 %v429_v13 }
 0x169   : > { %3117 = vmatmul.mubr.f32.gmra.mrb[38].mxu0 %v429_v13 }
 0x16a   : > { %3118 = vmatprep.mubr.f32.mxu0 %v430_v14 }
 0x16d   : > { %3119 = vmatmul.mubr.f32.gmra.mrb[40].mxu0 %v430_v14 }
 0x16e   : > { %3120 = vmatprep.mubr.f32.mxu0 %v431_v15 }
 0x171   : > { %3121 = vmatmul.mubr.f32.gmra.mrb[42].mxu0 %v431_v15 }
 0x172   : > { %3122 = vmatprep.mubr.f32.mxu0 %v432_v18 }
 0x175   : > { %3123 = vmatmul.mubr.f32.gmra.mrb[44].mxu0 %v432_v18 }
 0x176   : > { %3124 = vmatprep.mubr.f32.mxu0 %v433_v19 }
 0x179   : > { %3125 = vmatmul.mubr.f32.gmra.mrb[46].mxu0 %v433_v19 }
 0x17a   : > { %3126 = vmatprep.mubr.f32.mxu0 %v434_v22 }
 0x17d   : > { %3127 = vmatmul.mubr.f32.gmra.mrb[48].mxu0 %v434_v22 }
 0x17e   : > { %3128 = vmatprep.mubr.f32.mxu0 %v435_v23 }
 0x181   : > { %3129 = vmatmul.mubr.f32.gmra.mrb[50].mxu0 %v435_v23 }
 0x182   : > { %3130 = vmatprep.mubr.f32.mxu0 %v436_v24 }
 0x185   : > { %3131 = vmatmul.mubr.f32.gmra.mrb[52].mxu0 %v436_v24 }
 0x186   : > { %3132 = vmatprep.mubr.f32.mxu0 %v437_v25 }
 0x189   : > { %3133 = vmatmul.mubr.f32.gmra.mrb[54].mxu0 %v437_v25 }
 0x18a   : > { %3134 = vmatprep.mubr.f32.mxu0 %v438_v26 }
 0x18d   : > { %3135 = vmatmul.mubr.f32.gmra.mrb[56].mxu0 %v438_v26 }
 0x18e   : > { %3136 = vmatprep.mubr.f32.mxu0 %v439_v27 }
 0x191   : > { %3137 = vmatmul.mubr.f32.gmra.mrb[58].mxu0 %v439_v27 }
 0x192   : > { %3138 = vmatprep.mubr.f32.mxu0 %v440_v28 }
 0x193   : > { %2022 = vxpose.xlu0.b32.start [1/3] (short) %v4092_v16, 128 }
 0x195   : > { %3139 = vmatmul.mubr.f32.gmra.mrb[60].mxu0 %v440_v28 }
 0x196   : > { %3140 = vmatprep.mubr.f32.mxu0 %v441_v29 }
 0x197   : > { %2023 = vxpose.xlu0.b32.cont [2/3] (short) %v4095_v17, 128 }
 0x199   : > { %3141 = vmatmul.mubr.f32.gmra.mrb[62].mxu0 %v441_v29 }
 0x19b   : > { %2024 = vxpose.xlu0.b32.end [3/3] (short) %v2997_v10, 128 }
 0x1b8   : > { %v810_v30 = vpop.f32.mrb[0].mxu1 }
 0x1b9   : > { %v812_v31 = vpop.f32.mrb[1].mxu1 }
 0x1bc   : > { %v4130_v32 = vpop.f32.mrb[2].mxu1 }
 0x1bd   : > { %v4132_v33 = vpop.f32.mrb[3].mxu1 }
 0x1f0   : > { %v540_v62 = vpop.f32.mrb[0].mxu0 }
 0x1f1   : > { %v4134_v63 = vadd.f32 %v810_v30, %v540_v62  ;;  %v542_v1 = vpop.f32.mrb[1].mxu0 }
 0x1f2   : > { %v4136_v4 = vadd.f32 %v812_v31, %v542_v1 }
 0x1f3   : > { %6622 = vst [vmem:[#allocation27_spill] sm:$0xff] %v4134_v63 }
 0x1f4   : > { %6623 = vst [vmem:[#allocation28_spill] sm:$0xff] %v4136_v4  ;;  %v4138_v7 = vpop.f32.mrb[2].mxu0 }
 0x1f5   : > { %6624 = vst [vmem:[#allocation29_spill] sm:$0xff] %v4138_v7  ;;  %v4142_v9 = vpop.f32.mrb[3].mxu0 }
 0x1f6   : > { %6626 = vst [vmem:[#allocation31_spill] sm:$0xff] %v4142_v9 }
 0x1f8   : > { %v4148_v11 = vpop.f32.mrb[4].mxu0 }
 0x1f9   : > { %v4150_v12 = vpop.f32.mrb[5].mxu0 }
 0x1fa   : > { %6627 = vst [vmem:[#allocation32_spill] sm:$0xff] %v4150_v12 }
 0x1fc   : > { %v4152_v13 = vpop.f32.mrb[6].mxu0 }
 0x1fd   : > { %v4154_v14 = vpop.f32.mrb[7].mxu0 }
 0x1fe   : > { %6628 = vst [vmem:[#allocation33_spill] sm:$0xff] %v4154_v14 }
 0x200   : > { %v4156_v15 = vpop.f32.mrb[8].mxu0 }
 0x201   : > { %v4158_v18 = vpop.f32.mrb[9].mxu0 }
 0x202   : > { %6629 = vst [vmem:[#allocation34_spill] sm:$0xff] %v4158_v18 }
 0x204   : > { %v4160_v19 = vpop.f32.mrb[10].mxu0 }
 0x205   : > { %v4162_v22 = vpop.f32.mrb[11].mxu0 }
 0x206   : > { %6630 = vst [vmem:[#allocation35_spill] sm:$0xff] %v4162_v22 }
 0x208   : > { %v4164_v23 = vpop.f32.mrb[12].mxu0 }
 0x209   : > { %v4166_v0 = vpop.f32.mrb[13].mxu0 }
 0x20a   : > { %6631 = vst [vmem:[#allocation36_spill] sm:$0xff] %v4166_v0 }
 0x20c   : > { %v4168_v24 = vpop.f32.mrb[14].mxu0 }
 0x20d   : > { %v4170_v25 = vpop.f32.mrb[15].mxu0 }
 0x20e   : > { %6632 = vst [vmem:[#allocation37_spill] sm:$0xff] %v4170_v25 }
 0x210   : > { %v4172_v26 = vpop.f32.mrb[16].mxu0 }
 0x211   : > { %v4174_v27 = vpop.f32.mrb[17].mxu0 }
 0x212   : > { %6633 = vst [vmem:[#allocation38_spill] sm:$0xff] %v4174_v27 }
 0x214   : > { %v4176_v28 = vpop.f32.mrb[18].mxu0 }
 0x215   : > { %v4178_v29 = vpop.f32.mrb[19].mxu0 }
 0x216   : > { %6634 = vst [vmem:[#allocation39_spill] sm:$0xff] %v4178_v29 }
 0x218   : > { %v4180_v30 = vpop.f32.mrb[20].mxu0 }
 0x219   : > { %v4182_v31 = vpop.f32.mrb[21].mxu0 }
 0x21a   : > { %6635 = vst [vmem:[#allocation40_spill] sm:$0xff] %v4182_v31 }
 0x21c   : > { %v4184_v34 = vpop.f32.mrb[22].mxu0 }
 0x21d   : > { %v4186_v35 = vpop.f32.mrb[23].mxu0 }
 0x21e   : > { %6636 = vst [vmem:[#allocation41_spill] sm:$0xff] %v4186_v35 }
 0x220   : > { %v4188_v36 = vpop.f32.mrb[24].mxu0 }
 0x221   : > { %v4190_v37 = vpop.f32.mrb[25].mxu0 }
 0x222   : > { %6637 = vst [vmem:[#allocation42_spill] sm:$0xff] %v4190_v37 }
 0x224   : > { %v4192_v38 = vpop.f32.mrb[26].mxu0 }
 0x225   : > { %v4194_v39 = vpop.f32.mrb[27].mxu0 }
 0x226   : > { %6638 = vst [vmem:[#allocation43_spill] sm:$0xff] %v4194_v39 }
 0x228   : > { %v4196_v40 = vpop.f32.mrb[28].mxu0 }
 0x229   : > { %v4198_v41 = vpop.f32.mrb[29].mxu0 }
 0x22a   : > { %6639 = vst [vmem:[#allocation44_spill] sm:$0xff] %v4198_v41 }
 0x22c   : > { %v4200_v42 = vpop.f32.mrb[30].mxu0 }
 0x22d   : > { %v4202_v43 = vpop.f32.mrb[31].mxu0 }
 0x22e   : > { %6640 = vst [vmem:[#allocation45_spill] sm:$0xff] %v4202_v43 }
 0x230   : > { %v636_v44 = vpop.f32.mrb[32].mxu0 }
 0x231   : > { %v4206_v45 = vadd.f32 %v4130_v32, %v636_v44  ;;  %v638_v46 = vpop.f32.mrb[33].mxu0 }
 0x232   : > { %v4210_v47 = vadd.f32 %v4132_v33, %v638_v46 }
 0x233   : > { %6641 = vst [vmem:[#allocation46_spill] sm:$0xff] %v4206_v45  ;;  %v842_v48 = vmul.f32 %v4206_v45, %v4134_v63  ;;  %v854_v49 = vmul.f32 %v4206_v45, %v4138_v7  ;;  %v4218_v50 = vmul.f32 %v4206_v45, %v4148_v11  ;;  %v4222_v16 = vmul.f32 %v4206_v45, %v4152_v13 }
 0x234   : > { %6642 = vst [vmem:[#allocation47_spill] sm:$0xff] %v4210_v47  ;;  %v4224_v32 = vpop.f32.mrb[34].mxu0  ;;  %v843_v17 = vmul.f32 %v4210_v47, %v4136_v4  ;;  %v855_v33 = vmul.f32 %v4210_v47, %v4142_v9  ;;  %v4232_v51 = vmul.f32 %v4206_v45, %v4156_v15  ;;  %v4236_v52 = vmul.f32 %v4206_v45, %v4160_v19 }
 0x235   : > { %6643 = vst [vmem:[#allocation48_spill] sm:$0xff] %v4224_v32  ;;  %v4238_v53 = vpop.f32.mrb[35].mxu0  ;;  %v850_v54 = vmul.f32 %v4224_v32, %v4138_v7  ;;  %v844_v55 = vmul.f32 %v4134_v63, %v4224_v32  ;;  %v4246_v56 = vmul.f32 %v4224_v32, %v4160_v19  ;;  %v4250_v57 = vmul.f32 %v4224_v32, %v4164_v23 }
 0x236   : > { %6644 = vst [vmem:[#allocation49_spill] sm:$0xff] %v4236_v52  ;;  %6645 = vst [vmem:[#allocation50_spill] sm:$0xff] %v4238_v53  ;;  %v845_v58 = vmul.f32 %v4136_v4, %v4238_v53  ;;  %v851_v59 = vmul.f32 %v4238_v53, %v4142_v9  ;;  %v4258_v60 = vmul.f32 %v4224_v32, %v4168_v24 }
 0x237   : > { %6646 = vst [vmem:[#allocation51_spill] sm:$0xff] %v4250_v57  ;;  %v4262_v61 = vmul.f32 %v4224_v32, %v4148_v11  ;;  %v852_v62 = vadd.f32 %v850_v54, %v842_v48  ;;  %v4264_v1 = vadd.f32 %v854_v49, %v844_v55  ;;  %v4268_v2 = vmul.f32 %v4224_v32, %v4152_v13 }
 0x238   : > { %6647 = vst [vmem:[#allocation52_spill] sm:$0xff] %v4258_v60  ;;  %v4272_v3 = vmul.f32 %v4206_v45, %v4164_v23  ;;  %v4274_v5 = vpop.f32.mrb[36].mxu0  ;;  %v853_v6 = vadd.f32 %v851_v59, %v843_v17  ;;  %v4276_v10 = vadd.f32 %v855_v33, %v845_v58  ;;  %v4280_v44 = vmul.f32 %v4224_v32, %v4156_v15 }
 0x239   : > { %6648 = vst [vmem:[#allocation53_spill] sm:$0xff] %v4268_v2  ;;  %6650 = vst [vmem:[#allocation55_spill] sm:$0xff] %v4274_v5  ;;  %v4284_v46 = vmul.f32 %v4206_v45, %v4168_v24  ;;  %v4286_v48 = vpop.f32.mrb[37].mxu0  ;;  %v866_v49 = vmul.f32 %v4274_v5, %v4148_v11  ;;  %v4292_v54 = vmul.f32 %v4274_v5, %v4160_v19 }
 0x23a   : > { %6649 = vst [vmem:[#allocation54_spill] sm:$0xff] %v4272_v3  ;;  %6651 = vst [vmem:[#allocation56_spill] sm:$0xff] %v4280_v44  ;;  %v846_v17 = vmul.f32 %v4134_v63, %v4274_v5  ;;  %v4298_v33 = vmul.f32 %v4274_v5, %v4172_v26  ;;  %v867_v55 = vmul.f32 %v4286_v48, %v4150_v12 }
 0x23b   : > { %6652 = vst [vmem:[#allocation57_spill] sm:$0xff] %v4284_v46  ;;  %6653 = vst [vmem:[#allocation58_spill] sm:$0xff] %v4286_v48  ;;  %v4304_v58 = vmul.f32 %v4286_v48, %v4162_v22  ;;  %v4308_v59 = vmul.f32 %v4274_v5, %v4176_v28  ;;  %v1110_v8 = vmul.f32 %v4274_v5, %v4138_v7 }
 0x23c   : > { %6654 = vst [vmem:[#allocation59_spill] sm:$0xff] %v4298_v33  ;;  %v868_v21 = vsub.f32 %v852_v62, %v866_v49  ;;  %v4314_v20 = vmul.f32 %v4274_v5, %v4184_v34  ;;  %v4318_v53 = vmul.f32 %v4274_v5, %v4188_v36  ;;  %v4322_v47 = vmul.f32 %v4274_v5, %v4152_v13  ;;  %v4324_v9 = vpop.f32.mrb[38].mxu0 }
 0x23d   : > { %6655 = vst [vmem:[#allocation60_spill] sm:$0xff] %v4308_v59  ;;  %6659 = vst [vmem:[#allocation64_spill] sm:$0xff] %v4324_v9  ;;  %v869_v4 = vsub.f32 %v853_v6, %v867_v55  ;;  %v4328_v48 = vmul.f32 %v4206_v45, %v4172_v26  ;;  %v4332_v62 = vmul.f32 %v4224_v32, %v4184_v34 }
 0x23e   : > { %6656 = vst [vmem:[#allocation61_spill] sm:$0xff] %v4314_v20  ;;  %6657 = vst [vmem:[#allocation62_spill] sm:$0xff] %v4318_v53  ;;  %v4336_v49 = vmul.f32 %v4274_v5, %v4156_v15  ;;  %v4338_v53 = vpop.f32.mrb[39].mxu0  ;;  %v882_v20 = vmul.f32 %v4324_v9, %v4152_v13  ;;  %v4344_v6 = vmul.f32 %v4324_v9, %v4164_v23 }
 0x23f   : > { %6658 = vst [vmem:[#allocation63_spill] sm:$0xff] %v4322_v47  ;;  %6660 = vst [vmem:[#allocation65_spill] sm:$0xff] %v4328_v48  ;;  %v4348_v55 = vmul.f32 %v4324_v9, %v4172_v26  ;;  %v883_v5 = vmul.f32 %v4338_v53, %v4154_v14  ;;  %v4358_v48 = vmul.f32 %v4338_v53, %v4166_v0 }
 0x240   : > { %6661 = vst [vmem:[#allocation66_spill] sm:$0xff] %v4332_v62  ;;  %6662 = vst [vmem:[#allocation67_spill] sm:$0xff] %v4336_v49  ;;  %v4352_v62 = vmul.f32 %v4134_v63, %v4324_v9  ;;  %v4362_v49 = vmul.f32 %v4324_v9, %v4180_v30  ;;  %v4366_v47 = vmul.f32 %v4324_v9, %v4184_v34  ;;  %v4380_v2 = vpop.f32.mrb[40].mxu0 }
 0x241   : > { %6663 = vst [vmem:[#allocation68_spill] sm:$0xff] %v4338_v53  ;;  %6664 = vst [vmem:[#allocation69_spill] sm:$0xff] %v4348_v55  ;;  %v884_v46 = vsub.f32 %v868_v21, %v882_v20  ;;  %v4370_v3 = vmul.f32 %v4324_v9, %v4138_v7  ;;  %v4374_v44 = vmul.f32 %v4324_v9, %v4192_v38 }
 0x242   : > { %6665 = vst [vmem:[#allocation70_spill] sm:$0xff] %v4362_v49  ;;  %6666 = vst [vmem:[#allocation71_spill] sm:$0xff] %v4366_v47  ;;  %v4378_v53 = vmul.f32 %v4324_v9, %v4148_v11  ;;  %v885_v49 = vsub.f32 %v869_v4, %v883_v5  ;;  %v4384_v52 = vmul.f32 %v4206_v45, %v4176_v28 }
 0x243   : > { %6667 = vst [vmem:[#allocation72_spill] sm:$0xff] %v4374_v44  ;;  %6669 = vst [vmem:[#allocation74_spill] sm:$0xff] %v4380_v2  ;;  %v4388_v20 = vmul.f32 %v4224_v32, %v4188_v36  ;;  %v4392_v21 = vmul.f32 %v4324_v9, %v4196_v40  ;;  %v4394_v44 = vpop.f32.mrb[41].mxu0  ;;  %v4400_v4 = vmul.f32 %v4380_v2, %v4168_v24 }
 0x244   : > { %6668 = vst [vmem:[#allocation73_spill] sm:$0xff] %v4378_v53  ;;  %6670 = vst [vmem:[#allocation75_spill] sm:$0xff] %v4384_v52  ;;  %v898_v53 = vmul.f32 %v4380_v2, %v4156_v15  ;;  %v4404_v5 = vmul.f32 %v4380_v2, %v4176_v28  ;;  %v4414_v52 = vmul.f32 %v4394_v44, %v4170_v25  ;;  %v4436_v60 = vpop.f32.mrb[42].mxu0 }
 0x245   : > { %6671 = vst [vmem:[#allocation76_spill] sm:$0xff] %v4388_v20  ;;  %6672 = vst [vmem:[#allocation77_spill] sm:$0xff] %v4392_v21  ;;  %v4408_v20 = vmul.f32 %v4380_v2, %v4180_v30  ;;  %v899_v21 = vmul.f32 %v4394_v44, %v4158_v18  ;;  %v4418_v32 = vmul.f32 %v4134_v63, %v4380_v2 }
 0x246   : > { %6673 = vst [vmem:[#allocation78_spill] sm:$0xff] %v4394_v44  ;;  %6674 = vst [vmem:[#allocation79_spill] sm:$0xff] %v4404_v5  ;;  %v4422_v45 = vmul.f32 %v4380_v2, %v4188_v36  ;;  %v900_v47 = vsub.f32 %v884_v46, %v898_v53  ;;  %v4426_v59 = vmul.f32 %v4380_v2, %v4192_v38 }
 0x247   : > { %6675 = vst [vmem:[#allocation80_spill] sm:$0xff] %v4408_v20  ;;  %v4430_v20 = vmul.f32 %v4380_v2, %v4138_v7  ;;  %v4434_v44 = vmul.f32 %v4380_v2, %v4196_v40  ;;  %6679 = vst [vmem:[#allocation84_spill] sm:$0xff] %v4436_v60  ;;  %v901_v33 = vsub.f32 %v885_v49, %v899_v21 }
 0x248   : > { %6676 = vst [vmem:[#allocation81_spill] sm:$0xff] %v4422_v45  ;;  %6677 = vst [vmem:[#allocation82_spill] sm:$0xff] %v4426_v59  ;;  %v4440_v43 = vmul.f32 %v4380_v2, %v4148_v11  ;;  %v4444_v53 = vmul.f32 %v4380_v2, %v4152_v13  ;;  %v4448_v46 = vmul.f32 %v4324_v9, %v4156_v15  ;;  %v4450_v59 = vpop.f32.mrb[43].mxu0 }
 0x249   : > { %6678 = vst [vmem:[#allocation83_spill] sm:$0xff] %v4434_v44  ;;  %6683 = vst [vmem:[#allocation88_spill] sm:$0xff] %v4450_v59  ;;  %v914_v44 = vmul.f32 %v4436_v60, %v4160_v19  ;;  %v870_v49 = vmul.f32 %v4436_v60, %v4148_v11  ;;  %v858_v21 = vmul.f32 %v4436_v60, %v4138_v7  ;;  %v4477_v55 = vpop.f32.mrb[44].mxu0 }
 0x24a   : > { %6680 = vst [vmem:[#allocation85_spill] sm:$0xff] %v4440_v43  ;;  %6681 = vst [vmem:[#allocation86_spill] sm:$0xff] %v4444_v53  ;;  %v4460_v43 = vmul.f32 %v4436_v60, %v4184_v34  ;;  %v871_v2 = vmul.f32 %v4450_v59, %v4150_v12  ;;  %v915_v9 = vmul.f32 %v4450_v59, %v4162_v22  ;;  %v4486_v57 = vpop.f32.mrb[45].mxu0 }
 0x24b   : > { %6682 = vst [vmem:[#allocation87_spill] sm:$0xff] %v4448_v46  ;;  %v4468_v46 = vmul.f32 %v4436_v60, %v4188_v36  ;;  %v1100_v53 = vmul.f32 %v4134_v63, %v4436_v60  ;;  %v916_v45 = vadd.f32 %v914_v44, %v900_v47  ;;  %v872_v41 = vadd.f32 %v870_v49, %v4264_v1 }
 0x24c   : > { %6684 = vst [vmem:[#allocation89_spill] sm:$0xff] %v4460_v43  ;;  %v860_v5 = vadd.f32 %v858_v21, %v846_v17  ;;  %v4475_v43 = vmul.f32 %v4436_v60, %v4172_v26  ;;  %6687 = vst [vmem:[#allocation92_spill] sm:$0xff] %v4477_v55  ;;  %v873_v12 = vadd.f32 %v871_v2, %v4276_v10  ;;  %v4513_v49 = vpop.f32.mrb[46].mxu0 }
 0x24d   : > { %6685 = vst [vmem:[#allocation90_spill] sm:$0xff] %v4468_v46  ;;  %v917_v22 = vadd.f32 %v915_v9, %v901_v33  ;;  %v4480_v59 = vadd.f32 %v1110_v8, %v1100_v53  ;;  %v4484_v46 = vmul.f32 %v4436_v60, %v4176_v28  ;;  %6689 = vst [vmem:[#allocation94_spill] sm:$0xff] %v4486_v57 }
 0x24e   : > { %6686 = vst [vmem:[#allocation91_spill] sm:$0xff] %v4475_v43  ;;  %v930_v47 = vmul.f32 %v4477_v55, %v4164_v23  ;;  %v886_v1 = vmul.f32 %v4477_v55, %v4152_v13  ;;  %v876_v44 = vadd.f32 %v4218_v50, %v860_v5  ;;  %v4495_v2 = vmul.f32 %v4477_v55, %v4184_v34 }
 0x24f   : > { %6688 = vst [vmem:[#allocation93_spill] sm:$0xff] %v4484_v46  ;;  %v887_v8 = vmul.f32 %v4486_v57, %v4154_v14  ;;  %v931_v9 = vmul.f32 %v4486_v57, %v4166_v0  ;;  %v862_v10 = vmul.f32 %v4477_v55, %v4138_v7  ;;  %v4505_v17 = vmul.f32 %v4477_v55, %v4192_v38  ;;  %v4518_v46 = vpop.f32.mrb[47].mxu0 }
 0x250   : > { %v932_v33 = vadd.f32 %v930_v47, %v916_v45  ;;  %v888_v53 = vadd.f32 %v886_v1, %v872_v41  ;;  %v4511_v5 = vmul.f32 %v4477_v55, %v4172_v26  ;;  %6691 = vst [vmem:[#allocation96_spill] sm:$0xff] %v4513_v49  ;;  %v1102_v14 = vmul.f32 %v4134_v63, %v4477_v55 }
 0x251   : > { %6690 = vst [vmem:[#allocation95_spill] sm:$0xff] %v4505_v17  ;;  %v889_v21 = vadd.f32 %v887_v8, %v873_v12  ;;  %v933_v57 = vadd.f32 %v931_v9, %v917_v22  ;;  %v864_v0 = vadd.f32 %v862_v10, %v4352_v62  ;;  %6692 = vst [vmem:[#allocation97_spill] sm:$0xff] %v4518_v46 }
 0x252   : > { %v946_v41 = vmul.f32 %v4513_v49, %v4168_v24  ;;  %v902_v45 = vmul.f32 %v4513_v49, %v4156_v15  ;;  %v4526_v47 = vmul.f32 %v4513_v49, %v4188_v36  ;;  %v4530_v12 = vmul.f32 %v4513_v49, %v4192_v38 }
 0x253   : > { %v903_v22 = vmul.f32 %v4518_v46, %v4158_v18  ;;  %v947_v62 = vmul.f32 %v4518_v46, %v4170_v25  ;;  %v1106_v1 = vmul.f32 %v4513_v49, %v4138_v7  ;;  %v4540_v8 = vmul.f32 %v4513_v49, %v4176_v28  ;;  %v4549_v18 = vpop.f32.mrb[48].mxu0 }
 0x254   : > { %v948_v9 = vadd.f32 %v946_v41, %v932_v33  ;;  %v904_v10 = vadd.f32 %v902_v45, %v888_v53  ;;  %v4543_v50 = vadd.f32 %v4370_v3, %v1102_v14  ;;  %v4547_v43 = vmul.f32 %v4513_v49, %v4180_v30  ;;  %6695 = vst [vmem:[#allocation100_spill] sm:$0xff] %v4549_v18  ;;  %v4556_v55 = vpop.f32.mrb[49].mxu0 }
 0x255   : > { %6693 = vst [vmem:[#allocation98_spill] sm:$0xff] %v4540_v8  ;;  %v905_v60 = vadd.f32 %v903_v22, %v889_v21  ;;  %v949_v46 = vadd.f32 %v947_v62, %v933_v57  ;;  %v4552_v25 = vadd.f32 %v1106_v1, %v4418_v32  ;;  %v1104_v7 = vmul.f32 %v4134_v63, %v4513_v49  ;;  %v4581_v1 = vpop.f32.mrb[50].mxu0 }
 0x256   : > { %6694 = vst [vmem:[#allocation99_spill] sm:$0xff] %v4547_v43  ;;  %6696 = vst [vmem:[#allocation101_spill] sm:$0xff] %v4556_v55  ;;  %v962_v14 = vmul.f32 %v4549_v18, %v4172_v26  ;;  %v920_v3 = vsub.f32 %v904_v10, %v4292_v54  ;;  %v4563_v33 = vmul.f32 %v4549_v18, %v4184_v34  ;;  %v4588_v43 = vpop.f32.mrb[51].mxu0 }
 0x257   : > { %v890_v57 = vmul.f32 %v4549_v18, %v4152_v13  ;;  %v921_v32 = vsub.f32 %v905_v60, %v4304_v58  ;;  %v963_v53 = vmul.f32 %v4556_v55, %v4174_v27  ;;  %v4572_v21 = vmul.f32 %v4556_v55, %v4186_v35  ;;  %6698 = vst [vmem:[#allocation103_spill] sm:$0xff] %v4581_v1 }
 0x258   : > { %v878_v41 = vmul.f32 %v4549_v18, %v4148_v11  ;;  %v964_v54 = vsub.f32 %v948_v9, %v962_v14  ;;  %v936_v45 = vsub.f32 %v920_v3, %v4344_v6  ;;  %v4579_v62 = vmul.f32 %v4549_v18, %v4196_v40  ;;  %6699 = vst [vmem:[#allocation104_spill] sm:$0xff] %v4588_v43 }
 0x259   : > { %v892_v22 = vadd.f32 %v890_v57, %v876_v44  ;;  %v937_v60 = vsub.f32 %v921_v32, %v4358_v48  ;;  %v965_v58 = vsub.f32 %v949_v46, %v963_v53  ;;  %v4586_v55 = vmul.f32 %v4549_v18, %v4164_v23 }
 0x25a   : > { %6697 = vst [vmem:[#allocation102_spill] sm:$0xff] %v4579_v62  ;;  %v880_v10 = vsub.f32 %v864_v0, %v878_v41  ;;  %v978_v6 = vmul.f32 %v4581_v1, %v4176_v28  ;;  %v952_v44 = vsub.f32 %v936_v45, %v4400_v4  ;;  %v4595_v9 = vmul.f32 %v4581_v1, %v4188_v36  ;;  %v4613_v41 = vpop.f32.mrb[52].mxu0 }
 0x25b   : > { %v906_v48 = vmul.f32 %v4581_v1, %v4156_v15  ;;  %v953_v0 = vsub.f32 %v937_v60, %v4414_v52  ;;  %v979_v46 = vmul.f32 %v4588_v43, %v4178_v29  ;;  %v4604_v14 = vmul.f32 %v4588_v43, %v4190_v37  ;;  %6701 = vst [vmem:[#allocation106_spill] sm:$0xff] %v4613_v41 }
 0x25c   : > { %v896_v3 = vadd.f32 %v4222_v16, %v880_v10  ;;  %v980_v57 = vsub.f32 %v964_v54, %v978_v6  ;;  %v4609_v32 = vmul.f32 %v4581_v1, %v4196_v40  ;;  %v1122_v53 = vmul.f32 %v4581_v1, %v4148_v11  ;;  %v4627_v54 = vpop.f32.mrb[53].mxu0 }
 0x25d   : > { %v908_v4 = vadd.f32 %v906_v48, %v892_v22  ;;  %v981_v52 = vsub.f32 %v965_v58, %v979_v46  ;;  %v4617_v45 = vmul.f32 %v4581_v1, %v4168_v24  ;;  %v4621_v60 = vmul.f32 %v4549_v18, %v4160_v19  ;;  %6704 = vst [vmem:[#allocation109_spill] sm:$0xff] %v4627_v54  ;;  %v4659_v63 = vpop.f32.mrb[54].mxu0 }
 0x25e   : > { %6700 = vst [vmem:[#allocation105_spill] sm:$0xff] %v4609_v32  ;;  %v4625_v16 = vmul.f32 %v4581_v1, %v4200_v42  ;;  %v994_v22 = vmul.f32 %v4613_v41, %v4180_v30  ;;  %v4633_v58 = vmul.f32 %v4613_v41, %v4192_v38  ;;  %v4638_v6 = vmul.f32 %v4613_v41, %v4196_v40 }
 0x25f   : > { %6702 = vst [vmem:[#allocation107_spill] sm:$0xff] %v4621_v60  ;;  %v924_v10 = vsub.f32 %v908_v4, %v4246_v56  ;;  %v995_v48 = vmul.f32 %v4627_v54, %v4182_v31  ;;  %v4644_v46 = vmul.f32 %v4627_v54, %v4194_v39  ;;  %v910_v43 = vmul.f32 %v4613_v41, %v4156_v15 }
 0x260   : > { %6703 = vst [vmem:[#allocation108_spill] sm:$0xff] %v4625_v16  ;;  %v1124_v16 = vsub.f32 %v4552_v25, %v1122_v53  ;;  %v996_v49 = vsub.f32 %v980_v57, %v994_v22  ;;  %v1138_v56 = vmul.f32 %v4613_v41, %v4152_v13  ;;  %v4653_v4 = vmul.f32 %v4613_v41, %v4200_v42  ;;  %v4668_v57 = vpop.f32.mrb[55].mxu0 }
 0x261   : > { %v4657_v60 = vmul.f32 %v4613_v41, %v4168_v24  ;;  %v997_v54 = vsub.f32 %v981_v52, %v995_v48  ;;  %v912_v18 = vadd.f32 %v910_v43, %v896_v3  ;;  %v4662_v62 = vadd.f32 %v4430_v20, %v1104_v7  ;;  %6709 = vst [vmem:[#allocation114_spill] sm:$0xff] %v4668_v57  ;;  %v4686_v8 = vpop.f32.mrb[56].mxu0 }
 0x262   : > { %6705 = vst [vmem:[#allocation110_spill] sm:$0xff] %v4653_v4  ;;  %v4666_v25 = vmul.f32 %v4581_v1, %v4160_v19  ;;  %v1010_v53 = vmul.f32 %v4659_v63, %v4184_v34  ;;  %v966_v22 = vmul.f32 %v4659_v63, %v4172_v26  ;;  %v938_v4 = vmul.f32 %v4659_v63, %v4164_v23  ;;  %v4691_v41 = vpop.f32.mrb[57].mxu0 }
 0x263   : > { %6706 = vst [vmem:[#allocation111_spill] sm:$0xff] %v4657_v60  ;;  %6707 = vst [vmem:[#allocation112_spill] sm:$0xff] %v4662_v62  ;;  %v926_v43 = vmul.f32 %v4659_v63, %v4160_v19  ;;  %v967_v7 = vmul.f32 %v4668_v57, %v4174_v27  ;;  %v1011_v20 = vmul.f32 %v4668_v57, %v4186_v35  ;;  %v6763_v57 = vld [vmem:[#allocation99_spill] sm:$0xff] }
 0x264   : > { %6708 = vst [vmem:[#allocation113_spill] sm:$0xff] %v4666_v25  ;;  %v1140_v3 = vsub.f32 %v1124_v16, %v1138_v56  ;;  %v4684_v52 = vmul.f32 %v4659_v63, %v4200_v42  ;;  %v1012_v48 = vsub.f32 %v996_v49, %v1010_v53  ;;  %v968_v60 = vsub.f32 %v952_v44, %v966_v22  ;;  %v6711_v44 = vld [vmem:[#allocation51_spill] sm:$0xff] }
 0x265   : > { %v940_v1 = vsub.f32 %v924_v10, %v938_v4  ;;  %v928_v25 = vadd.f32 %v926_v43, %v912_v18  ;;  %v969_v17 = vsub.f32 %v953_v0, %v967_v7  ;;  %v1013_v62 = vsub.f32 %v997_v54, %v1011_v20  ;;  %6710 = vst [vmem:[#allocation115_spill] sm:$0xff] %v4691_v41  ;;  %v4715_v7 = vpop.f32.mrb[58].mxu0 }
 0x266   : > { %v1156_v32 = vadd.f32 %v4232_v51, %v1140_v3  ;;  %v1142_v27 = vmul.f32 %v4659_v63, %v4152_v13  ;;  %v1026_v16 = vmul.f32 %v4686_v8, %v4188_v36  ;;  %v982_v49 = vmul.f32 %v4686_v8, %v4176_v28  ;;  %v4719_v35 = vpop.f32.mrb[59].mxu0 }
 0x267   : > { %v954_v18 = vmul.f32 %v4686_v8, %v4168_v24  ;;  %v944_v10 = vsub.f32 %v928_v25, %v6711_v44  ;;  %v983_v0 = vmul.f32 %v4691_v41, %v4178_v29  ;;  %v1027_v51 = vmul.f32 %v4691_v41, %v4190_v37  ;;  %6713 = vst [vmem:[#allocation51_spill] sm:$0xff] %v4719_v35 }
 0x268   : > { %v4706_v54 = vmul.f32 %v4686_v8, %v4200_v42  ;;  %v1170_v56 = vmul.f32 %v4686_v8, %v4160_v19  ;;  %v1028_v4 = vsub.f32 %v1012_v48, %v1026_v16  ;;  %v984_v53 = vsub.f32 %v968_v60, %v982_v49  ;;  %v6714_v60 = vld [vmem:[#allocation69_spill] sm:$0xff] }
 0x269   : > { %v956_v22 = vsub.f32 %v940_v1, %v954_v18  ;;  %v6712_v43 = vsub.f32 %v4480_v59, %v4262_v61  ;;  %v985_v20 = vsub.f32 %v969_v17, %v983_v0  ;;  %v1029_v3 = vsub.f32 %v1013_v62, %v1027_v51  ;;  %v6715_v18 = vld [vmem:[#allocation79_spill] sm:$0xff] }
 0x26a   : > { %v1172_v44 = vadd.f32 %v1170_v56, %v1156_v32  ;;  %v1158_v37 = vmul.f32 %v4686_v8, %v4156_v15  ;;  %v1042_v48 = vmul.f32 %v4715_v7, %v4192_v38  ;;  %v998_v1 = vmul.f32 %v4715_v7, %v4180_v30  ;;  %v4740_v56 = vpop.f32.mrb[60].mxu0 }
 0x26b   : > { %v4713_v25 = vsub.f32 %v6712_v43, %v1142_v27  ;;  %v972_v61 = vsub.f32 %v956_v22, %v6714_v60  ;;  %v4728_v27 = vmul.f32 %v4715_v7, %v4200_v42  ;;  %v999_v59 = vmul.f32 %v4719_v35, %v4182_v31  ;;  %v4742_v29 = vpop.f32.mrb[61].mxu0 }
 0x26c   : > { %v1043_v17 = vmul.f32 %v4719_v35, %v4194_v39  ;;  %v958_v62 = vmul.f32 %v4715_v7, %v4168_v24  ;;  %v1186_v32 = vmul.f32 %v4715_v7, %v4164_v23  ;;  %v1044_v16 = vsub.f32 %v1028_v4, %v1042_v48  ;;  %6716 = vst [vmem:[#allocation69_spill] sm:$0xff] %v4742_v29 }
 0x26d   : > { %v1000_v49 = vsub.f32 %v984_v53, %v998_v1  ;;  %v988_v0 = vsub.f32 %v972_v61, %v6715_v18  ;;  %v1160_v51 = vsub.f32 %v4713_v25, %v1158_v37  ;;  %v1001_v22 = vsub.f32 %v985_v20, %v999_v59  ;;  %v6717_v25 = vld [vmem:[#allocation44_spill] sm:$0xff] }
 0x26e   : > { %v1045_v43 = vsub.f32 %v1029_v3, %v1043_v17  ;;  %v960_v60 = vsub.f32 %v944_v10, %v958_v62  ;;  %v1188_v31 = vadd.f32 %v1186_v32, %v1172_v44  ;;  %v1058_v35 = vmul.f32 %v4740_v56, %v4196_v40  ;;  %v6718_v10 = vld [vmem:[#allocation45_spill] sm:$0xff]  ;;  %v6719_v44 = vld [vmem:[#allocation59_spill] sm:$0xff]  ;;  %v4760_v17 = vpop.f32.mrb[62].mxu0  ;;  %v6720_v32 = vld [vmem:[#allocation52_spill] sm:$0xff] }
 0x26f   : > { %v1016_v39 = vsub.f32 %v1000_v49, %v4563_v33  ;;  %v1078_v4 = vmul.f32 %v4740_v56, %v4200_v42  ;;  %v1002_v53 = vmul.f32 %v4740_v56, %v4180_v30  ;;  %v1017_v37 = vsub.f32 %v1001_v22, %v4572_v21  ;;  %v4766_v22 = vpop.f32.mrb[63].mxu0 }
 0x270   : > { %v1059_v20 = vmul.f32 %v4742_v29, %v6717_v25  ;;  %v1079_v3 = vmul.f32 %v4742_v29, %v6718_v10  ;;  %v976_v48 = vadd.f32 %v6719_v44, %v960_v60  ;;  %v1060_v1 = vadd.f32 %v1058_v35, %v1044_v16  ;;  %6721 = vst [vmem:[#allocation79_spill] sm:$0xff] %v4766_v22 }
 0x271   : > { %v1032_v61 = vsub.f32 %v1016_v39, %v4595_v9  ;;  %v1004_v33 = vsub.f32 %v988_v0, %v1002_v53  ;;  %v990_v59 = vmul.f32 %v4740_v56, %v4176_v28  ;;  %v1033_v62 = vsub.f32 %v1017_v37, %v4604_v14 }
 0x272   : > { %v1061_v21 = vadd.f32 %v1059_v20, %v1045_v43  ;;  %v1204_v49 = vsub.f32 %v1188_v31, %v6720_v32  ;;  %v1218_v18 = vmul.f32 %v4740_v56, %v4172_v26  ;;  %v1074_v35 = vmul.f32 %v4760_v17, %v4200_v42 }
 0x273   : > { %v1048_v39 = vsub.f32 %v1032_v61, %v4633_v58  ;;  %v1062_v9 = vmul.f32 %v4760_v17, %v4196_v40  ;;  %v1020_v16 = vsub.f32 %v1004_v33, %v4495_v2  ;;  %v1049_v14 = vsub.f32 %v1033_v62, %v4644_v46  ;;  %v6725_v62 = vld [vmem:[#allocation80_spill] sm:$0xff] }
 0x274   : > { %v1063_v31 = vmul.f32 %v4766_v22, %v6717_v25  ;;  %v1075_v0 = vmul.f32 %v4766_v22, %v6718_v10  ;;  %v1050_v43 = vmul.f32 %v4760_v17, %v4192_v38  ;;  %v4781_v60 = vsub.f32 %v1060_v1, %v1074_v35 }
 0x275   : > { %v1064_v53 = vsub.f32 %v1048_v39, %v1062_v9  ;;  %v1036_v58 = vsub.f32 %v1020_v16, %v4526_v47  ;;  %v992_v37 = vadd.f32 %v990_v59, %v976_v48  ;;  %v1038_v2 = vmul.f32 %v4760_v17, %v4188_v36  ;;  %v6727_v47 = vld [vmem:[#allocation60_spill] sm:$0xff]  ;;  %v6728_v59 = vld [vmem:[#allocation49_spill] sm:$0xff] }
 0x276   : > { %6722 = vst [vmem:[#allocation59_spill] sm:$0xff] %v4781_v60  ;;  %v1065_v20 = vsub.f32 %v1049_v14, %v1063_v31  ;;  %v4784_v44 = vsub.f32 %v1061_v21, %v1075_v0  ;;  %v1220_v46 = vsub.f32 %v1204_v49, %v1218_v18  ;;  %1926 = vxpose.xlu1.b32.start [1/16] %v4781_v60, 128  ;;  %v6729_v18 = vld [vmem:[#allocation89_spill] sm:$0xff]  ;;  %v6730_v14 = vld [vmem:[#allocation70_spill] sm:$0xff] }
 0x277   : > { %v4789_v61 = vadd.f32 %v1078_v4, %v1064_v53  ;;  %v1052_v33 = vsub.f32 %v1036_v58, %v1050_v43  ;;  %v1008_v32 = vsub.f32 %v992_v37, %v6725_v62  ;;  %v1266_v1 = vmul.f32 %v4760_v17, %v4184_v34  ;;  %v6749_v60 = vld [vmem:[#allocation54_spill] sm:$0xff] }
 0x278   : > { %6723 = vst [vmem:[#allocation52_spill] sm:$0xff] %v4784_v44  ;;  %v4794_v35 = vadd.f32 %v1079_v3, %v1065_v20  ;;  %v1236_v48 = vadd.f32 %v6727_v47, %v1220_v46  ;;  %v1176_v21 = vadd.f32 %v6728_v59, %v1160_v51  ;;  %v1254_v39 = vmul.f32 %v4760_v17, %v4180_v30 }
 0x279   : > { %6724 = vst [vmem:[#allocation116_spill] sm:$0xff] %v4789_v61  ;;  %v1068_v4 = vsub.f32 %v1052_v33, %v4638_v6  ;;  %v1024_v9 = vadd.f32 %v6729_v18, %v1008_v32  ;;  %v1302_v16 = vmul.f32 %v4740_v56, %v4192_v38  ;;  %v4812_v0 = vmul.f32 %v4715_v7, %v4196_v40  ;;  %v6732_v32 = vld [vmem:[#allocation90_spill] sm:$0xff]  ;;  %v6736_v18 = vld [vmem:[#allocation112_spill] sm:$0xff] }
 0x27a   : > { %6726 = vst [vmem:[#allocation80_spill] sm:$0xff] %v4794_v35  ;;  %v3208_v3 = vpack.c.bf16 %v4794_v35, %v4784_v44  ;;  %v1252_v31 = vadd.f32 %v6730_v14, %v1236_v48  ;;  %v1192_v51 = vadd.f32 %v4586_v55, %v1176_v21  ;;  %1927 = vxpose.xlu1.b32.cont [2/16] %v4789_v61, 128  ;;  %v6733_v48 = vld [vmem:[#allocation106_spill] sm:$0xff]  ;;  %v6735_v21 = vld [vmem:[#allocation53_spill] sm:$0xff]  ;;  %v6737_v14 = vld [vmem:[#allocation95_spill] sm:$0xff] }
 0x27b   : > { %v4816_v6 = vadd.f32 %v4728_v27, %v1068_v4  ;;  %v1040_v43 = vadd.f32 %v1038_v2, %v1024_v9  ;;  %v1130_v53 = vmul.f32 %v4659_v63, %v4148_v11  ;;  %v1162_v58 = vmul.f32 %v4715_v7, %v4156_v15  ;;  %v6756_v35 = vld [vmem:[#allocation96_spill] sm:$0xff] }
 0x27c   : > { %3209 = vmatprep.subr.bf16.mxu1 %v3208_v3  ;;  %v1268_v37 = vsub.f32 %v1252_v31, %v1266_v1  ;;  %v1208_v55 = vadd.f32 %v4617_v45, %v1192_v51  ;;  %v1242_v20 = vmul.f32 %v4760_v17, %v4176_v28  ;;  %v4827_v46 = vmul.f32 %v4740_v56, %v4188_v36 }
 0x27d   : > { %6731 = vst [vmem:[#allocation60_spill] sm:$0xff] %v4816_v6  ;;  %v1056_v27 = vsub.f32 %v1040_v43, %v4530_v12  ;;  %v1132_v2 = vadd.f32 %v1130_v53, %v4543_v50  ;;  %v4833_v33 = vmul.f32 %v4686_v8, %v4196_v40  ;;  %v1134_v62 = vmul.f32 %v4686_v8, %v4148_v11  ;;  %v6734_v50 = vld [vmem:[#allocation105_spill] sm:$0xff]  ;;  %v6739_v43 = vld [vmem:[#allocation92_spill] sm:$0xff] }
 0x27e   : > { %v1284_v45 = vadd.f32 %v6732_v32, %v1268_v37  ;;  %v1224_v1 = vsub.f32 %v1208_v55, %v4511_v5  ;;  %v1150_v47 = vmul.f32 %v4715_v7, %v4152_v13  ;;  %v1198_v59 = vmul.f32 %v6733_v48, %v4164_v23  ;;  %1928 = vxpose.xlu1.b32.cont [3/16] %v4816_v6, 128  ;;  %v6738_v5 = vld [vmem:[#allocation98_spill] sm:$0xff]  ;;  %v6750_v6 = vld [vmem:[#allocation113_spill] sm:$0xff] }
 0x27f   : > { %v1072_v12 = vadd.f32 %v6734_v50, %v1056_v27  ;;  %v1148_v4 = vsub.f32 %v1132_v2, %v6735_v21  ;;  %v1136_v9 = vadd.f32 %v1134_v62, %v6736_v18  ;;  %v1230_v3 = vmul.f32 %v4760_v17, %v4172_v26  ;;  %v6741_v32 = vld [vmem:[#allocation102_spill] sm:$0xff]  ;;  %v6743_v18 = vld [vmem:[#allocation27_spill] sm:$0xff] }
 0x280   : > { %v1300_v31 = vadd.f32 %v6737_v14, %v1284_v45  ;;  %v1240_v51 = vsub.f32 %v1224_v1, %v6738_v5  ;;  %v1262_v53 = vmul.f32 %v6739_v43, %v4180_v30  ;;  %v4855_v37 = vmul.f32 %v4740_v56, %v4184_v34  ;;  %v6742_v1 = vld [vmem:[#allocation100_spill] sm:$0xff]  ;;  %v6748_v5 = vld [vmem:[#allocation71_spill] sm:$0xff] }
 0x281   : > { %v4858_v55 = vsub.f32 %v1072_v12, %v4706_v54  ;;  %v1164_v27 = vsub.f32 %v1148_v4, %v1162_v58  ;;  %v1152_v2 = vadd.f32 %v1150_v47, %v1136_v9  ;;  %v4862_v62 = vmul.f32 %v4659_v63, %v4196_v40  ;;  %v6744_v58 = vld [vmem:[#allocation107_spill] sm:$0xff]  ;;  %v6745_v12 = vld [vmem:[#allocation56_spill] sm:$0xff]  ;;  %v6746_v9 = vld [vmem:[#allocation29_spill] sm:$0xff] }
 0x282   : > { %v1316_v45 = vsub.f32 %v1300_v31, %v6741_v32  ;;  %v1256_v50 = vsub.f32 %v1240_v51, %v1254_v39  ;;  %v4867_v21 = vmul.f32 %v6742_v1, %v4200_v42  ;;  %v1354_v14 = vmul.f32 %v6743_v18, %v6742_v1 }
 0x283   : > { %6740 = vst [vmem:[#allocation49_spill] sm:$0xff] %v4858_v55  ;;  %1929 = vxpose.xlu1.b32.cont [4/16] %v4858_v55, 128  ;;  %v1180_v47 = vsub.f32 %v1164_v27, %v6744_v58  ;;  %v1168_v4 = vsub.f32 %v1152_v2, %v6745_v12  ;;  %v1362_v31 = vmul.f32 %v4659_v63, %v6746_v9  ;;  %v6751_v2 = vld [vmem:[#allocation84_spill] sm:$0xff]  ;;  %v6752_v55 = vld [vmem:[#allocation81_spill] sm:$0xff] }
 0x284   : > { %v4879_v39 = vadd.f32 %v4684_v52, %v1316_v45  ;;  %v1272_v51 = vsub.f32 %v1256_v50, %v6748_v5  ;;  %v1410_v32 = vmul.f32 %v4740_v56, %v4156_v15  ;;  %v1426_v49 = vmul.f32 %v6739_v43, %v4160_v19  ;;  %v6753_v50 = vld [vmem:[#allocation103_spill] sm:$0xff] }
 0x285   : > { %v1196_v54 = vadd.f32 %v6749_v60, %v1180_v47  ;;  %v1184_v27 = vsub.f32 %v1168_v4, %v6750_v6  ;;  %v1364_v58 = vadd.f32 %v1362_v31, %v1354_v14  ;;  %v1442_v12 = vmul.f32 %v6751_v2, %v4164_v23  ;;  %v6754_v60 = vld [vmem:[#allocation111_spill] sm:$0xff]  ;;  %v6755_v47 = vld [vmem:[#allocation73_spill] sm:$0xff] }
 0x286   : > { %6747 = vst [vmem:[#allocation89_spill] sm:$0xff] %v4879_v39  ;;  %v1288_v61 = vsub.f32 %v1272_v51, %v6752_v55  ;;  %v1458_v52 = vmul.f32 %v4760_v17, %v4168_v24  ;;  %v1490_v45 = vmul.f32 %v6733_v48, %v4176_v28  ;;  %v4897_v5 = vmul.f32 %v6753_v50, %v4180_v30 }
 0x287   : > { %1930 = vxpose.xlu1.b32.cont [5/16] %v4879_v39, 128  ;;  %v1212_v6 = vadd.f32 %v6754_v60, %v1196_v54  ;;  %v1200_v14 = vsub.f32 %v1184_v27, %v1198_v59  ;;  %v1380_v4 = vadd.f32 %v6755_v47, %v1364_v58  ;;  %v4904_v55 = vmul.f32 %v4715_v7, %v4188_v36  ;;  %v6758_v54 = vld [vmem:[#allocation91_spill] sm:$0xff]  ;;  %v6759_v27 = vld [vmem:[#allocation57_spill] sm:$0xff] }
 0x288   : > { %v1304_v31 = vsub.f32 %v1288_v61, %v1302_v16  ;;  %v4908_v51 = vmul.f32 %v4686_v8, %v4192_v38  ;;  %v4912_v44 = vmul.f32 %v6756_v35, %v4200_v42  ;;  %v1356_v10 = vmul.f32 %v6743_v18, %v6753_v50  ;;  %v6760_v60 = vld [vmem:[#allocation63_spill] sm:$0xff] }
 0x289   : > { %v1228_v59 = vadd.f32 %v6758_v54, %v1212_v6  ;;  %v1216_v58 = vadd.f32 %v6759_v27, %v1200_v14  ;;  %v1396_v47 = vsub.f32 %v1380_v4, %v6760_v60  ;;  %v1366_v61 = vmul.f32 %v4686_v8, %v6746_v9  ;;  %v6761_v27 = vld [vmem:[#allocation110_spill] sm:$0xff] }
 0x28a   : > { %6757 = vst [vmem:[#allocation70_spill] sm:$0xff] %v4912_v44  ;;  %v1320_v16 = vadd.f32 %v4812_v0, %v1304_v31  ;;  %v1398_v25 = vmul.f32 %v4740_v56, %v4152_v13  ;;  %v1430_v22 = vmul.f32 %v6756_v35, %v4160_v19  ;;  %v1446_v29 = vmul.f32 %v4760_v17, %v4164_v23 }
 0x28b   : > { %v1244_v41 = vadd.f32 %v1242_v20, %v1228_v59  ;;  %v1232_v6 = vsub.f32 %v1216_v58, %v1230_v3  ;;  %v1412_v54 = vsub.f32 %v1396_v47, %v1410_v32  ;;  %v1368_v14 = vadd.f32 %v1366_v61, %v1356_v10  ;;  %v6764_v20 = vld [vmem:[#allocation93_spill] sm:$0xff] }
 0x28c   : > { %v4929_v4 = vsub.f32 %v1320_v16, %v6761_v27  ;;  %v1462_v60 = vmul.f32 %v6751_v2, %v4168_v24  ;;  %v4935_v0 = vmul.f32 %v6733_v48, %v4172_v26  ;;  %v4939_v31 = vmul.f32 %v6742_v1, %v4180_v30  ;;  %v6765_v10 = vld [vmem:[#allocation85_spill] sm:$0xff] }
 0x28d   : > { %v1260_v44 = vsub.f32 %v1244_v41, %v6763_v57  ;;  %v1248_v3 = vadd.f32 %v6764_v20, %v1232_v6  ;;  %v1428_v32 = vsub.f32 %v1412_v54, %v1426_v49  ;;  %v1384_v59 = vadd.f32 %v6765_v10, %v1368_v14  ;;  %v6768_v57 = vld [vmem:[#allocation61_spill] sm:$0xff] }
 0x28e   : > { %6762 = vst [vmem:[#allocation90_spill] sm:$0xff] %v4929_v4  ;;  %1931 = vxpose.xlu1.b32.cont [6/16] %v4929_v4, 128  ;;  %v4949_v47 = vmul.f32 %v4715_v7, %v4184_v34  ;;  %v4953_v61 = vmul.f32 %v4659_v63, %v4192_v38  ;;  %v4957_v41 = vmul.f32 %v6739_v43, %v4200_v42 }
 0x28f   : > { %v1276_v49 = vadd.f32 %v6768_v57, %v1260_v44  ;;  %v1264_v16 = vadd.f32 %v1262_v53, %v1248_v3  ;;  %v1444_v6 = vadd.f32 %v1442_v12, %v1428_v32  ;;  %v1400_v54 = vadd.f32 %v1398_v25, %v1384_v59  ;;  %v6769_v53 = vld [vmem:[#allocation67_spill] sm:$0xff]  ;;  %v6770_v57 = vld [vmem:[#allocation82_spill] sm:$0xff] }
 0x290   : > { %6766 = vst [vmem:[#allocation106_spill] sm:$0xff] %v4953_v61  ;;  %6767 = vst [vmem:[#allocation105_spill] sm:$0xff] %v4957_v41  ;;  %v1358_v14 = vmul.f32 %v6743_v18, %v6733_v48  ;;  %v1370_v27 = vmul.f32 %v4715_v7, %v6746_v9  ;;  %v1386_v20 = vmul.f32 %v4740_v56, %v4148_v11  ;;  %v6771_v41 = vld [vmem:[#allocation62_spill] sm:$0xff] }
 0x291   : > { %v1434_v10 = vmul.f32 %v4760_v17, %v4160_v19  ;;  %v1292_v58 = vadd.f32 %v4827_v46, %v1276_v49  ;;  %v1280_v39 = vsub.f32 %v1264_v16, %v4855_v37  ;;  %v1460_v44 = vadd.f32 %v1458_v52, %v1444_v6  ;;  %v6772_v46 = vld [vmem:[#allocation65_spill] sm:$0xff]  ;;  %v6773_v6 = vld [vmem:[#allocation46_spill] sm:$0xff] }
 0x292   : > { %v1416_v12 = vsub.f32 %v1400_v54, %v6769_v53  ;;  %v1372_v25 = vadd.f32 %v1370_v27, %v1358_v14  ;;  %v1450_v3 = vmul.f32 %v6756_v35, %v4164_v23  ;;  %v1466_v32 = vmul.f32 %v6739_v43, %v4168_v24  ;;  %v6775_v27 = vld [vmem:[#allocation72_spill] sm:$0xff] }
 0x293   : > { %v1482_v59 = vmul.f32 %v6753_v50, %v4172_v26  ;;  %v1308_v4 = vsub.f32 %v1292_v58, %v6770_v57  ;;  %v1296_v61 = vadd.f32 %v6771_v41, %v1280_v39  ;;  %v1476_v49 = vadd.f32 %v6772_v46, %v1460_v44  ;;  %v6778_v57 = vld [vmem:[#allocation55_spill] sm:$0xff] }
 0x294   : > { %v1432_v37 = vsub.f32 %v1416_v12, %v1430_v22  ;;  %v1388_v52 = vsub.f32 %v1372_v25, %v1386_v20  ;;  %v4982_v16 = vmul.f32 %v6742_v1, %v4176_v28  ;;  %v4986_v54 = vmul.f32 %v6773_v6, %v4180_v30  ;;  %v6776_v22 = vld [vmem:[#allocation86_spill] sm:$0xff]  ;;  %v6777_v12 = vld [vmem:[#allocation48_spill] sm:$0xff] }
 0x295   : > { %v4990_v14 = vmul.f32 %v4686_v8, %v4184_v34  ;;  %v1324_v58 = vsub.f32 %v1308_v4, %v4833_v33  ;;  %v1312_v39 = vadd.f32 %v6775_v27, %v1296_v61  ;;  %v1492_v41 = vadd.f32 %v1490_v45, %v1476_v49  ;;  %v6781_v61 = vld [vmem:[#allocation87_spill] sm:$0xff] }
 0x296   : > { %v1448_v44 = vsub.f32 %v1432_v37, %v1446_v29  ;;  %v1404_v20 = vadd.f32 %v6776_v22, %v1388_v52  ;;  %v4997_v53 = vmul.f32 %v4659_v63, %v4188_v36  ;;  %v5001_v25 = vmul.f32 %v6777_v12, %v4192_v38 }
 0x297   : > { %6774 = vst [vmem:[#allocation53_spill] sm:$0xff] %v4990_v14  ;;  %v5005_v46 = vmul.f32 %v6778_v57, %v4196_v40  ;;  %v6779_v14 = vld [vmem:[#allocation108_spill] sm:$0xff]  ;;  %v1328_v45 = vadd.f32 %v4862_v62, %v1312_v39  ;;  %v1508_v29 = vsub.f32 %v1492_v41, %v4897_v5  ;;  %v5015_v37 = vmul.f32 %v6751_v2, %v4200_v42  ;;  %v6783_v62 = vld [vmem:[#allocation66_spill] sm:$0xff] }
 0x298   : > { %v5008_v33 = vadd.f32 %v6779_v14, %v1324_v58  ;;  %v1464_v4 = vadd.f32 %v1462_v60, %v1448_v44  ;;  %v1420_v49 = vsub.f32 %v1404_v20, %v6781_v61  ;;  %v1360_v52 = vmul.f32 %v6743_v18, %v4659_v63 }
 0x299   : > { %v1374_v27 = vmul.f32 %v6742_v1, %v6746_v9  ;;  %v5023_v14 = vsub.f32 %v1328_v45, %v4867_v21  ;;  %v1524_v5 = vadd.f32 %v6783_v62, %v1508_v29  ;;  %v1390_v58 = vmul.f32 %v6739_v43, %v4148_v11  ;;  %v6784_v45 = vld [vmem:[#allocation75_spill] sm:$0xff] }
 0x29a   : > { %6780 = vst [vmem:[#allocation112_spill] sm:$0xff] %v5008_v33  ;;  %1932 = vxpose.xlu1.b32.cont [7/16] %v5008_v33, 128  ;;  %v1480_v60 = vsub.f32 %v1464_v4, %v4935_v0  ;;  %v1436_v39 = vadd.f32 %v1434_v10, %v1420_v49  ;;  %v1406_v44 = vmul.f32 %v6751_v2, %v4152_v13  ;;  %v6785_v0 = vld [vmem:[#allocation64_spill] sm:$0xff] }
 0x29b   : > { %6782 = vst [vmem:[#allocation95_spill] sm:$0xff] %v5023_v14  ;;  %v1376_v41 = vadd.f32 %v1374_v27, %v1360_v52  ;;  %v1422_v22 = vmul.f32 %v4760_v17, %v4156_v15  ;;  %v1540_v21 = vadd.f32 %v4904_v55, %v1524_v5  ;;  %v1438_v4 = vmul.f32 %v6785_v0, %v4160_v19 }
 0x29c   : > { %v1496_v29 = vadd.f32 %v6784_v45, %v1480_v60  ;;  %v1452_v61 = vsub.f32 %v1436_v39, %v1450_v3  ;;  %v1454_v10 = vmul.f32 %v6778_v57, %v4164_v23  ;;  %v1470_v49 = vmul.f32 %v4740_v56, %v4168_v24 }
 0x29d   : > { %v1392_v62 = vsub.f32 %v1376_v41, %v1390_v58  ;;  %v1556_v52 = vsub.f32 %v1540_v21, %v4908_v51  ;;  %v1486_v55 = vmul.f32 %v6777_v12, %v4172_v26  ;;  %v1502_v5 = vmul.f32 %v4715_v7, %v4176_v28  ;;  %v6786_v41 = vld [vmem:[#allocation83_spill] sm:$0xff] }
 0x29e   : > { %1933 = vxpose.xlu1.b32.cont [8/16] %v5023_v14, 128  ;;  %v1512_v27 = vadd.f32 %v4939_v31, %v1496_v29  ;;  %v1468_v3 = vadd.f32 %v1466_v32, %v1452_v61  ;;  %v5052_v58 = vmul.f32 %v4686_v8, %v4180_v30  ;;  %v5056_v39 = vmul.f32 %v6773_v6, %v4184_v34  ;;  %v6789_v61 = vld [vmem:[#allocation74_spill] sm:$0xff] }
 0x29f   : > { %v1408_v60 = vadd.f32 %v1406_v44, %v1392_v62  ;;  %v1572_v51 = vsub.f32 %v1556_v52, %v6786_v41  ;;  %v5062_v21 = vmul.f32 %v6733_v48, %v4188_v36  ;;  %v5066_v32 = vmul.f32 %v6753_v50, %v4192_v38  ;;  %v6791_v52 = vld [vmem:[#allocation70_spill] sm:$0xff] }
 0x2a0   : > { %v1528_v31 = vsub.f32 %v1512_v27, %v4949_v47  ;;  %v1484_v44 = vadd.f32 %v1482_v59, %v1468_v3  ;;  %v5070_v29 = vmul.f32 %v6756_v35, %v4196_v40  ;;  %v5074_v62 = vmul.f32 %v6789_v61, %v4200_v42  ;;  %v6793_v27 = vld [vmem:[#allocation76_spill] sm:$0xff] }
 0x2a1   : > { %6787 = vst [vmem:[#allocation98_spill] sm:$0xff] %v5066_v32  ;;  %v1424_v45 = vadd.f32 %v1422_v22, %v1408_v60  ;;  %v5077_v47 = vadd.f32 %v6791_v52, %v1572_v51  ;;  %v1610_v20 = vmul.f32 %v6743_v18, %v4686_v8  ;;  %v1618_v59 = vmul.f32 %v6753_v50, %v6746_v9  ;;  %v6794_v51 = vld [vmem:[#allocation106_spill] sm:$0xff] }
 0x2a2   : > { %6788 = vst [vmem:[#allocation92_spill] sm:$0xff] %v5070_v29  ;;  %6790 = vst [vmem:[#allocation102_spill] sm:$0xff] %v5074_v62  ;;  %v1544_v41 = vadd.f32 %v6793_v27, %v1528_v31  ;;  %v1500_v22 = vsub.f32 %v1484_v44, %v4982_v16  ;;  %v1634_v60 = vmul.f32 %v6756_v35, %v4148_v11  ;;  %v6795_v62 = vld [vmem:[#allocation77_spill] sm:$0xff] }
 0x2a3   : > { %6792 = vst [vmem:[#allocation100_spill] sm:$0xff] %v5077_v47  ;;  %v1440_v3 = vadd.f32 %v1438_v4, %v1424_v45  ;;  %v1650_v33 = vmul.f32 %v4760_v17, %v4152_v13  ;;  %1934 = vxpose.xlu1.b32.cont [9/16] %v5077_v47, 128  ;;  %v1620_v31 = vadd.f32 %v1618_v59, %v1610_v20  ;;  %v6796_v59 = vld [vmem:[#allocation53_spill] sm:$0xff] }
 0x2a4   : > { %v1560_v52 = vadd.f32 %v6794_v51, %v1544_v41  ;;  %v1666_v27 = vmul.f32 %v6751_v2, %v4156_v15  ;;  %v1682_v14 = vmul.f32 %v6789_v61, %v4160_v19  ;;  %v1516_v16 = vadd.f32 %v4986_v54, %v1500_v22  ;;  %v6797_v22 = vld [vmem:[#allocation105_spill] sm:$0xff] }
 0x2a5   : > { %v1456_v4 = vsub.f32 %v1440_v3, %v1454_v10  ;;  %v1698_v44 = vmul.f32 %v4740_v56, %v4164_v23  ;;  %v1714_v45 = vmul.f32 %v6778_v57, %v4168_v24  ;;  %v1636_v32 = vsub.f32 %v1620_v31, %v1634_v60 }
 0x2a6   : > { %v1576_v29 = vadd.f32 %v6795_v62, %v1560_v52  ;;  %v1730_v20 = vmul.f32 %v4715_v7, %v4172_v26  ;;  %v1746_v41 = vmul.f32 %v6777_v12, %v4176_v28  ;;  %v1532_v51 = vadd.f32 %v6796_v59, %v1516_v16 }
 0x2a7   : > { %v1472_v2 = vsub.f32 %v1456_v4, %v1470_v49  ;;  %v1762_v54 = vmul.f32 %v4659_v63, %v4180_v30  ;;  %v5110_v10 = vmul.f32 %v6733_v48, %v4184_v34  ;;  %v1652_v62 = vsub.f32 %v1636_v32, %v1650_v33 }
 0x2a8   : > { %v5113_v3 = vsub.f32 %v1576_v29, %v6797_v22  ;;  %v5117_v60 = vmul.f32 %v6773_v6, %v4188_v36  ;;  %v5121_v52 = vmul.f32 %v6742_v1, %v4192_v38  ;;  %v1548_v49 = vsub.f32 %v1532_v51, %v4997_v53 }
 0x2a9   : > { %v1488_v31 = vadd.f32 %v1486_v55, %v1472_v2  ;;  %v5126_v16 = vmul.f32 %v6739_v43, %v4196_v40  ;;  %v5130_v29 = vmul.f32 %v6785_v0, %v4200_v42  ;;  %v1668_v32 = vadd.f32 %v1666_v27, %v1652_v62 }
 0x2aa   : > { %6798 = vst [vmem:[#allocation27_spill] sm:$0xff] %v5113_v3  ;;  %1935 = vxpose.xlu1.b32.cont [10/16] %v5113_v3, 128  ;;  %v1612_v4 = vmul.f32 %v6743_v18, %v4715_v7  ;;  %v1622_v2 = vmul.f32 %v6733_v48, %v6746_v9  ;;  %v1564_v53 = vadd.f32 %v5001_v25, %v1548_v49 }
 0x2ab   : > { %6799 = vst [vmem:[#allocation107_spill] sm:$0xff] %v5126_v16  ;;  %6800 = vst [vmem:[#allocation56_spill] sm:$0xff] %v5130_v29  ;;  %v1504_v55 = vadd.f32 %v1502_v5, %v1488_v31  ;;  %v1638_v59 = vmul.f32 %v4760_v17, %v4148_v11  ;;  %v1654_v51 = vmul.f32 %v6756_v35, %v4152_v13 }
 0x2ac   : > { %v1684_v22 = vadd.f32 %v1682_v14, %v1668_v32  ;;  %v1624_v33 = vadd.f32 %v1622_v2, %v1612_v4  ;;  %v1670_v27 = vmul.f32 %v6739_v43, %v4156_v15  ;;  %v1686_v62 = vmul.f32 %v4740_v56, %v4160_v19 }
 0x2ad   : > { %v1580_v47 = vsub.f32 %v1564_v53, %v5005_v46  ;;  %v1520_v3 = vsub.f32 %v1504_v55, %v5052_v58  ;;  %v1702_v25 = vmul.f32 %v6789_v61, %v4164_v23  ;;  %v1718_v5 = vmul.f32 %v6785_v0, %v4168_v24 }
 0x2ae   : > { %v1700_v49 = vadd.f32 %v1698_v44, %v1684_v22  ;;  %v1640_v31 = vadd.f32 %v1638_v59, %v1624_v33  ;;  %v1734_v14 = vmul.f32 %v4686_v8, %v4172_v26  ;;  %v5158_v32 = vmul.f32 %v4659_v63, %v4176_v28 }
 0x2af   : > { %v5161_v4 = vadd.f32 %v5015_v37, %v1580_v47  ;;  %v1536_v46 = vadd.f32 %v5056_v39, %v1520_v3  ;;  %v1766_v58 = vmul.f32 %v6777_v12, %v4180_v30  ;;  %v5168_v2 = vmul.f32 %v6753_v50, %v4184_v34  ;;  %v6805_v39 = vld [vmem:[#allocation84_spill] sm:$0xff] }
 0x2b0   : > { %v1716_v44 = vsub.f32 %v1700_v49, %v1714_v45  ;;  %v1656_v33 = vsub.f32 %v1640_v31, %v1654_v51  ;;  %v5172_v53 = vmul.f32 %v6742_v1, %v4188_v36  ;;  %v5176_v55 = vmul.f32 %v6773_v6, %v4192_v38 }
 0x2b1   : > { %6801 = vst [vmem:[#allocation29_spill] sm:$0xff] %v5161_v4  ;;  %6802 = vst [vmem:[#allocation71_spill] sm:$0xff] %v5168_v2  ;;  %1936 = vxpose.xlu1.b32.cont [11/16] %v5161_v4, 128  ;;  %v1552_v37 = vadd.f32 %v5062_v21, %v1536_v46  ;;  %v5182_v47 = vmul.f32 %v6805_v39, %v4196_v40  ;;  %v5186_v45 = vmul.f32 %v6778_v57, %v4200_v42  ;;  %v6808_v21 = vld [vmem:[#allocation98_spill] sm:$0xff]  ;;  %v6850_v4 = vld [vmem:[#allocation79_spill] sm:$0xff] }
 0x2b2   : > { %6803 = vst [vmem:[#allocation54_spill] sm:$0xff] %v5172_v53  ;;  %6804 = vst [vmem:[#allocation113_spill] sm:$0xff] %v5176_v55  ;;  %v1614_v3 = vmul.f32 %v6743_v18, %v4740_v56  ;;  %v1732_v59 = vsub.f32 %v1716_v44, %v1730_v20  ;;  %v1672_v51 = vadd.f32 %v1670_v27, %v1656_v33  ;;  %v6809_v33 = vld [vmem:[#allocation92_spill] sm:$0xff] }
 0x2b3   : > { %6806 = vst [vmem:[#allocation81_spill] sm:$0xff] %v5182_v47  ;;  %6807 = vst [vmem:[#allocation103_spill] sm:$0xff] %v5186_v45  ;;  %v1626_v22 = vmul.f32 %v4760_v17, %v6746_v9  ;;  %v1642_v49 = vmul.f32 %v6733_v48, %v4148_v11  ;;  %v1568_v31 = vsub.f32 %v1552_v37, %v6808_v21 }
 0x2b4   : > { %v1658_v46 = vmul.f32 %v6753_v50, %v4152_v13  ;;  %v1674_v47 = vmul.f32 %v6742_v1, %v4156_v15  ;;  %v1690_v45 = vmul.f32 %v4715_v7, %v4160_v19  ;;  %v1748_v55 = vadd.f32 %v1746_v41, %v1732_v59 }
 0x2b5   : > { %v1688_v20 = vsub.f32 %v1672_v51, %v1686_v62  ;;  %v1628_v27 = vadd.f32 %v1626_v22, %v1614_v3  ;;  %v1706_v44 = vmul.f32 %v4686_v8, %v4164_v23  ;;  %v1584_v53 = vadd.f32 %v6809_v33, %v1568_v31  ;;  %v6810_v3 = vld [vmem:[#allocation102_spill] sm:$0xff]  ;;  %v6849_v31 = vld [vmem:[#allocation43_spill] sm:$0xff] }
 0x2b6   : > { %v1722_v37 = vmul.f32 %v4659_v63, %v4168_v24  ;;  %v1738_v21 = vmul.f32 %v6789_v61, %v4172_v26  ;;  %v5210_v2 = vmul.f32 %v6785_v0, %v4176_v28  ;;  %v1764_v29 = vadd.f32 %v1762_v54, %v1748_v55 }
 0x2b7   : > { %v1704_v16 = vadd.f32 %v1702_v25, %v1688_v20  ;;  %v1644_v41 = vadd.f32 %v1642_v49, %v1628_v27  ;;  %v5214_v62 = vmul.f32 %v6778_v57, %v4180_v30  ;;  %v5217_v59 = vsub.f32 %v1584_v53, %v6810_v3 }
 0x2b8   : > { %v5221_v51 = vmul.f32 %v6756_v35, %v4184_v34  ;;  %v5225_v22 = vmul.f32 %v6739_v43, %v4188_v36  ;;  %v5229_v54 = vmul.f32 %v6805_v39, %v4192_v38  ;;  %v1780_v25 = vsub.f32 %v1764_v29, %v5110_v10 }
 0x2b9   : > { %6811 = vst [vmem:[#allocation111_spill] sm:$0xff] %v5217_v59  ;;  %v1720_v55 = vsub.f32 %v1704_v16, %v1718_v5  ;;  %v1660_v49 = vsub.f32 %v1644_v41, %v1658_v46  ;;  %v5234_v53 = vmul.f32 %v6773_v6, %v4196_v40  ;;  %1937 = vxpose.xlu1.b32.cont [12/16] %v5217_v59, 128 }
 0x2ba   : > { %v5241_v20 = vmul.f32 %v6777_v12, %v4200_v42  ;;  %v1616_v27 = vmul.f32 %v6743_v18, %v4760_v17  ;;  %v1630_v10 = vmul.f32 %v4740_v56, %v6746_v9  ;;  %v1796_v16 = vadd.f32 %v5117_v60, %v1780_v25  ;;  %v6826_v25 = vld [vmem:[#allocation101_spill] sm:$0xff] }
 0x2bb   : > { %v1736_v29 = vadd.f32 %v1734_v14, %v1720_v55  ;;  %v1676_v5 = vadd.f32 %v1674_v47, %v1660_v49  ;;  %v1646_v46 = vmul.f32 %v4715_v7, %v4148_v11  ;;  %v1662_v41 = vmul.f32 %v4686_v8, %v4152_v13 }
 0x2bc   : > { %v1632_v33 = vadd.f32 %v1630_v10, %v1616_v27  ;;  %v1678_v3 = vmul.f32 %v4659_v63, %v4156_v15  ;;  %v1694_v17 = vmul.f32 %v6733_v48, %v4160_v19  ;;  %v1812_v18 = vadd.f32 %v5121_v52, %v1796_v16  ;;  %v6812_v15 = vld [vmem:[#allocation107_spill] sm:$0xff]  ;;  %v6828_v27 = vld [vmem:[#allocation104_spill] sm:$0xff] }
 0x2bd   : > { %v1752_v56 = vsub.f32 %v1736_v29, %v5158_v32  ;;  %v1692_v9 = vsub.f32 %v1676_v5, %v1690_v45  ;;  %v1710_v60 = vmul.f32 %v6753_v50, %v4164_v23  ;;  %v1726_v11 = vmul.f32 %v6742_v1, %v4168_v24  ;;  %v6829_v16 = vld [vmem:[#allocation35_spill] sm:$0xff]  ;;  %v6830_v29 = vld [vmem:[#allocation50_spill] sm:$0xff] }
 0x2be   : > { %v1648_v14 = vsub.f32 %v1632_v33, %v1646_v46  ;;  %v1742_v13 = vmul.f32 %v6756_v35, %v4172_v26  ;;  %v5266_v63 = vmul.f32 %v6739_v43, %v4176_v28  ;;  %v1828_v19 = vsub.f32 %v1812_v18, %v6812_v15  ;;  %v6813_v28 = vld [vmem:[#allocation56_spill] sm:$0xff]  ;;  %v6815_v43 = vld [vmem:[#allocation71_spill] sm:$0xff]  ;;  %v6831_v46 = vld [vmem:[#allocation113_spill] sm:$0xff] }
 0x2bf   : > { %v1768_v8 = vadd.f32 %v1766_v58, %v1752_v56  ;;  %v1708_v7 = vadd.f32 %v1706_v44, %v1692_v9  ;;  %v1774_v48 = vmul.f32 %v6805_v39, %v4180_v30  ;;  %v5273_v23 = vmul.f32 %v6789_v61, %v4184_v34  ;;  %v6822_v39 = vld [vmem:[#allocation54_spill] sm:$0xff]  ;;  %v6823_v44 = vld [vmem:[#allocation32_spill] sm:$0xff]  ;;  %v6834_v56 = vld [vmem:[#allocation37_spill] sm:$0xff] }
 0x2c0   : > { %v1664_v52 = vadd.f32 %v1662_v41, %v1648_v14  ;;  %v5277_v24 = vmul.f32 %v6785_v0, %v4188_v36  ;;  %v5281_v26 = vmul.f32 %v6778_v57, %v4192_v38  ;;  %v5284_v35 = vadd.f32 %v6813_v28, %v1828_v19  ;;  %v6818_v36 = vld [vmem:[#allocation58_spill] sm:$0xff]  ;;  %v6819_v0 = vld [vmem:[#allocation28_spill] sm:$0xff]  ;;  %v6820_v38 = vld [vmem:[#allocation31_spill] sm:$0xff] }
 0x2c1   : > { %v1784_v1 = vadd.f32 %v6815_v43, %v1768_v8  ;;  %v1724_v50 = vsub.f32 %v1708_v7, %v1722_v37  ;;  %v5289_v30 = vmul.f32 %v6777_v12, %v4196_v40  ;;  %v5293_v61 = vmul.f32 %v6773_v6, %v4200_v42  ;;  %v6821_v57 = vld [vmem:[#allocation88_spill] sm:$0xff]  ;;  %v6824_v37 = vld [vmem:[#allocation47_spill] sm:$0xff]  ;;  %v6825_v12 = vld [vmem:[#allocation33_spill] sm:$0xff] }
 0x2c2   : > { %6814 = vst [vmem:[#allocation73_spill] sm:$0xff] %v5284_v35  ;;  %v1680_v34 = vsub.f32 %v1664_v52, %v1678_v3  ;;  %v847_v32 = vmul.f32 %v6819_v0, %v6818_v36  ;;  %v859_v58 = vmul.f32 %v6821_v57, %v6820_v38  ;;  %1938 = vxpose.xlu1.b32.cont [13/16] %v5284_v35, 128  ;;  %v6827_v6 = vld [vmem:[#allocation34_spill] sm:$0xff]  ;;  %v6832_v3 = vld [vmem:[#allocation36_spill] sm:$0xff]  ;;  %v6835_v9 = vld [vmem:[#allocation115_spill] sm:$0xff] }
 0x2c3   : > { %6816 = vst [vmem:[#allocation96_spill] sm:$0xff] %v5289_v30  ;;  %6817 = vst [vmem:[#allocation91_spill] sm:$0xff] %v5293_v61  ;;  %v1800_v47 = vsub.f32 %v1784_v1, %v6822_v39  ;;  %v1740_v45 = vadd.f32 %v1738_v21, %v1724_v50  ;;  %v875_v40 = vmul.f32 %v6824_v37, %v6823_v44  ;;  %v6833_v21 = vld [vmem:[#allocation114_spill] sm:$0xff]  ;;  %v6837_v8 = vld [vmem:[#allocation68_spill] sm:$0xff] }
 0x2c4   : > { %v891_v55 = vmul.f32 %v6826_v25, %v6825_v12  ;;  %v1696_v49 = vadd.f32 %v1694_v17, %v1680_v34  ;;  %v861_v42 = vadd.f32 %v859_v58, %v847_v32  ;;  %v907_v10 = vmul.f32 %v6828_v27, %v6827_v6  ;;  %v6836_v17 = vld [vmem:[#allocation38_spill] sm:$0xff]  ;;  %v6838_v52 = vld [vmem:[#allocation39_spill] sm:$0xff]  ;;  %v6840_v1 = vld [vmem:[#allocation81_spill] sm:$0xff] }
 0x2c5   : > { %v923_v5 = vmul.f32 %v6830_v29, %v6829_v16  ;;  %v1816_v33 = vadd.f32 %v6831_v46, %v1800_v47  ;;  %v1756_v41 = vsub.f32 %v1740_v45, %v5210_v2  ;;  %v939_v18 = vmul.f32 %v6833_v21, %v6832_v3  ;;  %v6839_v28 = vld [vmem:[#allocation78_spill] sm:$0xff]  ;;  %v6841_v2 = vld [vmem:[#allocation40_spill] sm:$0xff]  ;;  %v6842_v32 = vld [vmem:[#allocation69_spill] sm:$0xff] }
 0x2c6   : > { %v955_v14 = vmul.f32 %v6835_v9, %v6834_v56  ;;  %v1712_v15 = vsub.f32 %v1696_v49, %v1710_v60  ;;  %v877_v19 = vadd.f32 %v875_v40, %v861_v42  ;;  %v971_v7 = vmul.f32 %v6837_v8, %v6836_v17  ;;  %v6843_v39 = vld [vmem:[#allocation41_spill] sm:$0xff]  ;;  %v6844_v47 = vld [vmem:[#allocation94_spill] sm:$0xff] }
 0x2c7   : > { %v5319_v43 = vmul.f32 %v6839_v28, %v6838_v52  ;;  %v1832_v50 = vadd.f32 %v6840_v1, %v1816_v33  ;;  %v1772_v34 = vadd.f32 %v5214_v62, %v1756_v41  ;;  %v1003_v58 = vmul.f32 %v6842_v32, %v6841_v2  ;;  %v6846_v49 = vld [vmem:[#allocation42_spill] sm:$0xff]  ;;  %v6847_v42 = vld [vmem:[#allocation97_spill] sm:$0xff]  ;;  %v6852_v33 = vld [vmem:[#allocation103_spill] sm:$0xff] }
 0x2c8   : > { %v5327_v45 = vmul.f32 %v6844_v47, %v6843_v39  ;;  %v1728_v60 = vadd.f32 %v1726_v11, %v1712_v15  ;;  %v893_v40 = vadd.f32 %v891_v55, %v877_v19  ;;  %v5331_v46 = vmul.f32 %v6847_v42, %v6846_v49  ;;  %v6854_v41 = vld [vmem:[#allocation44_spill] sm:$0xff]  ;;  %v6855_v61 = vld [vmem:[#allocation109_spill] sm:$0xff]  ;;  %v6858_v11 = vld [vmem:[#allocation51_spill] sm:$0xff] }
 0x2c9   : > { %v5335_v59 = vmul.f32 %v6850_v4, %v6849_v31  ;;  %v5338_v1 = vsub.f32 %v1832_v50, %v6852_v33  ;;  %v1788_v62 = vadd.f32 %v5221_v51, %v1772_v34  ;;  %v5343_v30 = vmul.f32 %v6855_v61, %v6854_v41 }
 0x2ca   : > { %6845 = vst [vmem:[#allocation57_spill] sm:$0xff] %v5327_v45  ;;  %6848 = vst [vmem:[#allocation63_spill] sm:$0xff] %v5331_v46  ;;  %v6857_v45 = vld [vmem:[#allocation45_spill] sm:$0xff]  ;;  %v1744_v15 = vadd.f32 %v1742_v13, %v1728_v60  ;;  %v909_v19 = vadd.f32 %v907_v10, %v893_v40  ;;  %v849_v46 = vmul.f32 %v6819_v0, %v6837_v8 }
 0x2cb   : > { %6851 = vst [vmem:[#allocation110_spill] sm:$0xff] %v5335_v59  ;;  %6853 = vst [vmem:[#allocation99_spill] sm:$0xff] %v5338_v1  ;;  %v5347_v55 = vmul.f32 %v6858_v11, %v6857_v45  ;;  %v863_v59 = vmul.f32 %v6844_v47, %v6820_v38  ;;  %1939 = vxpose.xlu1.b32.cont [14/16] %v5338_v1, 128  ;;  %v1804_v51 = vsub.f32 %v1788_v62, %v5225_v22 }
 0x2cc   : > { %6856 = vst [vmem:[#allocation93_spill] sm:$0xff] %v5343_v30  ;;  %v879_v34 = vmul.f32 %v6826_v25, %v6823_v44  ;;  %v895_v13 = vmul.f32 %v6824_v37, %v6825_v12  ;;  %v1760_v10 = vsub.f32 %v1744_v15, %v5266_v63  ;;  %v925_v60 = vsub.f32 %v909_v19, %v923_v5 }
 0x2cd   : > { %6859 = vst [vmem:[#allocation85_spill] sm:$0xff] %v5347_v55  ;;  %v865_v40 = vadd.f32 %v863_v59, %v849_v46  ;;  %v911_v33 = vmul.f32 %v6855_v61, %v6827_v6  ;;  %v1820_v55 = vadd.f32 %v5229_v54, %v1804_v51  ;;  %v927_v50 = vmul.f32 %v6833_v21, %v6829_v16 }
 0x2ce   : > { %v943_v22 = vmul.f32 %v6830_v29, %v6832_v3  ;;  %v959_v62 = vmul.f32 %v6858_v11, %v6834_v56  ;;  %v1776_v35 = vadd.f32 %v1774_v48, %v1760_v10  ;;  %v941_v1 = vsub.f32 %v925_v60, %v939_v18 }
 0x2cf   : > { %v881_v30 = vsub.f32 %v865_v40, %v879_v34  ;;  %v975_v59 = vmul.f32 %v6818_v36, %v6836_v17  ;;  %v1836_v63 = vadd.f32 %v5234_v53, %v1820_v55  ;;  %v991_v54 = vmul.f32 %v6842_v32, %v6838_v52 }
 0x2d0   : > { %v5378_v5 = vmul.f32 %v6839_v28, %v6841_v2  ;;  %v5382_v46 = vmul.f32 %v6821_v57, %v6843_v39  ;;  %v1792_v48 = vadd.f32 %v5273_v23, %v1776_v35  ;;  %v957_v18 = vsub.f32 %v941_v1, %v955_v14 }
 0x2d1   : > { %v897_v15 = vadd.f32 %v895_v13, %v881_v30  ;;  %v5387_v19 = vmul.f32 %v6850_v4, %v6846_v49  ;;  %v5390_v53 = vsub.f32 %v1836_v63, %v5241_v20  ;;  %v5394_v55 = vmul.f32 %v6847_v42, %v6849_v31 }
 0x2d2   : > { %v5398_v51 = vmul.f32 %v6828_v27, %v6854_v41  ;;  %v5402_v23 = vmul.f32 %v6835_v9, %v6857_v45  ;;  %v1808_v35 = vsub.f32 %v1792_v48, %v5277_v24  ;;  %v973_v30 = vsub.f32 %v957_v18, %v971_v7 }
 0x2d3   : > { %6860 = vst [vmem:[#allocation61_spill] sm:$0xff] %v5390_v53  ;;  %v913_v14 = vadd.f32 %v911_v33, %v897_v15  ;;  %v1099_v20 = vmul.f32 %v6819_v0, %v6839_v28  ;;  %1940 = vxpose.xlu1.b32.cont [15/16] %v5390_v53, 128  ;;  %v1107_v1 = vmul.f32 %v6847_v42, %v6820_v38  ;;  %v6863_v15 = vld [vmem:[#allocation96_spill] sm:$0xff] }
 0x2d4   : > { %6861 = vst [vmem:[#allocation67_spill] sm:$0xff] %v5398_v51  ;;  %6862 = vst [vmem:[#allocation82_spill] sm:$0xff] %v5402_v23  ;;  %v1123_v34 = vmul.f32 %v6828_v27, %v6823_v44  ;;  %v1139_v13 = vmul.f32 %v6855_v61, %v6825_v12  ;;  %v1155_v10 = vmul.f32 %v6824_v37, %v6827_v6 }
 0x2d5   : > { %v1824_v24 = vadd.f32 %v5281_v26, %v1808_v35  ;;  %v989_v7 = vsub.f32 %v973_v30, %v5319_v43  ;;  %v929_v60 = vadd.f32 %v927_v50, %v913_v14  ;;  %v1171_v40 = vmul.f32 %v6835_v9, %v6829_v16 }
 0x2d6   : > { %v1109_v33 = vadd.f32 %v1107_v1, %v1099_v20  ;;  %v1187_v63 = vmul.f32 %v6858_v11, %v6832_v3  ;;  %v1203_v48 = vmul.f32 %v6830_v29, %v6834_v56  ;;  %v1219_v18 = vmul.f32 %v6842_v32, %v6836_v17  ;;  %v6865_v20 = vld [vmem:[#allocation91_spill] sm:$0xff] }
 0x2d7   : > { %v1840_v23 = vsub.f32 %v1824_v24, %v6863_v15  ;;  %v1005_v51 = vsub.f32 %v989_v7, %v1003_v58  ;;  %v945_v26 = vsub.f32 %v929_v60, %v943_v22  ;;  %v1235_v43 = vmul.f32 %v6818_v36, %v6838_v52  ;;  %v6867_v58 = vld [vmem:[#allocation57_spill] sm:$0xff] }
 0x2d8   : > { %v1125_v50 = vsub.f32 %v1109_v33, %v1123_v34  ;;  %v5431_v35 = vmul.f32 %v6837_v8, %v6841_v2  ;;  %v5435_v30 = vmul.f32 %v6850_v4, %v6843_v39  ;;  %v5439_v14 = vmul.f32 %v6821_v57, %v6846_v49 }
 0x2d9   : > { %v5442_v1 = vadd.f32 %v6865_v20, %v1840_v23  ;;  %v1021_v22 = vsub.f32 %v1005_v51, %v6867_v58  ;;  %v961_v24 = vsub.f32 %v945_v26, %v959_v62  ;;  %v5447_v34 = vmul.f32 %v6844_v47, %v6849_v31  ;;  %v6871_v62 = vld [vmem:[#allocation63_spill] sm:$0xff] }
 0x2da   : > { %6864 = vst [vmem:[#allocation62_spill] sm:$0xff] %v5439_v14  ;;  %v1141_v7 = vsub.f32 %v1125_v50, %v1139_v13  ;;  %v5451_v60 = vmul.f32 %v6826_v25, %v6854_v41  ;;  %v5455_v33 = vmul.f32 %v6833_v21, %v6857_v45  ;;  %v1101_v23 = vmul.f32 %v6819_v0, %v6821_v57 }
 0x2db   : > { %6866 = vst [vmem:[#allocation65_spill] sm:$0xff] %v5442_v1  ;;  %6868 = vst [vmem:[#allocation46_spill] sm:$0xff] %v5447_v34  ;;  %1941 = vxpose.xlu1.b32.end [16/16] %v5442_v1, 128  ;;  %v1037_v15 = vsub.f32 %v1021_v22, %v6871_v62  ;;  %v977_v26 = vadd.f32 %v975_v59, %v961_v24  ;;  %v1111_v13 = vmul.f32 %v6818_v36, %v6820_v38  ;;  %v6873_v62 = vld [vmem:[#allocation52_spill] sm:$0xff]  ;;  %v6874_v34 = vld [vmem:[#allocation93_spill] sm:$0xff] }
 0x2dc   : > { %6869 = vst [vmem:[#allocation72_spill] sm:$0xff] %v5451_v60  ;;  %6870 = vst [vmem:[#allocation86_spill] sm:$0xff] %v5455_v33  ;;  %v1157_v50 = vadd.f32 %v1155_v10, %v1141_v7  ;;  %v1127_v20 = vmul.f32 %v6830_v29, %v6823_v44  ;;  %v1143_v58 = vmul.f32 %v6833_v21, %v6825_v12  ;;  %v6872_v60 = vld [vmem:[#allocation110_spill] sm:$0xff] }
 0x2dd   : > { %v1159_v33 = vmul.f32 %v6835_v9, %v6827_v6  ;;  %v1053_v51 = vsub.f32 %v1037_v15, %v6872_v60  ;;  %v993_v53 = vadd.f32 %v991_v54, %v977_v26  ;;  %v1113_v1 = vadd.f32 %v1111_v13, %v1101_v23 }
 0x2de   : > { %v1175_v59 = vmul.f32 %v6824_v37, %v6829_v16  ;;  %v1173_v22 = vadd.f32 %v1171_v40, %v1157_v50  ;;  %v1191_v10 = vmul.f32 %v6826_v25, %v6832_v3  ;;  %v1207_v24 = vmul.f32 %v6828_v27, %v6834_v56 }
 0x2df   : > { %v1223_v7 = vmul.f32 %v6844_v47, %v6836_v17  ;;  %1958 = vxpose.xlu1.b32.start [1/16] %v6873_v62, 128  ;;  %v1069_v14 = vsub.f32 %v1053_v51, %v6874_v34  ;;  %v1009_v54 = vsub.f32 %v993_v53, %v5378_v5  ;;  %v1129_v60 = vsub.f32 %v1113_v1, %v1127_v20  ;;  %v6876_v34 = vld [vmem:[#allocation85_spill] sm:$0xff] }
 0x2e0   : > { %v1239_v23 = vmul.f32 %v6847_v42, %v6838_v52  ;;  %v1189_v40 = vadd.f32 %v1187_v63, %v1173_v22  ;;  %v5487_v15 = vmul.f32 %v6850_v4, %v6841_v2  ;;  %v5491_v26 = vmul.f32 %v6837_v8, %v6843_v39  ;;  %v6881_v22 = vld [vmem:[#allocation80_spill] sm:$0xff] }
 0x2e1   : > { %v5495_v13 = vmul.f32 %v6839_v28, %v6846_v49  ;;  %v5498_v51 = vadd.f32 %v6876_v34, %v1069_v14  ;;  %v1025_v5 = vadd.f32 %v5382_v46, %v1009_v54  ;;  %v1145_v53 = vsub.f32 %v1129_v60, %v1143_v58 }
 0x2e2   : > { %v5503_v63 = vmul.f32 %v6842_v32, %v6849_v31  ;;  %v1205_v1 = vsub.f32 %v1189_v40, %v1203_v48  ;;  %v5507_v50 = vmul.f32 %v6858_v11, %v6854_v41  ;;  %v5511_v20 = vmul.f32 %v6855_v61, %v6857_v45 }
 0x2e3   : > { %6875 = vst [vmem:[#allocation48_spill] sm:$0xff] %v5495_v13  ;;  %6877 = vst [vmem:[#allocation55_spill] sm:$0xff] %v5498_v51  ;;  %v1103_v14 = vmul.f32 %v6819_v0, %v6844_v47  ;;  %1959 = vxpose.xlu1.b32.cont [2/16] %v6881_v22, 128  ;;  %v1041_v46 = vadd.f32 %v5387_v19, %v1025_v5  ;;  %v1161_v58 = vsub.f32 %v1145_v53, %v1159_v33 }
 0x2e4   : > { %6878 = vst [vmem:[#allocation108_spill] sm:$0xff] %v5503_v63  ;;  %6879 = vst [vmem:[#allocation87_spill] sm:$0xff] %v5507_v50  ;;  %v1115_v62 = vmul.f32 %v6837_v8, %v6820_v38  ;;  %v1131_v48 = vmul.f32 %v6833_v21, %v6823_v44  ;;  %v1221_v54 = vsub.f32 %v1205_v1, %v1219_v18 }
 0x2e5   : > { %6880 = vst [vmem:[#allocation66_spill] sm:$0xff] %v5511_v20  ;;  %v1147_v60 = vmul.f32 %v6830_v29, %v6825_v12  ;;  %v1163_v40 = vmul.f32 %v6858_v11, %v6827_v6  ;;  %v1179_v34 = vmul.f32 %v6826_v25, %v6829_v16  ;;  %v1057_v22 = vsub.f32 %v1041_v46, %v5394_v55  ;;  %v6882_v20 = vld [vmem:[#allocation67_spill] sm:$0xff] }
 0x2e6   : > { %v1177_v19 = vadd.f32 %v1175_v59, %v1161_v58  ;;  %v1117_v33 = vadd.f32 %v1115_v62, %v1103_v14  ;;  %v1237_v5 = vadd.f32 %v1235_v43, %v1221_v54  ;;  %v1211_v53 = vmul.f32 %v6855_v61, %v6834_v56 }
 0x2e7   : > { %v1227_v18 = vmul.f32 %v6821_v57, %v6836_v17  ;;  %v1243_v1 = vmul.f32 %v6850_v4, %v6838_v52  ;;  %1960 = vxpose.xlu1.b32.cont [3/16] %v5498_v51, 128  ;;  %v1073_v50 = vadd.f32 %v6882_v20, %v1057_v22  ;;  %v5538_v55 = vmul.f32 %v6847_v42, %v6841_v2 }
 0x2e8   : > { %v1193_v63 = vadd.f32 %v1191_v10, %v1177_v19  ;;  %v1133_v13 = vadd.f32 %v1131_v48, %v1117_v33  ;;  %v1253_v43 = vadd.f32 %v5431_v35, %v1237_v5  ;;  %v5543_v59 = vmul.f32 %v6818_v36, %v6843_v39  ;;  %v6883_v10 = vld [vmem:[#allocation82_spill] sm:$0xff] }
 0x2e9   : > { %v5547_v14 = vmul.f32 %v6842_v32, %v6846_v49  ;;  %v5551_v46 = vmul.f32 %v6839_v28, %v6849_v31  ;;  %v5554_v20 = vsub.f32 %v1073_v50, %v6883_v10  ;;  %v5558_v35 = vmul.f32 %v6835_v9, %v6854_v41  ;;  %v6885_v50 = vld [vmem:[#allocation62_spill] sm:$0xff] }
 0x2ea   : > { %v1209_v58 = vadd.f32 %v1207_v24, %v1193_v63  ;;  %v1149_v62 = vsub.f32 %v1133_v13, %v1147_v60  ;;  %v1269_v48 = vsub.f32 %v1253_v43, %v5435_v30  ;;  %v5563_v54 = vmul.f32 %v6828_v27, %v6857_v45 }
 0x2eb   : > { %6884 = vst [vmem:[#allocation75_spill] sm:$0xff] %v5554_v20  ;;  %v1105_v22 = vmul.f32 %v6819_v0, %v6847_v42  ;;  %v1119_v19 = vmul.f32 %v6839_v28, %v6820_v38  ;;  %1961 = vxpose.xlu1.b32.cont [4/16] %v5554_v20, 128  ;;  %v1135_v63 = vmul.f32 %v6835_v9, %v6823_v44 }
 0x2ec   : > { %v1225_v24 = vsub.f32 %v1209_v58, %v1223_v7  ;;  %v1165_v13 = vsub.f32 %v1149_v62, %v1163_v40  ;;  %v1151_v30 = vmul.f32 %v6858_v11, %v6825_v12  ;;  %v1285_v60 = vadd.f32 %v6885_v50, %v1269_v48  ;;  %v6886_v58 = vld [vmem:[#allocation46_spill] sm:$0xff] }
 0x2ed   : > { %v1121_v33 = vadd.f32 %v1119_v19, %v1105_v22  ;;  %v1167_v5 = vmul.f32 %v6830_v29, %v6827_v6  ;;  %v1183_v43 = vmul.f32 %v6828_v27, %v6829_v16  ;;  %v1195_v7 = vmul.f32 %v6824_v37, %v6832_v3 }
 0x2ee   : > { %v1241_v10 = vsub.f32 %v1225_v24, %v1239_v23  ;;  %v1181_v51 = vsub.f32 %v1165_v13, %v1179_v34  ;;  %v1199_v40 = vmul.f32 %v6855_v61, %v6832_v3  ;;  %v1301_v62 = vadd.f32 %v6886_v58, %v1285_v60  ;;  %v6887_v24 = vld [vmem:[#allocation72_spill] sm:$0xff] }
 0x2ef   : > { %v1137_v20 = vadd.f32 %v1135_v63, %v1121_v33  ;;  %v1231_v48 = vmul.f32 %v6850_v4, %v6836_v17  ;;  %v1247_v22 = vmul.f32 %v6821_v57, %v6838_v52  ;;  %v1263_v23 = vmul.f32 %v6844_v47, %v6841_v2 }
 0x2f0   : > { %v1257_v19 = vsub.f32 %v1241_v10, %v5487_v15  ;;  %v1197_v50 = vadd.f32 %v1195_v7, %v1181_v51  ;;  %v5593_v34 = vmul.f32 %v6842_v32, %v6843_v39  ;;  %v1317_v13 = vsub.f32 %v1301_v62, %v6887_v24 }
 0x2f1   : > { %v1153_v60 = vadd.f32 %v1151_v30, %v1137_v20  ;;  %v5598_v63 = vmul.f32 %v6818_v36, %v6846_v49  ;;  %v5602_v33 = vmul.f32 %v6837_v8, %v6849_v31  ;;  %v5607_v10 = vmul.f32 %v6833_v21, %v6854_v41  ;;  %v6892_v20 = vld [vmem:[#allocation86_spill] sm:$0xff] }
 0x2f2   : > { %v1273_v15 = vsub.f32 %v1257_v19, %v5491_v26  ;;  %v1213_v51 = vadd.f32 %v1211_v53, %v1197_v50  ;;  %v5611_v7 = vmul.f32 %v6826_v25, %v6857_v45  ;;  %v5614_v30 = vadd.f32 %v6892_v20, %v1317_v13  ;;  %v6894_v26 = vld [vmem:[#allocation48_spill] sm:$0xff] }
 0x2f3   : > { %6888 = vst [vmem:[#allocation64_spill] sm:$0xff] %v5598_v63  ;;  %6889 = vst [vmem:[#allocation83_spill] sm:$0xff] %v5602_v33  ;;  %v1169_v58 = vsub.f32 %v1153_v60, %v1167_v5  ;;  %v1355_v62 = vmul.f32 %v6819_v0, %v6826_v25  ;;  %v1363_v24 = vmul.f32 %v6833_v21, %v6820_v38 }
 0x2f4   : > { %6890 = vst [vmem:[#allocation74_spill] sm:$0xff] %v5607_v10  ;;  %6891 = vst [vmem:[#allocation70_spill] sm:$0xff] %v5611_v7  ;;  %v1289_v53 = vsub.f32 %v1273_v15, %v6894_v26  ;;  %v1229_v19 = vadd.f32 %v1227_v18, %v1213_v51  ;;  %v1379_v50 = vmul.f32 %v6837_v8, %v6823_v44  ;;  %1962 = vxpose.xlu1.b32.cont [5/16] %v5614_v30, 128  ;;  %v6895_v7 = vld [vmem:[#allocation108_spill] sm:$0xff] }
 0x2f5   : > { %6893 = vst [vmem:[#allocation76_spill] sm:$0xff] %v5614_v30  ;;  %v1395_v10 = vmul.f32 %v6818_v36, %v6825_v12  ;;  %v1185_v13 = vsub.f32 %v1169_v58, %v1183_v43  ;;  %v1365_v20 = vadd.f32 %v1363_v24, %v1355_v62  ;;  %v1411_v5 = vmul.f32 %v6842_v32, %v6827_v6  ;;  %v6896_v24 = vld [vmem:[#allocation87_spill] sm:$0xff] }
 0x2f6   : > { %v1427_v60 = vmul.f32 %v6844_v47, %v6829_v16  ;;  %v1305_v33 = vsub.f32 %v1289_v53, %v6895_v7  ;;  %v1245_v15 = vadd.f32 %v1243_v1, %v1229_v19  ;;  %v1443_v18 = vmul.f32 %v6821_v57, %v6832_v3 }
 0x2f7   : > { %v1459_v51 = vmul.f32 %v6850_v4, %v6834_v56  ;;  %v1201_v26 = vsub.f32 %v1185_v13, %v1199_v40  ;;  %v1215_v43 = vmul.f32 %v6824_v37, %v6834_v56  ;;  %v1381_v58 = vadd.f32 %v1379_v50, %v1365_v20 }
 0x2f8   : > { %v1491_v62 = vmul.f32 %v6855_v61, %v6838_v52  ;;  %v1321_v30 = vadd.f32 %v6896_v24, %v1305_v33  ;;  %v1261_v63 = vsub.f32 %v1245_v15, %v5538_v55  ;;  %v5643_v1 = vmul.f32 %v6828_v27, %v6841_v2  ;;  %v6897_v33 = vld [vmem:[#allocation66_spill] sm:$0xff] }
 0x2f9   : > { %v5647_v7 = vmul.f32 %v6830_v29, %v6843_v39  ;;  %v1217_v40 = vadd.f32 %v1215_v43, %v1201_v26  ;;  %v1397_v53 = vsub.f32 %v1381_v58, %v1395_v10  ;;  %v5651_v19 = vmul.f32 %v6858_v11, %v6846_v49 }
 0x2fa   : > { %v5655_v50 = vmul.f32 %v6835_v9, %v6849_v31  ;;  %v5658_v55 = vsub.f32 %v1321_v30, %v6897_v33  ;;  %v1277_v13 = vadd.f32 %v5543_v59, %v1261_v63  ;;  %v5663_v20 = vmul.f32 %v6839_v28, %v6854_v41 }
 0x2fb   : > { %v5667_v10 = vmul.f32 %v6847_v42, %v6857_v45  ;;  %v1233_v15 = vsub.f32 %v1217_v40, %v1231_v48  ;;  %v1413_v26 = vsub.f32 %v1397_v53, %v1411_v5  ;;  %v1357_v43 = vmul.f32 %v6819_v0, %v6828_v27 }
 0x2fc   : > { %6898 = vst [vmem:[#allocation106_spill] sm:$0xff] %v5658_v55  ;;  %6899 = vst [vmem:[#allocation77_spill] sm:$0xff] %v5663_v20  ;;  %v1367_v58 = vmul.f32 %v6835_v9, %v6820_v38  ;;  %1963 = vxpose.xlu1.b32.cont [6/16] %v5658_v55, 128  ;;  %v1293_v59 = vadd.f32 %v5547_v14, %v1277_v13  ;;  %v1383_v63 = vmul.f32 %v6839_v28, %v6823_v44 }
 0x2fd   : > { %6900 = vst [vmem:[#allocation53_spill] sm:$0xff] %v5667_v10  ;;  %v1399_v30 = vmul.f32 %v6842_v32, %v6825_v12  ;;  %v1415_v48 = vmul.f32 %v6818_v36, %v6827_v6  ;;  %v1249_v5 = vadd.f32 %v1247_v22, %v1233_v15  ;;  %v1429_v24 = vsub.f32 %v1413_v26, %v1427_v60 }
 0x2fe   : > { %v1369_v40 = vadd.f32 %v1367_v58, %v1357_v43  ;;  %v1431_v53 = vmul.f32 %v6847_v42, %v6829_v16  ;;  %v1309_v33 = vsub.f32 %v1293_v59, %v5551_v46  ;;  %v1447_v14 = vmul.f32 %v6850_v4, %v6832_v3 }
 0x2ff   : > { %v1463_v13 = vmul.f32 %v6821_v57, %v6834_v56  ;;  %v1479_v55 = vmul.f32 %v6855_v61, %v6836_v17  ;;  %v1265_v10 = vadd.f32 %v1263_v23, %v1249_v5  ;;  %v1445_v20 = vadd.f32 %v1443_v18, %v1429_v24 }
 0x300   : > { %v1475_v22 = vmul.f32 %v6824_v37, %v6836_v17  ;;  %v1385_v60 = vadd.f32 %v1383_v63, %v1369_v40  ;;  %v1325_v15 = vsub.f32 %v1309_v33, %v5558_v35  ;;  %v5695_v46 = vmul.f32 %v6826_v25, %v6841_v2 }
 0x301   : > { %v5699_v26 = vmul.f32 %v6858_v11, %v6843_v39  ;;  %v5703_v43 = vmul.f32 %v6830_v29, %v6846_v49  ;;  %v1281_v23 = vsub.f32 %v1265_v10, %v5593_v34  ;;  %v1461_v18 = vadd.f32 %v1459_v51, %v1445_v20  ;;  %v6905_v51 = vld [vmem:[#allocation64_spill] sm:$0xff] }
 0x302   : > { %v1401_v58 = vadd.f32 %v1399_v30, %v1385_v60  ;;  %v5708_v59 = vmul.f32 %v6833_v21, %v6849_v31  ;;  %v5711_v35 = vadd.f32 %v5563_v54, %v1325_v15  ;;  %v5715_v63 = vmul.f32 %v6837_v8, %v6854_v41  ;;  %v6906_v15 = vld [vmem:[#allocation83_spill] sm:$0xff] }
 0x303   : > { %v5719_v5 = vmul.f32 %v6844_v47, %v6857_v45  ;;  %v1359_v34 = vmul.f32 %v6819_v0, %v6855_v61  ;;  %v1297_v20 = vadd.f32 %v6905_v51, %v1281_v23  ;;  %v1477_v10 = vadd.f32 %v1475_v22, %v1461_v18 }
 0x304   : > { %6901 = vst [vmem:[#allocation105_spill] sm:$0xff] %v5708_v59  ;;  %6902 = vst [vmem:[#allocation84_spill] sm:$0xff] %v5711_v35  ;;  %v1417_v30 = vsub.f32 %v1401_v58, %v1415_v48  ;;  %v1371_v24 = vmul.f32 %v6858_v11, %v6820_v38  ;;  %1964 = vxpose.xlu1.b32.cont [7/16] %v5711_v35, 128  ;;  %v1387_v54 = vmul.f32 %v6842_v32, %v6823_v44 }
 0x305   : > { %6903 = vst [vmem:[#allocation98_spill] sm:$0xff] %v5715_v63  ;;  %6904 = vst [vmem:[#allocation92_spill] sm:$0xff] %v5719_v5  ;;  %v1403_v40 = vmul.f32 %v6839_v28, %v6825_v12  ;;  %v1419_v33 = vmul.f32 %v6837_v8, %v6827_v6  ;;  %v1435_v60 = vmul.f32 %v6850_v4, %v6829_v16  ;;  %v6907_v63 = vld [vmem:[#allocation74_spill] sm:$0xff] }
 0x306   : > { %v1313_v22 = vadd.f32 %v6906_v15, %v1297_v20  ;;  %v1493_v48 = vadd.f32 %v1491_v62, %v1477_v10  ;;  %v1433_v23 = vsub.f32 %v1417_v30, %v1431_v53  ;;  %v1373_v18 = vadd.f32 %v1371_v24, %v1359_v34 }
 0x307   : > { %v1451_v58 = vmul.f32 %v6847_v42, %v6832_v3  ;;  %v1467_v51 = vmul.f32 %v6844_v47, %v6834_v56  ;;  %v1483_v35 = vmul.f32 %v6828_v27, %v6836_v17  ;;  %v5744_v5 = vmul.f32 %v6826_v25, %v6838_v52 }
 0x308   : > { %v1329_v59 = vadd.f32 %v6907_v63, %v1313_v22  ;;  %v1509_v20 = vsub.f32 %v1493_v48, %v5643_v1  ;;  %v1449_v62 = vsub.f32 %v1433_v23, %v1447_v14  ;;  %v1389_v53 = vsub.f32 %v1373_v18, %v1387_v54  ;;  %v6908_v63 = vld [vmem:[#allocation70_spill] sm:$0xff] }
 0x309   : > { %v1495_v34 = vmul.f32 %v6824_v37, %v6838_v52  ;;  %v5752_v10 = vmul.f32 %v6835_v9, %v6843_v39  ;;  %v5756_v30 = vmul.f32 %v6833_v21, %v6846_v49  ;;  %v5760_v24 = vmul.f32 %v6830_v29, %v6849_v31 }
 0x30a   : > { %v5763_v15 = vsub.f32 %v1329_v59, %v6908_v63  ;;  %v1525_v1 = vadd.f32 %v5647_v7, %v1509_v20  ;;  %v1465_v14 = vadd.f32 %v1463_v13, %v1449_v62  ;;  %v1405_v54 = vadd.f32 %v1403_v40, %v1389_v53  ;;  %v5778_v59 = vpop.trf.xlu0 }
 0x30b   : > { %v5768_v22 = vmul.f32 %v6818_v36, %v6854_v41  ;;  %v5772_v48 = vmul.f32 %v6821_v57, %v6857_v45  ;;  %v1361_v23 = vmul.f32 %v6819_v0, %v6833_v21  ;;  %v1375_v18 = vmul.f32 %v6826_v25, %v6820_v38  ;;  %6912 = vst [vmem:[#allocation71_spill] sm:$0xff] %v5778_v59 }
 0x30c   : > { %6909 = vst [vmem:[#allocation102_spill] sm:$0xff] %v5763_v15  ;;  %1965 = vxpose.xlu1.b32.cont [8/16] %v5763_v15, 128  ;;  %v1541_v7 = vadd.f32 %v5651_v19, %v1525_v1  ;;  %v1481_v13 = vsub.f32 %v1465_v14, %v1479_v55  ;;  %v1421_v40 = vsub.f32 %v1405_v54, %v1419_v33  ;;  %v6913_v54 = vld [vmem:[#allocation77_spill] sm:$0xff] }
 0x30d   : > { %6910 = vst [vmem:[#allocation107_spill] sm:$0xff] %v5768_v22  ;;  %6911 = vst [vmem:[#allocation56_spill] sm:$0xff] %v5772_v48  ;;  %v1391_v20 = vmul.f32 %v6844_v47, %v6823_v44  ;;  %v1377_v62 = vadd.f32 %v1375_v18, %v1361_v23  ;;  %v1407_v53 = vmul.f32 %v6821_v57, %v6825_v12 }
 0x30e   : > { %v1423_v63 = vmul.f32 %v6850_v4, %v6827_v6  ;;  %v1439_v48 = vmul.f32 %v6837_v8, %v6829_v16  ;;  %v1557_v59 = vsub.f32 %v1541_v7, %v5655_v50  ;;  %v1497_v15 = vadd.f32 %v1495_v34, %v1481_v13 }
 0x30f   : > { %v1437_v22 = vadd.f32 %v1435_v60, %v1421_v40  ;;  %v1455_v19 = vmul.f32 %v6818_v36, %v6832_v3  ;;  %v1393_v55 = vsub.f32 %v1377_v62, %v1391_v20  ;;  %v1471_v33 = vmul.f32 %v6842_v32, %v6834_v56 }
 0x310   : > { %v1487_v1 = vmul.f32 %v6830_v29, %v6836_v17  ;;  %v1503_v14 = vmul.f32 %v6858_v11, %v6838_v52  ;;  %v1573_v23 = vsub.f32 %v1557_v59, %v6913_v54  ;;  %v1513_v18 = vadd.f32 %v5695_v46, %v1497_v15  ;;  %v5815_v59 = vpop.trf.xlu0  ;;  %v6915_v46 = vld [vmem:[#allocation53_spill] sm:$0xff] }
 0x311   : > { %v1453_v50 = vsub.f32 %v1437_v22, %v1451_v58  ;;  %v5803_v60 = vmul.f32 %v6835_v9, %v6841_v2  ;;  %v1515_v34 = vmul.f32 %v6824_v37, %v6841_v2  ;;  %v1409_v7 = vadd.f32 %v1407_v53, %v1393_v55  ;;  %6914 = vst [vmem:[#allocation58_spill] sm:$0xff] %v5815_v59  ;;  %v6918_v59 = vld [vmem:[#allocation105_spill] sm:$0xff] }
 0x312   : > { %v5809_v13 = vmul.f32 %v6855_v61, %v6846_v49  ;;  %v5813_v40 = vmul.f32 %v6828_v27, %v6849_v31  ;;  %v5818_v58 = vadd.f32 %v6915_v46, %v1573_v23  ;;  %v1529_v15 = vsub.f32 %v1513_v18, %v5699_v26 }
 0x313   : > { %v1469_v22 = vadd.f32 %v1467_v51, %v1453_v50  ;;  %v5823_v20 = vmul.f32 %v6847_v42, %v6854_v41  ;;  %v1425_v62 = vadd.f32 %v1423_v63, %v1409_v7  ;;  %v5827_v53 = vmul.f32 %v6839_v28, %v6857_v45 }
 0x314   : > { %6916 = vst [vmem:[#allocation28_spill] sm:$0xff] %v5818_v58  ;;  %v1611_v55 = vmul.f32 %v6819_v0, %v6835_v9  ;;  %v1619_v54 = vmul.f32 %v6828_v27, %v6820_v38  ;;  %1966 = vxpose.xlu1.b32.cont [9/16] %v5818_v58, 128  ;;  %v1545_v26 = vadd.f32 %v5703_v43, %v1529_v15 }
 0x315   : > { %6917 = vst [vmem:[#allocation31_spill] sm:$0xff] %v5827_v53  ;;  %v1485_v51 = vadd.f32 %v1483_v35, %v1469_v22  ;;  %v1635_v23 = vmul.f32 %v6847_v42, %v6823_v44  ;;  %v1651_v63 = vmul.f32 %v6850_v4, %v6825_v12  ;;  %v1441_v18 = vadd.f32 %v1439_v48, %v1425_v62 }
 0x316   : > { %v1621_v50 = vadd.f32 %v1619_v54, %v1611_v55  ;;  %v1667_v7 = vmul.f32 %v6821_v57, %v6827_v6  ;;  %v1683_v46 = vmul.f32 %v6839_v28, %v6829_v16  ;;  %v1561_v53 = vadd.f32 %v6918_v59, %v1545_v26  ;;  %v5853_v55 = vpop.trf.xlu0  ;;  %v6920_v54 = vld [vmem:[#allocation98_spill] sm:$0xff] }
 0x317   : > { %v1501_v58 = vsub.f32 %v1485_v51, %v5744_v5  ;;  %v1699_v43 = vmul.f32 %v6842_v32, %v6832_v3  ;;  %v1715_v35 = vmul.f32 %v6818_v36, %v6834_v56  ;;  %v1457_v15 = vsub.f32 %v1441_v18, %v1455_v19  ;;  %6919 = vst [vmem:[#allocation88_spill] sm:$0xff] %v5853_v55  ;;  %v6921_v55 = vld [vmem:[#allocation92_spill] sm:$0xff] }
 0x318   : > { %v1637_v22 = vsub.f32 %v1621_v50, %v1635_v23  ;;  %v1731_v48 = vmul.f32 %v6858_v11, %v6836_v17  ;;  %v1747_v62 = vmul.f32 %v6830_v29, %v6838_v52  ;;  %v1577_v59 = vadd.f32 %v6920_v54, %v1561_v53 }
 0x319   : > { %v1517_v26 = vadd.f32 %v1515_v34, %v1501_v58  ;;  %v5858_v5 = vmul.f32 %v6833_v21, %v6841_v2  ;;  %v5862_v51 = vmul.f32 %v6855_v61, %v6843_v39  ;;  %v1473_v19 = vsub.f32 %v1457_v15, %v1471_v33 }
 0x31a   : > { %v1535_v23 = vmul.f32 %v6824_v37, %v6843_v39  ;;  %v1653_v18 = vsub.f32 %v1637_v22, %v1651_v63  ;;  %v5868_v50 = vmul.f32 %v6826_v25, %v6849_v31  ;;  %v5871_v53 = vsub.f32 %v1577_v59, %v6921_v55 }
 0x31b   : > { %v1533_v34 = vadd.f32 %v5752_v10, %v1517_v26  ;;  %v5876_v58 = vmul.f32 %v6844_v47, %v6854_v41  ;;  %v5880_v33 = vmul.f32 %v6837_v8, %v6857_v45  ;;  %v1489_v15 = vadd.f32 %v1487_v1, %v1473_v19 }
 0x31c   : > { %6922 = vst [vmem:[#allocation54_spill] sm:$0xff] %v5871_v53  ;;  %v1669_v54 = vadd.f32 %v1667_v7, %v1653_v18  ;;  %v1613_v63 = vmul.f32 %v6819_v0, %v6858_v11  ;;  %v1623_v22 = vmul.f32 %v6855_v61, %v6820_v38  ;;  %1967 = vxpose.xlu1.b32.cont [10/16] %v5871_v53, 128 }
 0x31d   : > { %6923 = vst [vmem:[#allocation32_spill] sm:$0xff] %v5876_v58  ;;  %6924 = vst [vmem:[#allocation47_spill] sm:$0xff] %v5880_v33  ;;  %v1549_v10 = vsub.f32 %v1533_v34, %v5756_v30  ;;  %v1639_v55 = vmul.f32 %v6850_v4, %v6823_v44  ;;  %v1655_v59 = vmul.f32 %v6847_v42, %v6825_v12  ;;  %v5896_v33 = vpop.trf.xlu0 }
 0x31e   : > { %v1671_v1 = vmul.f32 %v6844_v47, %v6827_v6  ;;  %v1505_v7 = vadd.f32 %v1503_v14, %v1489_v15  ;;  %v1685_v26 = vadd.f32 %v1683_v46, %v1669_v54  ;;  %v1625_v19 = vadd.f32 %v1623_v22, %v1613_v63  ;;  %6925 = vst [vmem:[#allocation33_spill] sm:$0xff] %v5896_v33  ;;  %v6926_v63 = vld [vmem:[#allocation107_spill] sm:$0xff] }
 0x31f   : > { %v1687_v18 = vmul.f32 %v6842_v32, %v6829_v16  ;;  %v1565_v53 = vadd.f32 %v5760_v24, %v1549_v10  ;;  %v1703_v30 = vmul.f32 %v6839_v28, %v6832_v3  ;;  %v1719_v34 = vmul.f32 %v6837_v8, %v6834_v56 }
 0x320   : > { %v1735_v58 = vmul.f32 %v6835_v9, %v6836_v17  ;;  %v1521_v14 = vsub.f32 %v1505_v7, %v5803_v60  ;;  %v1701_v46 = vadd.f32 %v1699_v43, %v1685_v26  ;;  %v1641_v15 = vadd.f32 %v1639_v55, %v1625_v19  ;;  %v5925_v26 = vpop.trf.xlu1 }
 0x321   : > { %v5908_v54 = vmul.f32 %v6833_v21, %v6838_v52  ;;  %v1581_v22 = vsub.f32 %v1565_v53, %v6926_v63  ;;  %v5913_v24 = vmul.f32 %v6830_v29, %v6841_v2  ;;  %v5917_v10 = vmul.f32 %v6828_v27, %v6843_v39  ;;  %6928 = vst [vmem:[#allocation34_spill] sm:$0xff] %v5925_v26  ;;  %v6929_v53 = vld [vmem:[#allocation56_spill] sm:$0xff] }
 0x322   : > { %v5921_v33 = vmul.f32 %v6826_v25, %v6846_v49  ;;  %v1537_v60 = vadd.f32 %v1535_v23, %v1521_v14  ;;  %v1717_v43 = vsub.f32 %v1701_v46, %v1715_v35  ;;  %v1795_v55 = vmul.f32 %v6824_v37, %v6846_v49 }
 0x323   : > { %6927 = vst [vmem:[#allocation101_spill] sm:$0xff] %v5917_v10  ;;  %v1657_v7 = vsub.f32 %v1641_v15, %v1655_v59  ;;  %v5928_v19 = vadd.f32 %v6929_v53, %v1581_v22  ;;  %v5932_v63 = vmul.f32 %v6821_v57, %v6854_v41  ;;  %v5936_v10 = vmul.f32 %v6818_v36, %v6857_v45  ;;  %v5943_v15 = vpop.trf.xlu0 }
 0x324   : > { %v1615_v35 = vmul.f32 %v6819_v0, %v6842_v32  ;;  %v1553_v23 = vadd.f32 %v5809_v13, %v1537_v60  ;;  %v1733_v14 = vsub.f32 %v1717_v43, %v1731_v48  ;;  %v1627_v46 = vmul.f32 %v6850_v4, %v6820_v38  ;;  %6933 = vst [vmem:[#allocation113_spill] sm:$0xff] %v5943_v15 }
 0x325   : > { %6930 = vst [vmem:[#allocation104_spill] sm:$0xff] %v5928_v19  ;;  %6931 = vst [vmem:[#allocation35_spill] sm:$0xff] %v5932_v63  ;;  %v1673_v59 = vadd.f32 %v1671_v1, %v1657_v7  ;;  %1968 = vxpose.xlu1.b32.cont [11/16] %v5928_v19, 128  ;;  %v1643_v22 = vmul.f32 %v6855_v61, %v6823_v44  ;;  %v1659_v53 = vmul.f32 %v6828_v27, %v6825_v12  ;;  %v5955_v7 = vpop.trf.xlu1 }
 0x326   : > { %6932 = vst [vmem:[#allocation50_spill] sm:$0xff] %v5936_v10  ;;  %v1675_v10 = vmul.f32 %v6826_v25, %v6827_v6  ;;  %v1691_v13 = vmul.f32 %v6858_v11, %v6829_v16  ;;  %v1569_v48 = vsub.f32 %v1553_v23, %v5813_v40  ;;  %v1749_v1 = vadd.f32 %v1747_v62, %v1733_v14 }
 0x327   : > { %v1689_v60 = vsub.f32 %v1673_v59, %v1687_v18  ;;  %v1629_v43 = vadd.f32 %v1627_v46, %v1615_v35  ;;  %v1707_v15 = vmul.f32 %v6835_v9, %v6832_v3  ;;  %v1723_v63 = vmul.f32 %v6833_v21, %v6834_v56 }
 0x328   : > { %v1739_v19 = vmul.f32 %v6839_v28, %v6836_v17  ;;  %v5965_v26 = vmul.f32 %v6837_v8, %v6838_v52  ;;  %v1585_v40 = vadd.f32 %v5823_v20, %v1569_v48  ;;  %v1765_v62 = vadd.f32 %v5858_v5, %v1749_v1  ;;  %v6936_v20 = vld [vmem:[#allocation31_spill] sm:$0xff] }
 0x329   : > { %v1705_v18 = vadd.f32 %v1703_v30, %v1689_v60  ;;  %v1645_v35 = vadd.f32 %v1643_v22, %v1629_v43  ;;  %v5971_v23 = vmul.f32 %v6818_v36, %v6841_v2  ;;  %v5975_v14 = vmul.f32 %v6847_v42, %v6843_v39  ;;  %v5989_v1 = vpop.trf.xlu1  ;;  %v5991_v60 = vpop.trf.xlu0 }
 0x32a   : > { %v5979_v59 = vmul.f32 %v6844_v47, %v6846_v49  ;;  %v5983_v46 = vmul.f32 %v6821_v57, %v6849_v31  ;;  %v5986_v5 = vsub.f32 %v1585_v40, %v6936_v20  ;;  %v1781_v30 = vsub.f32 %v1765_v62, %v5862_v51  ;;  %v6945_v20 = vld [vmem:[#allocation34_spill] sm:$0xff] }
 0x32b   : > { %v1721_v22 = vsub.f32 %v1705_v18, %v1719_v34  ;;  %v1661_v48 = vsub.f32 %v1645_v35, %v1659_v53  ;;  %v5995_v43 = vmul.f32 %v6830_v29, %v6857_v45  ;;  %v1647_v53 = vmul.f32 %v6858_v11, %v6823_v44 }
 0x32c   : > { %6934 = vst [vmem:[#allocation36_spill] sm:$0xff] %v5979_v59  ;;  %6935 = vst [vmem:[#allocation114_spill] sm:$0xff] %v5983_v46  ;;  %v1617_v59 = vmul.f32 %v6819_v0, %v6850_v4  ;;  %v1631_v46 = vmul.f32 %v6842_v32, %v6820_v38  ;;  %1969 = vxpose.xlu1.b32.cont [12/16] %v5986_v5, 128  ;;  %v1797_v40 = vadd.f32 %v1795_v55, %v1781_v30  ;;  %v6947_v30 = vld [vmem:[#allocation102_spill] sm:$0xff] }
 0x32d   : > { %v1737_v51 = vadd.f32 %v1735_v58, %v1721_v22  ;;  %v1677_v34 = vadd.f32 %v1675_v10, %v1661_v48  ;;  %v1663_v18 = vmul.f32 %v6835_v9, %v6825_v12  ;;  %v1679_v35 = vmul.f32 %v6833_v21, %v6827_v6  ;;  %v6014_v10 = vpop.trf.xlu1  ;;  %v6948_v48 = vld [vmem:[#allocation28_spill] sm:$0xff] }
 0x32e   : > { %v1633_v62 = vadd.f32 %v1631_v46, %v1617_v59  ;;  %v1695_v4 = vmul.f32 %v6855_v61, %v6829_v16  ;;  %v1813_v0 = vadd.f32 %v5868_v50, %v1797_v40  ;;  %v1711_v58 = vmul.f32 %v6828_v27, %v6832_v3  ;;  %v6937_v16 = vld [vmem:[#allocation32_spill] sm:$0xff]  ;;  %v6026_v3 = vpop.trf.xlu0  ;;  %v6949_v40 = vld [vmem:[#allocation54_spill] sm:$0xff] }
 0x32f   : > { %v1753_v38 = vsub.f32 %v1737_v51, %v5908_v54  ;;  %v1693_v32 = vsub.f32 %v1677_v34, %v1691_v13  ;;  %v1727_v12 = vmul.f32 %v6826_v25, %v6834_v56  ;;  %v1743_v6 = vmul.f32 %v6847_v42, %v6836_v17  ;;  %v6939_v42 = vld [vmem:[#allocation101_spill] sm:$0xff]  ;;  %v6942_v13 = vld [vmem:[#allocation71_spill] sm:$0xff]  ;;  %v6950_v34 = vld [vmem:[#allocation104_spill] sm:$0xff] }
 0x330   : > { %v1649_v44 = vsub.f32 %v1633_v62, %v1647_v53  ;;  %v1759_v61 = vmul.f32 %v6844_v47, %v6838_v52  ;;  %v1829_v21 = vsub.f32 %v1813_v0, %v6937_v16  ;;  %v1775_v27 = vmul.f32 %v6821_v57, %v6841_v2  ;;  %v6938_v52 = vld [vmem:[#allocation47_spill] sm:$0xff]  ;;  %2998 = vmatprep.mubr.msk.f32.mxu1 %vm2054_vm2, %v6942_v13  ;;  %v6951_v62 = vld [vmem:[#allocation116_spill] sm:$0xff]  ;;  %v6954_v0 = vld [vmem:[#allocation58_spill] sm:$0xff] }
 0x331   : > { %v1769_v9 = vadd.f32 %v5913_v24, %v1753_v38  ;;  %v1709_v11 = vadd.f32 %v1707_v15, %v1693_v32  ;;  %v1791_v25 = vmul.f32 %v6839_v28, %v6843_v39  ;;  %v6032_v56 = vmul.f32 %v6837_v8, %v6846_v49  ;;  %v1946_v24 = vpop.trf.xlu1  ;;  %v6940_v39 = vld [vmem:[#allocation55_spill] sm:$0xff]  ;;  %2216 = vmatmul.mubr.f32.vlgmr.msra.gmra.mrb[4].mxu1 %v6945_v20 }
 0x332   : > { %v1665_v50 = vadd.f32 %v1663_v18, %v1649_v44  ;;  %v6036_v17 = vmul.f32 %v6818_v36, %v6849_v31  ;;  %v6039_v47 = vadd.f32 %v6938_v52, %v1829_v21  ;;  %v6044_v2 = vmul.f32 %v6830_v29, %v6854_v41  ;;  %v6941_v49 = vld [vmem:[#allocation75_spill] sm:$0xff]  ;;  %v6944_v29 = vld [vmem:[#allocation106_spill] sm:$0xff]  ;;  %2999 = vmatprep.mubr.msk.f32.mxu1 %vm2054_vm2, %v6954_v0  ;;  %v2013_v38 = vpop.trf.xlu0  ;;  %v6958_v52 = vld [vmem:[#allocation60_spill] sm:$0xff] }
 0x333   : > { %v1785_v54 = vadd.f32 %v6939_v42, %v1769_v9  ;;  %v1725_v57 = vsub.f32 %v1709_v11, %v1723_v63  ;;  %v1815_v28 = vmul.f32 %v6824_v37, %v6849_v31  ;;  %v3212_v36 = vpack.c.bf16 %v6941_v49, %v6940_v39  ;;  %v6943_v63 = vld [vmem:[#allocation76_spill] sm:$0xff]  ;;  %v6952_v18 = vld [vmem:[#allocation59_spill] sm:$0xff] }
 0x334   : > { %v1681_v8 = vsub.f32 %v1665_v50, %v1679_v35  ;;  %1970 = vxpose.xlu1.b32.cont [13/16] %v6039_v47, 128  ;;  %v3216_v59 = vpack.c.bf16 %v6944_v29, %v6943_v63  ;;  %v6946_v31 = vld [vmem:[#allocation84_spill] sm:$0xff]  ;;  %v3224_v51 = vpack.c.bf16 %v6949_v40, %v6948_v48  ;;  %v3228_v53 = vpack.c.bf16 %v5986_v5, %v6950_v34  ;;  %v6955_v44 = vld [vmem:[#allocation35_spill] sm:$0xff]  ;;  %v6956_v5 = vld [vmem:[#allocation50_spill] sm:$0xff] }
 0x335   : > { %v1801_v55 = vsub.f32 %v1785_v54, %v5921_v33  ;;  %v1741_v15 = vadd.f32 %v1739_v19, %v1725_v57  ;;  %v3220_v22 = vpack.c.bf16 %v6947_v30, %v6946_v31  ;;  %v6953_v35 = vpack.c.bf16 %v6951_v62, %v6952_v18  ;;  %2221 = vmatmul.mubr.f32.gmra.mrb[6].mxu1 %v5955_v7  ;;  %v6957_v50 = vld [vmem:[#allocation49_spill] sm:$0xff]  ;;  %v6960_v54 = vld [vmem:[#allocation88_spill] sm:$0xff] }
 0x336   : > { %v1697_v46 = vadd.f32 %v1695_v4, %v1681_v8  ;;  %v1947_v4 = vpop.trf.xlu1  ;;  %v6959_v42 = vpack.c.bf16 %v6957_v50, %v6958_v52  ;;  %3000 = vmatprep.mubr.msk.f32.mxu1 %vm2054_vm2, %v6960_v54  ;;  %v2014_v7 = vpop.trf.xlu0  ;;  %v1835_v49 = vmul.f32 %v6824_v37, %v6854_v41  ;;  %v6970_v41 = vld [vmem:[#allocation113_spill] sm:$0xff]  ;;  %v1855_v48 = vmul.f32 %v6824_v37, %v6857_v45 }
 0x337   : > { %v1817_v33 = vadd.f32 %v1815_v28, %v1801_v55  ;;  %v1757_v19 = vsub.f32 %v1741_v15, %v5965_v26  ;;  %3211 = vmatpush1.bf16.msra.mxu1 %v6953_v35  ;;  %v6961_v28 = vld [vmem:[#allocation36_spill] sm:$0xff]  ;;  %v6964_v55 = vld [vmem:[#allocation89_spill] sm:$0xff] }
 0x338   : > { %v1713_v32 = vsub.f32 %v1697_v46, %v1711_v58  ;;  %3213 = vmatprep.subr.bf16.mxu1 %v3212_v36  ;;  %v6963_v36 = vld [vmem:[#allocation90_spill] sm:$0xff]  ;;  %v6975_v34 = vld [vmem:[#allocation29_spill] sm:$0xff] }
 0x339   : > { %v1833_v16 = vadd.f32 %v6955_v44, %v1817_v33  ;;  %v1773_v21 = vadd.f32 %v5971_v23, %v1757_v19  ;;  %2226 = vmatmul.mubr.f32.gmra.mrb[8].mxu1 %v5989_v1  ;;  %v6965_v15 = vpack.c.bf16 %v6963_v36, %v6964_v55  ;;  %v6978_v33 = vld [vmem:[#allocation73_spill] sm:$0xff] }
 0x33a   : > { %v1729_v9 = vadd.f32 %v1727_v12, %v1713_v32  ;;  %v1948_v58 = vpop.trf.xlu1  ;;  %v2015_v20 = vpop.trf.xlu0  ;;  %v6981_v62 = vld [vmem:[#allocation61_spill] sm:$0xff] }
 0x33b   : > { %v1849_v26 = vsub.f32 %v1833_v16, %v6956_v5  ;;  %v1789_v11 = vadd.f32 %v5975_v14, %v1773_v21  ;;  %3215 = vmatpush1.bf16.msra.mxu1 %v6959_v42  ;;  %v6962_v14 = vld [vmem:[#allocation114_spill] sm:$0xff] }
 0x33c   : > { %v1745_v57 = vadd.f32 %v1743_v6, %v1729_v9  ;;  %3217 = vmatprep.subr.bf16.mxu1 %v3216_v59  ;;  %v6966_v6 = vld [vmem:[#allocation33_spill] sm:$0xff]  ;;  %v6968_v59 = vld [vmem:[#allocation112_spill] sm:$0xff] }
 0x33d   : > { %1971 = vxpose.xlu1.b32.cont [14/16] %v1849_v26, 128  ;;  %v1805_v23 = vsub.f32 %v1789_v11, %v6961_v28  ;;  %v3232_v12 = vpack.c.bf16 %v1849_v26, %v6039_v47  ;;  %3001 = vmatprep.mubr.msk.f32.mxu1 %vm2054_vm2, %v6966_v6 }
 0x33e   : > { %v1761_v8 = vsub.f32 %v1745_v57, %v1759_v61  ;;  %v1949_v13 = vpop.trf.xlu1  ;;  %2231 = vmatmul.mubr.f32.gmra.mrb[10].mxu1 %v6014_v10  ;;  %v6967_v61 = vld [vmem:[#allocation95_spill] sm:$0xff]  ;;  %v6972_v10 = vld [vmem:[#allocation100_spill] sm:$0xff] }
 0x33f   : > { %v1821_v39 = vadd.f32 %v6962_v14, %v1805_v23  ;;  %3219 = vmatpush1.bf16.msra.mxu1 %v6965_v15  ;;  %v6969_v46 = vpack.c.bf16 %v6967_v61, %v6968_v59  ;;  %3002 = vmatprep.mubr.msk.f32.mxu1 %vm2054_vm2, %v6970_v41 }
 0x340   : > { %v1777_v63 = vadd.f32 %v1775_v27, %v1761_v8  ;;  %3221 = vmatprep.subr.bf16.mxu1 %v3220_v22 }
 0x341   : > { %v1837_v47 = vadd.f32 %v1835_v49, %v1821_v39 }
 0x342   : > { %v1793_v29 = vadd.f32 %v1791_v25, %v1777_v63  ;;  %v1950_v27 = vpop.trf.xlu1  ;;  %2236 = vmatmul.mubr.f32.gmra.mrb[12].mxu1 %v1946_v24  ;;  %v6971_v25 = vld [vmem:[#allocation27_spill] sm:$0xff] }
 0x343   : > { %v1853_v1 = vsub.f32 %v1837_v47, %v5995_v43  ;;  %3223 = vmatpush1.bf16.msra.mxu1 %v6969_v46  ;;  %v6973_v22 = vpack.c.bf16 %v6971_v25, %v6972_v10  ;;  %3003 = vmatprep.mubr.msk.f32.mxu1 %vm2054_vm2, %v5991_v60  ;;  %v2377_v25 = vld [vmem:[#allocation12 + $0x8] sm:$0xff] }
 0x344   : > { %v1809_v31 = vsub.f32 %v1793_v29, %v6032_v56  ;;  %3225 = vmatprep.subr.bf16.mxu1 %v3224_v51  ;;  %v2016_v56 = vpop.trf.xlu0  ;;  %v6974_v51 = vld [vmem:[#allocation111_spill] sm:$0xff] }
 0x345   : > { %1972 = vxpose.xlu1.b32.cont [15/16] %v1853_v1, 128 }
 0x346   : > { %v1825_v30 = vadd.f32 %v6036_v17, %v1809_v31  ;;  %2241 = vmatmul.mubr.f32.gmra.mrb[14].mxu1 %v1947_v4  ;;  %v6976_v17 = vpack.c.bf16 %v6974_v51, %v6975_v34  ;;  %v1951_v24 = vpop.trf.xlu1  ;;  %v6984_v4 = vld [vmem:[#allocation26_spill] sm:$0xff] }
 0x347   : > { %3227 = vmatpush1.bf16.msra.mxu1 %v6973_v22  ;;  %3004 = vmatprep.mubr.msk.f32.mxu1 %vm2054_vm2, %v6026_v3  ;;  %v6983_v3 = vld [vmem:[#allocation25_spill] sm:$0xff] }
 0x348   : > { %v1841_v43 = vsub.f32 %v1825_v30, %v6044_v2  ;;  %3229 = vmatprep.subr.bf16.mxu1 %v3228_v53  ;;  %v6977_v2 = vld [vmem:[#allocation99_spill] sm:$0xff]  ;;  %v2017_v37 = vpop.trf.xlu0  ;;  %v6980_v53 = vld [vmem:[#allocation65_spill] sm:$0xff] }
 0x349   : > { %v6979_v19 = vpack.c.bf16 %v6977_v2, %v6978_v33  ;;  %v6982_v18 = vpack.c.bf16 %v6980_v53, %v6981_v62  ;;  %v2376_v22 = vld [vmem:[#allocation12] sm:$0xff] }
 0x34a   : > { %v1857_v40 = vadd.f32 %v1855_v48, %v1841_v43  ;;  %2246 = vmatmul.mubr.f32.gmra.mrb[16].mxu1 %v1948_v58  ;;  %v1952_v45 = vpop.trf.xlu1  ;;  %v2379_v43 = vld [vmem:[#allocation12 + $0x18] sm:$0xff]  ;;  %v2378_v48 = vld [vmem:[#allocation12 + $0x10] sm:$0xff] }
 0x34b   : > { %3231 = vmatpush1.bf16.msra.mxu1 %v6976_v17  ;;  %3005 = vmatprep.mubr.msk.f32.mxu1 %vm2054_vm2, %v2013_v38  ;;  %v3727_v38 = vmov 1.0  }
 0x34c   : > { %1973 = vxpose.xlu1.b32.end [16/16] %v1857_v40, 128  ;;  %3233 = vmatprep.subr.bf16.mxu1 %v3232_v12  ;;  %v3236_v60 = vpack.c.bf16 %v1857_v40, %v1853_v1  ;;  %v2018_v35 = vpop.trf.xlu0 }
 0x34e   : > { %2251 = vmatmul.mubr.f32.gmra.mrb[18].mxu1 %v1949_v13  ;;  %v1953_v0 = vpop.trf.xlu1 }
 0x34f   : > { %3235 = vmatpush1.bf16.msra.mxu1 %v6979_v19  ;;  %3006 = vmatprep.mubr.msk.f32.mxu1 %vm2054_vm2, %v2014_v7 }
 0x350   : > { %3237 = vmatprep.subr.bf16.mxu1 %v3236_v60  ;;  %v2019_v44 = vpop.trf.xlu0 }
 0x352   : > { %2256 = vmatmul.mubr.f32.gmra.mrb[20].mxu1 %v1950_v27  ;;  %v1954_v16 = vpop.trf.xlu1 }
 0x353   : > { %3239 = vmatpush1.bf16.msra.mxu1 %v6982_v18  ;;  %3007 = vmatprep.mubr.msk.f32.mxu1 %vm2054_vm2, %v2015_v20 }
 0x354   : > { %3241 = vmatprep.subr.bf16.mxu1 %v6983_v3  ;;  %v2020_v21 = vpop.trf.xlu0 }
 0x356   : > { %2261 = vmatmul.mubr.f32.gmra.mrb[22].mxu1 %v1951_v24  ;;  %v1955_v9 = vpop.trf.xlu1 }
 0x357   : > { %3243 = vmatpush1.bf16.msra.mxu1 %v6984_v4  ;;  %3008 = vmatprep.mubr.msk.f32.mxu1 %vm2054_vm2, %v2016_v56 }
 0x358   : > { %3044 = vmatprep.subr.msk.mxu1 %vm828_vm1, %v3727_v38  ;;  %v2021_v5 = vpop.trf.xlu0 }
 0x35a   : > { %2266 = vmatmul.mubr.f32.gmra.mrb[24].mxu1 %v1952_v45  ;;  %v1956_v26 = vpop.trf.xlu1 }
 0x35b   : > { %3045 = vmatpush1.msk.msra.mxu1 %vm828_vm1, %v3727_v38  ;;  %3009 = vmatprep.mubr.msk.f32.mxu1 %vm2054_vm2, %v2017_v37 }
 0x35c   : > { %v2038_v11 = vpop.trf.xlu0 }
 0x35e   : > { %2271 = vmatmul.mubr.f32.gmra.mrb[26].mxu1 %v1953_v0  ;;  %v1957_v50 = vpop.trf.xlu1 }
 0x35f   : > { %3010 = vmatprep.mubr.msk.f32.mxu1 %vm2054_vm2, %v2018_v35 }
 0x360   : > { %v2039_v52 = vpop.trf.xlu0 }
 0x362   : > { %2276 = vmatmul.mubr.f32.gmra.mrb[28].mxu1 %v1954_v16 }
 0x363   : > { %3011 = vmatprep.mubr.msk.f32.mxu1 %vm2054_vm2, %v2019_v44 }
 0x364   : > { %v2040_v42 = vpop.trf.xlu0 }
 0x366   : > { %2281 = vmatmul.mubr.f32.gmra.mrb[30].mxu1 %v1955_v9 }
 0x367   : > { %3012 = vmatprep.mubr.msk.f32.mxu1 %vm2054_vm2, %v2020_v21 }
 0x368   : > { %v2041_v54 = vpop.trf.xlu0 }
 0x36a   : > { %2286 = vmatmul.mubr.f32.gmra.mrb[32].mxu1 %v1956_v26 }
 0x36b   : > { %3013 = vmatprep.mubr.msk.f32.mxu1 %vm2054_vm2, %v2021_v5 }
 0x36c   : > { %v2042_v58 = vpop.trf.xlu0 }
 0x36e   : > { %2291 = vmatmul.mubr.f32.gmra.mrb[34].mxu1 %v1957_v50 }
 0x36f   : > { %3014 = vmatprep.mubr.msk.f32.mxu1 %vm2054_vm2, %v2038_v11 }
 0x370   : > { %v2043_v57 = vpop.trf.xlu0 }
 0x374   : > { %v2044_v23 = vpop.trf.xlu0 }
 0x378   : > { %v2045_v7 = vpop.trf.xlu0 }
 0x37c   : > { %v2046_v39 = vpop.trf.xlu0 }
 0x380   : > { %v2047_v36 = vpop.trf.xlu0 }
 0x384   : > { %v2048_v6 = vpop.trf.xlu0 }
 0x388   : > { %v2049_v63 = vpop.trf.xlu0 }
 0x38c   : > { %v2050_v1 = vpop.trf.xlu0 }
 0x390   : > { %v1974_v28 = vpop.trf.xlu1  ;;  %v2051_v59 = vpop.trf.xlu0 }
 0x391   : > { %2296 = vmatmul.mubr.f32.gmra.mrb[36].mxu1 %v1974_v28 }
 0x392   : > { %3015 = vmatprep.mubr.msk.f32.mxu1 %vm2054_vm2, %v2039_v52 }
 0x394   : > { %v1975_v12 = vpop.trf.xlu1  ;;  %v2052_v20 = vpop.trf.xlu0 }
 0x395   : > { %2301 = vmatmul.mubr.f32.gmra.mrb[38].mxu1 %v1975_v12 }
 0x396   : > { %3016 = vmatprep.mubr.msk.f32.mxu1 %vm2054_vm2, %v2040_v42 }
 0x398   : > { %v1976_v8 = vpop.trf.xlu1  ;;  %v2053_v27 = vpop.trf.xlu0 }
 0x399   : > { %2306 = vmatmul.mubr.f32.gmra.mrb[40].mxu1 %v1976_v8 }
 0x39a   : > { %3017 = vmatprep.mubr.msk.f32.mxu1 %vm2054_vm2, %v2041_v54 }
 0x39c   : > { %v1977_v14 = vpop.trf.xlu1 }
 0x39d   : > { %2311 = vmatmul.mubr.f32.gmra.mrb[42].mxu1 %v1977_v14 }
 0x39e   : > { %3018 = vmatprep.mubr.msk.f32.mxu1 %vm2054_vm2, %v2042_v58 }
 0x3a0   : > { %v1978_v49 = vpop.trf.xlu1 }
 0x3a1   : > { %2316 = vmatmul.mubr.f32.gmra.mrb[44].mxu1 %v1978_v49 }
 0x3a2   : > { %3019 = vmatprep.mubr.msk.f32.mxu1 %vm2054_vm2, %v2043_v57 }
 0x3a4   : > { %v1979_v55 = vpop.trf.xlu1 }
 0x3a5   : > { %2321 = vmatmul.mubr.f32.gmra.mrb[46].mxu1 %v1979_v55 }
 0x3a6   : > { %3020 = vmatprep.mubr.msk.f32.mxu1 %vm2054_vm2, %v2044_v23 }
 0x3a8   : > { %v1980_v15 = vpop.trf.xlu1 }
 0x3a9   : > { %2326 = vmatmul.mubr.f32.gmra.mrb[48].mxu1 %v1980_v15 }
 0x3aa   : > { %3021 = vmatprep.mubr.msk.f32.mxu1 %vm2054_vm2, %v2045_v7 }
 0x3ac   : > { %v1981_v13 = vpop.trf.xlu1 }
 0x3ad   : > { %2331 = vmatmul.mubr.f32.gmra.mrb[50].mxu1 %v1981_v13 }
 0x3ae   : > { %3022 = vmatprep.mubr.msk.f32.mxu1 %vm2054_vm2, %v2046_v39 }
 0x3b0   : > { %v1982_v47 = vpop.trf.xlu1 }
 0x3b1   : > { %2336 = vmatmul.mubr.f32.gmra.mrb[52].mxu1 %v1982_v47 }
 0x3b2   : > { %3023 = vmatprep.mubr.msk.f32.mxu1 %vm2054_vm2, %v2047_v36 }
 0x3b4   : > { %v1983_v29 = vpop.trf.xlu1 }
 0x3b5   : > { %2341 = vmatmul.mubr.f32.gmra.mrb[54].mxu1 %v1983_v29 }
 0x3b6   : > { %3024 = vmatprep.mubr.msk.f32.mxu1 %vm2054_vm2, %v2048_v6 }
 0x3b8   : > { %v1984_v61 = vpop.trf.xlu1 }
 0x3b9   : > { %2346 = vmatmul.mubr.f32.gmra.mrb[56].mxu1 %v1984_v61 }
 0x3ba   : > { %3025 = vmatprep.mubr.msk.f32.mxu1 %vm2054_vm2, %v2049_v63 }
 0x3bc   : > { %v1985_v46 = vpop.trf.xlu1 }
 0x3bd   : > { %2351 = vmatmul.mubr.f32.gmra.mrb[58].mxu1 %v1985_v46 }
 0x3be   : > { %3026 = vmatprep.mubr.msk.f32.mxu1 %vm2054_vm2, %v2050_v1 }
 0x3c0   : > { %v1986_v41 = vpop.trf.xlu1 }
 0x3c1   : > { %2356 = vmatmul.mubr.f32.gmra.mrb[60].mxu1 %v1986_v41 }
 0x3c2   : > { %3027 = vmatprep.mubr.msk.f32.mxu1 %vm2054_vm2, %v2051_v59 }
 0x3c4   : > { %v1987_v31 = vpop.trf.xlu1 }
 0x3c5   : > { %2361 = vmatmul.mubr.f32.gmra.mrb[62].mxu1 %v1987_v31 }
 0x3c6   : > { %3028 = vmatprep.mubr.msk.f32.mxu1 %vm2054_vm2, %v2052_v20 }
 0x3c8   : > { %v1988_v30 = vpop.trf.xlu1 }
 0x3c9   : > { %2366 = vmatmul.mubr.f32.gmra.mrb[64].mxu1 %v1988_v30 }
 0x3ca   : > { %3029 = vmatprep.mubr.msk.f32.mxu1 %vm2054_vm2, %v2053_v27 }
 0x3cc   : > { %v1989_v10 = vpop.trf.xlu1 }
 0x3cd   : > { %2371 = vmatmul.mubr.f32.gmra.mrb[66].mxu1 %v1989_v10 }
 0x3ce   : > { %3030 = vmatprep.mubr.msk.f32.mxu1 %vm2054_vm2, %v2377_v25 }
 0x3d1   : > { %2451 = vmatmul.mubr.f32.vlgmr.msra.gmra.mrb[68].mxu1 %v2376_v22 }
 0x3d2   : > { %3031 = vmatprep.mubr.msk.f32.mxu1 %vm2054_vm2, %v2379_v43 }
 0x3d5   : > { %2457 = vmatmul.mubr.f32.gmra.mrb[70].mxu1 %v2378_v48 }
 0x404   : > { %v6151_v56 = vpop.f32.mrb[4].mxu1 }
 0x405   : > { %v2219_v40 = vpop.f32.mrb[5].mxu1  ;;  %v2463_v51 = vmul.f32 %v6151_v56, %v6151_v56 }
 0x407   : > { %2495 = vadd.xlane.f32.xlu0 %v2463_v51 }
 0x408   : > { %v6155_v34 = vpop.f32.mrb[6].mxu1 }
 0x409   : > { %v2224_v17 = vpop.f32.mrb[7].mxu1  ;;  %v2464_v24 = vmul.f32 %v6155_v34, %v6155_v34 }
 0x40b   : > { %2497 = vadd.xlane.f32.xlu1 %v2464_v24 }
 0x40c   : > { %v6159_v60 = vpop.f32.mrb[8].mxu1 }
 0x40d   : > { %v2229_v2 = vpop.f32.mrb[9].mxu1  ;;  %v2465_v33 = vmul.f32 %v6159_v60, %v6159_v60 }
 0x40f   : > { %2499 = vadd.xlane.f32.xlu1 %v2465_v33 }
 0x411   : > { %v6163_v19 = vpop.f32.mrb[10].mxu1 }
 0x412   : > { %v2234_v37 = vpop.f32.mrb[11].mxu1  ;;  %v2466_v45 = vmul.f32 %v6163_v19, %v6163_v19 }
 0x414   : > { %2501 = vadd.xlane.f32.xlu0 %v2466_v45 }
 0x415   : > { %v6167_v53 = vpop.f32.mrb[12].mxu1 }
 0x416   : > { %v2239_v62 = vpop.f32.mrb[13].mxu1  ;;  %v2467_v18 = vmul.f32 %v6167_v53, %v6167_v53 }
 0x418   : > { %2503 = vadd.xlane.f32.xlu1 %v2467_v18 }
 0x419   : > { %v6171_v3 = vpop.f32.mrb[14].mxu1 }
 0x41a   : > { %v2244_v35 = vpop.f32.mrb[15].mxu1  ;;  %v2468_v0 = vmul.f32 %v6171_v3, %v6171_v3 }
 0x41c   : > { %2505 = vadd.xlane.f32.xlu0 %v2468_v0 }
 0x41d   : > { %v6175_v4 = vpop.f32.mrb[16].mxu1 }
 0x41e   : > { %v2249_v38 = vpop.f32.mrb[17].mxu1  ;;  %v2469_v32 = vmul.f32 %v6175_v4, %v6175_v4 }
 0x420   : > { %2507 = vadd.xlane.f32.xlu1 %v2469_v32 }
 0x421   : > { %v6179_v44 = vpop.f32.mrb[18].mxu1 }
 0x422   : > { %v2254_v16 = vpop.f32.mrb[19].mxu1  ;;  %v2470_v21 = vmul.f32 %v6179_v44, %v6179_v44 }
 0x424   : > { %2509 = vadd.xlane.f32.xlu0 %v2470_v21 }
 0x425   : > { %v6183_v9 = vpop.f32.mrb[20].mxu1 }
 0x426   : > { %v2259_v5 = vpop.f32.mrb[21].mxu1  ;;  %v2471_v26 = vmul.f32 %v6183_v9, %v6183_v9 }
 0x428   : > { %2511 = vadd.xlane.f32.xlu1 %v2471_v26 }
 0x429   : > { %v6187_v11 = vpop.f32.mrb[22].mxu1 }
 0x42a   : > { %v2264_v50 = vpop.f32.mrb[23].mxu1  ;;  %v2472_v52 = vmul.f32 %v6187_v11, %v6187_v11 }
 0x42c   : > { %2513 = vadd.xlane.f32.xlu0 %v2472_v52 }
 0x42d   : > { %v6191_v42 = vpop.f32.mrb[24].mxu1 }
 0x42e   : > { %v2269_v54 = vpop.f32.mrb[25].mxu1  ;;  %v2473_v58 = vmul.f32 %v6191_v42, %v6191_v42 }
 0x430   : > { %2515 = vadd.xlane.f32.xlu1 %v2473_v58 }
 0x431   : > { %v6195_v57 = vpop.f32.mrb[26].mxu1 }
 0x432   : > { %v2274_v28 = vpop.f32.mrb[27].mxu1  ;;  %v2474_v23 = vmul.f32 %v6195_v57, %v6195_v57 }
 0x434   : > { %2517 = vadd.xlane.f32.xlu0 %v2474_v23 }
 0x435   : > { %v6199_v12 = vpop.f32.mrb[28].mxu1 }
 0x436   : > { %v2279_v7 = vpop.f32.mrb[29].mxu1  ;;  %v2475_v8 = vmul.f32 %v6199_v12, %v6199_v12 }
 0x438   : > { %2519 = vadd.xlane.f32.xlu1 %v2475_v8 }
 0x439   : > { %v6203_v14 = vpop.f32.mrb[30].mxu1 }
 0x43a   : > { %v2284_v39 = vpop.f32.mrb[31].mxu1  ;;  %v2476_v49 = vmul.f32 %v6203_v14, %v6203_v14 }
 0x43c   : > { %2521 = vadd.xlane.f32.xlu0 %v2476_v49 }
 0x43d   : > { %v6207_v36 = vpop.f32.mrb[32].mxu1 }
 0x43e   : > { %v2289_v55 = vpop.f32.mrb[33].mxu1  ;;  %v2477_v15 = vmul.f32 %v6207_v36, %v6207_v36 }
 0x440   : > { %2523 = vadd.xlane.f32.xlu1 %v2477_v15 }
 0x441   : > { %v6211_v6 = vpop.f32.mrb[34].mxu1 }
 0x442   : > { %v2294_v13 = vpop.f32.mrb[35].mxu1  ;;  %v2478_v63 = vmul.f32 %v6211_v6, %v6211_v6 }
 0x444   : > { %2525 = vadd.xlane.f32.xlu0 %v2478_v63 }
 0x464   : > { %v6215_v47 = vpop.f32.mrb[36].mxu1 }
 0x465   : > { %v2299_v29 = vpop.f32.mrb[37].mxu1  ;;  %v2479_v1 = vmul.f32 %v6215_v47, %v6215_v47 }
 0x467   : > { %2527 = vadd.xlane.f32.xlu1 %v2479_v1 }
 0x468   : > { %v6219_v61 = vpop.f32.mrb[38].mxu1 }
 0x469   : > { %v2304_v59 = vpop.f32.mrb[39].mxu1  ;;  %v2480_v46 = vmul.f32 %v6219_v61, %v6219_v61 }
 0x46b   : > { %2529 = vadd.xlane.f32.xlu0 %v2480_v46 }
 0x46c   : > { %v6223_v41 = vpop.f32.mrb[40].mxu1 }
 0x46d   : > { %v2309_v20 = vpop.f32.mrb[41].mxu1  ;;  %v2481_v31 = vmul.f32 %v6223_v41, %v6223_v41 }
 0x46f   : > { %2531 = vadd.xlane.f32.xlu1 %v2481_v31 }
 0x470   : > { %v6227_v27 = vpop.f32.mrb[42].mxu1 }
 0x471   : > { %v2314_v30 = vpop.f32.mrb[43].mxu1  ;;  %v2482_v25 = vmul.f32 %v6227_v27, %v6227_v27 }
 0x473   : > { %2533 = vadd.xlane.f32.xlu0 %v2482_v25 }
 0x474   : > { %v6231_v10 = vpop.f32.mrb[44].mxu1 }
 0x475   : > { %v2319_v22 = vpop.f32.mrb[45].mxu1  ;;  %v2483_v43 = vmul.f32 %v6231_v10, %v6231_v10 }
 0x477   : > { %2535 = vadd.xlane.f32.xlu1 %v2483_v43 }
 0x478   : > { %v6235_v48 = vpop.f32.mrb[46].mxu1 }
 0x479   : > { %v2324_v40 = vpop.f32.mrb[47].mxu1  ;;  %v2484_v51 = vmul.f32 %v6235_v48, %v6235_v48 }
 0x47b   : > { %2537 = vadd.xlane.f32.xlu0 %v2484_v51 }
 0x47c   : > { %v6239_v17 = vpop.f32.mrb[48].mxu1 }
 0x47d   : > { %v2329_v24 = vpop.f32.mrb[49].mxu1  ;;  %v2485_v2 = vmul.f32 %v6239_v17, %v6239_v17 }
 0x47f   : > { %2539 = vadd.xlane.f32.xlu1 %v2485_v2 }
 0x480   : > { %v6243_v33 = vpop.f32.mrb[50].mxu1 }
 0x481   : > { %v2334_v37 = vpop.f32.mrb[51].mxu1  ;;  %v2486_v45 = vmul.f32 %v6243_v33, %v6243_v33 }
 0x483   : > { %2541 = vadd.xlane.f32.xlu0 %v2486_v45 }
 0x484   : > { %v6247_v62 = vpop.f32.mrb[52].mxu1 }
 0x485   : > { %v2339_v18 = vpop.f32.mrb[53].mxu1  ;;  %v2487_v35 = vmul.f32 %v6247_v62, %v6247_v62 }
 0x487   : > { %2543 = vadd.xlane.f32.xlu1 %v2487_v35 }
 0x488   : > { %v6251_v0 = vpop.f32.mrb[54].mxu1 }
 0x489   : > { %v2344_v38 = vpop.f32.mrb[55].mxu1  ;;  %v2488_v32 = vmul.f32 %v6251_v0, %v6251_v0 }
 0x48b   : > { %2545 = vadd.xlane.f32.xlu0 %v2488_v32 }
 0x48c   : > { %v6255_v16 = vpop.f32.mrb[56].mxu1 }
 0x48d   : > { %v2349_v21 = vpop.f32.mrb[57].mxu1  ;;  %v2489_v5 = vmul.f32 %v6255_v16, %v6255_v16 }
 0x48f   : > { %2547 = vadd.xlane.f32.xlu1 %v2489_v5 }
 0x490   : > { %v6259_v26 = vpop.f32.mrb[58].mxu1 }
 0x491   : > { %v2354_v50 = vpop.f32.mrb[59].mxu1  ;;  %v2490_v52 = vmul.f32 %v6259_v26, %v6259_v26 }
 0x493   : > { %2549 = vadd.xlane.f32.xlu0 %v2490_v52 }
 0x494   : > { %v6263_v54 = vpop.f32.mrb[60].mxu1  ;;  %v2496_v39 = vpop.xlane.xlu0 %2495 }
 0x495   : > { %v2359_v58 = vpop.f32.mrb[61].mxu1  ;;  %v2491_v28 = vmul.f32 %v6263_v54, %v6263_v54  ;;  %v2559_v49 = vmul.f32 0.125, %v2496_v39 }
 0x497   : > { %2551 = vadd.xlane.f32.xlu1 %v2491_v28  ;;  %v2591_v15 = vadd.f32 0.01, %v2559_v49 }
 0x498   : > { %v6267_v23 = vpop.f32.mrb[62].mxu1  ;;  %v2498_v29 = vpop.xlane.xlu1 %2497 }
 0x499   : > { %v2364_v7 = vpop.f32.mrb[63].mxu1  ;;  %v2492_v8 = vmul.f32 %v6267_v23, %v6267_v23  ;;  %3358 = vrsqrt.f32 %v2591_v15  ;;  %v2560_v1 = vmul.f32 0.125, %v2498_v29 }
 0x49b   : > { %2553 = vadd.xlane.f32.xlu0 %v2492_v8  ;;  %v2592_v46 = vadd.f32 0.01, %v2560_v1 }
 0x49c   : > { %v6271_v55 = vpop.f32.mrb[64].mxu1  ;;  %v2500_v30 = vpop.xlane.xlu1 %2499 }
 0x49d   : > { %v2369_v13 = vpop.f32.mrb[65].mxu1  ;;  %v2493_v63 = vmul.f32 %v6271_v55, %v6271_v55  ;;  %3360 = vrsqrt.f32 %v2592_v46  ;;  %v2561_v25 = vmul.f32 0.125, %v2500_v30 }
 0x49f   : > { %2555 = vadd.xlane.f32.xlu1 %v2493_v63  ;;  %v2593_v22 = vadd.f32 0.01, %v2561_v25 }
 0x4a0   : > { %v6275_v59 = vpop.f32.mrb[66].mxu1 }
 0x4a1   : > { %v2374_v20 = vpop.f32.mrb[67].mxu1  ;;  %v2494_v31 = vmul.f32 %v6275_v59, %v6275_v59  ;;  %v2502_v40 = vpop.xlane.xlu0 %2501  ;;  %3362 = vrsqrt.f32 %v2593_v22 }
 0x4a2   : > { %v2562_v24 = vmul.f32 0.125, %v2502_v40 }
 0x4a3   : > { %2557 = vadd.xlane.f32.xlu0 %v2494_v31  ;;  %v3359_v2 = vpop.eup %3358 }
 0x4a4   : > { %v2452_v43 = vpop.f32.mrb[68].mxu1  ;;  %v2594_v37 = vadd.f32 0.01, %v2562_v24  ;;  %v2655_v18 = vmul.f32 %v3359_v2, %v6151_v56 }
 0x4a5   : > { %v2454_v51 = vpop.f32.mrb[69].mxu1  ;;  %v2504_v35 = vpop.xlane.xlu1 %2503 }
 0x4a6   : > { %3364 = vrsqrt.f32 %v2594_v37  ;;  %v2563_v21 = vmul.f32 0.125, %v2504_v35  ;;  %2687 = vst [vmem:[%s6282_s30] sm:$0xff] %v2655_v18 }
 0x4a7   : > { %v3361_v52 = vpop.eup %3360 }
 0x4a8   : > { %v2458_v45 = vpop.f32.mrb[70].mxu1  ;;  %v2595_v58 = vadd.f32 0.01, %v2563_v21  ;;  %v2656_v7 = vmul.f32 %v3361_v52, %v6155_v34 }
 0x4a9   : > { %v2719_v38 = vadd.f32 %v2458_v45, %v2452_v43  ;;  %v2460_v32 = vpop.f32.mrb[71].mxu1  ;;  %v2506_v8 = vpop.xlane.xlu0 %2505 }
 0x4aa   : > { %v2726_v5 = vadd.f32 %v2460_v32, %v2454_v51  ;;  %3366 = vrsqrt.f32 %v2595_v58  ;;  %v2564_v39 = vmul.f32 0.125, %v2506_v8  ;;  %2688 = vst [vmem:[%s6282_s30 + $0x8] sm:$0xff] %v2656_v7 }
 0x4ab   : > { %v2720_v50 = vrot.slane %v2719_v38, 4  ;;  %v3363_v13 = vpop.eup %3362 }
 0x4ac   : > { %v2727_v28 = vrot.slane %v2726_v5, 4  ;;  %v2596_v63 = vadd.f32 0.01, %v2564_v39  ;;  %v2657_v1 = vmul.f32 %v3363_v13, %v6159_v60 }
 0x4ad   : > { %v2721_v56 = vadd.f32 %v2720_v50, %v2719_v38  ;;  %v2508_v46 = vpop.xlane.xlu1 %2507 }
 0x4ae   : > { %v2728_v49 = vadd.f32 %v2727_v28, %v2726_v5  ;;  %3368 = vrsqrt.f32 %v2596_v63  ;;  %v2565_v31 = vmul.f32 0.125, %v2508_v46  ;;  %2689 = vst [vmem:[%s6282_s30 + $0x10] sm:$0xff] %v2657_v1 }
 0x4af   : > { %v2722_v15 = vrot.slane %v2721_v56, 2 }
 0x4b0   : > { %v2729_v29 = vrot.slane %v2728_v49, 2  ;;  %v3365_v25 = vpop.eup %3364  ;;  %v2597_v22 = vadd.f32 0.01, %v2565_v31 }
 0x4b1   : > { %v2723_v20 = vadd.f32 %v2722_v15, %v2721_v56  ;;  %v2658_v24 = vmul.f32 %v3365_v25, %v6163_v19  ;;  %v2510_v2 = vpop.xlane.xlu0 %2509 }
 0x4b2   : > { %v2730_v30 = vadd.f32 %v2729_v29, %v2728_v49  ;;  %3370 = vrsqrt.f32 %v2597_v22  ;;  %v2566_v18 = vmul.f32 0.125, %v2510_v2 }
 0x4b3   : > { %v2724_v34 = vrot.slane %v2723_v20, 1  ;;  %2690 = vst [vmem:[%s6282_s30 + $0x18] sm:$0xff] %v2658_v24 }
 0x4b4   : > { %v2731_v40 = vrot.slane %v2730_v30, 1  ;;  %v3367_v38 = vpop.eup %3366  ;;  %v2598_v21 = vadd.f32 0.01, %v2566_v18 }
 0x4b5   : > { %v2725_v37 = vadd.f32 %v2724_v34, %v2723_v20  ;;  %v2659_v50 = vmul.f32 %v3367_v38, %v6167_v53  ;;  %v2512_v52 = vpop.xlane.xlu1 %2511 }
 0x4b6   : > { %v2732_v35 = vadd.f32 %v2731_v40, %v2730_v30  ;;  %3372 = vrsqrt.f32 %v2598_v21  ;;  %v2567_v19 = vmul.f32 0.125, %v2512_v52 }
 0x4b7   : > { %v2734_v60 = vmul.f32 0.0625, %v2725_v37  ;;  %2691 = vst [vmem:[%s6282_s30 + $0x20] sm:$0xff] %v2659_v50 }
 0x4b8   : > { %v2735_v5 = vmul.f32 0.0625, %v2732_v35  ;;  %v3369_v53 = vpop.eup %3368  ;;  %v2599_v49 = vadd.f32 0.01, %v2567_v19 }
 0x4b9   : > { %v6292_v58 = vsub.f32 %v2452_v43, %v2734_v60  ;;  %v6294_v28 = vsub.f32 %v2458_v45, %v2734_v60  ;;  %v2514_v15 = vpop.xlane.xlu0 %2513 }
 0x4ba   : > { %v6296_v7 = vsub.f32 %v2454_v51, %v2735_v5  ;;  %v6298_v8 = vsub.f32 %v2460_v32, %v2735_v5  ;;  %v2660_v51 = vmul.f32 %v3369_v53, %v6171_v3  ;;  %3374 = vrsqrt.f32 %v2599_v49 }
 0x4bb   : > { %v2740_v56 = vmul.f32 %v6292_v58, %v6292_v58  ;;  %v2742_v39 = vmul.f32 %v6294_v28, %v6294_v28  ;;  %v2568_v13 = vmul.f32 0.125, %v2514_v15 }
 0x4bc   : > { %v2741_v43 = vmul.f32 %v6296_v7, %v6296_v7  ;;  %v2743_v45 = vmul.f32 %v6298_v8, %v6298_v8  ;;  %2692 = vst [vmem:[%s6282_s30 + $0x28] sm:$0xff] %v2660_v51  ;;  %v3371_v1 = vpop.eup %3370 }
 0x4bd   : > { %v2744_v32 = vadd.f32 %v2742_v39, %v2740_v56  ;;  %v2600_v46 = vadd.f32 0.01, %v2568_v13  ;;  %v2661_v31 = vmul.f32 %v3371_v1, %v6175_v4  ;;  %v2516_v34 = vpop.xlane.xlu1 %2515 }
 0x4be   : > { %v2751_v63 = vadd.f32 %v2743_v45, %v2741_v43  ;;  %v2569_v22 = vmul.f32 0.125, %v2516_v34 }
 0x4bf   : > { %v2745_v29 = vrot.slane %v2744_v32, 4  ;;  %3376 = vrsqrt.f32 %v2600_v46  ;;  %2693 = vst [vmem:[%s6282_s30 + $0x30] sm:$0xff] %v2661_v31 }
 0x4c0   : > { %v2752_v20 = vrot.slane %v2751_v63, 4  ;;  %v3373_v40 = vpop.eup %3372  ;;  %v2601_v2 = vadd.f32 0.01, %v2569_v22 }
 0x4c1   : > { %v2746_v30 = vadd.f32 %v2745_v29, %v2744_v32  ;;  %v2662_v37 = vmul.f32 %v3373_v40, %v6179_v44  ;;  %v2518_v35 = vpop.xlane.xlu0 %2517 }
 0x4c2   : > { %v2753_v25 = vadd.f32 %v2752_v20, %v2751_v63  ;;  %3378 = vrsqrt.f32 %v2601_v2  ;;  %v2570_v38 = vmul.f32 0.125, %v2518_v35 }
 0x4c3   : > { %v2747_v3 = vrot.slane %v2746_v30, 2  ;;  %2694 = vst [vmem:[%s6282_s30 + $0x38] sm:$0xff] %v2662_v37 }
 0x4c4   : > { %v2754_v24 = vrot.slane %v2753_v25, 2  ;;  %v3375_v21 = vpop.eup %3374  ;;  %v2602_v50 = vadd.f32 0.01, %v2570_v38 }
 0x4c5   : > { %v2748_v18 = vadd.f32 %v2747_v3, %v2746_v30  ;;  %v2663_v52 = vmul.f32 %v3375_v21, %v6183_v9  ;;  %v2520_v56 = vpop.xlane.xlu1 %2519 }
 0x4c6   : > { %v2755_v60 = vadd.f32 %v2754_v24, %v2753_v25  ;;  %3380 = vrsqrt.f32 %v2602_v50  ;;  %v2571_v53 = vmul.f32 0.125, %v2520_v56 }
 0x4c7   : > { %v2749_v4 = vrot.slane %v2748_v18, 1  ;;  %2695 = vst [vmem:[%s6282_s30 + $0x40] sm:$0xff] %v2663_v52 }
 0x4c8   : > { %v2756_v5 = vrot.slane %v2755_v60, 1  ;;  %v2603_v45 = vadd.f32 0.01, %v2571_v53 }
 0x4c9   : > { %v2750_v19 = vadd.f32 %v2749_v4, %v2748_v18  ;;  %v3377_v49 = vpop.eup %3376  ;;  %v2522_v32 = vpop.xlane.xlu0 %2521 }
 0x4ca   : > { %v2757_v39 = vadd.f32 %v2756_v5, %v2755_v60  ;;  %v2664_v51 = vmul.f32 %v3377_v49, %v6187_v11  ;;  %3382 = vrsqrt.f32 %v2603_v45  ;;  %v2572_v9 = vmul.f32 0.125, %v2522_v32 }
 0x4cb   : > { %v2758_v44 = vmul.f32 0.0625, %v2750_v19 }
 0x4cc   : > { %v2759_v43 = vmul.f32 0.0625, %v2757_v39  ;;  %2696 = vst [vmem:[%s6282_s30 + $0x48] sm:$0xff] %v2664_v51  ;;  %v3379_v63 = vpop.eup %3378  ;;  %v2604_v29 = vadd.f32 0.01, %v2572_v9 }
 0x4cd   : > { %v2760_v15 = vadd.f32 1e-05, %v2758_v44  ;;  %v2665_v1 = vmul.f32 %v3379_v63, %v6191_v42  ;;  %v2524_v46 = vpop.xlane.xlu1 %2523 }
 0x4ce   : > { %v2761_v13 = vadd.f32 1e-05, %v2759_v43  ;;  %v2573_v20 = vmul.f32 0.125, %v2524_v46 }
 0x4cf   : > { %3384 = vrsqrt.f32 %v2760_v15  ;;  %2697 = vst [vmem:[%s6282_s30 + $0x50] sm:$0xff] %v2665_v1 }
 0x4d0   : > { %3386 = vrsqrt.f32 %v2761_v13  ;;  %v3381_v11 = vpop.eup %3380  ;;  %v2605_v31 = vadd.f32 0.01, %v2573_v20 }
 0x4d1   : > { %3388 = vrsqrt.f32 %v2604_v29  ;;  %v2666_v30 = vmul.f32 %v3381_v11, %v6195_v57  ;;  %v2526_v34 = vpop.xlane.xlu0 %2525 }
 0x4d2   : > { %3390 = vrsqrt.f32 %v2605_v31  ;;  %v2574_v25 = vmul.f32 0.125, %v2526_v34 }
 0x4d3   : > { %2698 = vst [vmem:[%s6282_s30 + $0x58] sm:$0xff] %v2666_v30 }
 0x4d4   : > { %v3383_v22 = vpop.eup %3382  ;;  %v2606_v3 = vadd.f32 0.01, %v2574_v25 }
 0x4d5   : > { %v2667_v40 = vmul.f32 %v3383_v22, %v6199_v12 }
 0x4d6   : > { %3392 = vrsqrt.f32 %v2606_v3 }
 0x4d7   : > { %2699 = vst [vmem:[%s6282_s30 + $0x60] sm:$0xff] %v2667_v40 }
 0x4d9   : > { %v3385_v42 = vpop.eup %3384 }
 0x4da   : > { %v3387_v24 = vpop.eup %3386  ;;  %v2764_v57 = vmul.f32 %v3385_v42, %v6292_v58  ;;  %v2766_v2 = vmul.f32 %v3385_v42, %v6294_v28 }
 0x4db   : > { %v2765_v37 = vmul.f32 %v3387_v24, %v6296_v7  ;;  %v2767_v18 = vmul.f32 %v3387_v24, %v6298_v8  ;;  %v3389_v12 = vpop.eup %3388 }
 0x4dc   : > { %2768 = vst [vmem:[%s405_s29] sm:$0xff] %v2764_v57  ;;  %2770 = vst [vmem:[%s405_s29 + $0x10] sm:$0xff] %v2766_v2  ;;  %v2668_v58 = vmul.f32 %v3389_v12, %v6203_v14 }
 0x4dd   : > { %2769 = vst [vmem:[%s405_s29 + $0x8] sm:$0xff] %v2765_v37  ;;  %2771 = vst [vmem:[%s405_s29 + $0x18] sm:$0xff] %v2767_v18 }
 0x4de   : > { %3611 = shalt.err (!%p3608_p8)
}
 0x4df   : > { %s3612_s14 = scalar_lea.hbm %s6334_s16, 512  ;;  %s3616_s3 = scalar_lea.hbm %s6459_s7, 1024 }
 0x4e0   : > { %p3613_p11 = scmp.ne.s32.totalorder %s6334_s16, %s3612_s14  ;;  %p3617_p1 = scmp.lt.u32.totalorder %s6334_s16, %s6459_s7 }
 0x4e1   : > { %p3618_p2 = scmp.lt.u32.totalorder %s3616_s3, %s3612_s14  ;;  %p3620_p0 = scmp.lt.u32.totalorder %s3612_s14, %s6334_s16 }
 0x4e2   : > { %p3614_p7 = pnand %p3613_p11, %p3949_p3 }
 0x4e3   : > { %p3619_p13 = por %p3618_p2, %p3617_p1 }
 0x4e4   : > { %p3615_p12 = pneg %p3614_p7 }
 0x4e5   : > { %p3621_p4 = por %p3620_p0, %p3619_p13 }
 0x4e7   : > { %p3622_p6 = pnand %p3621_p4, %p3615_p12 }
 0x4e9   : > { %3625 = shalt.err (!%p3622_p6)
}
 0x4ea   : > { %s3729_s29 = smov 256   ;;  %s3730_s20 = smov 512   ;;  %2700 = vst [vmem:[%s6282_s30 + $0x68] sm:$0xff] %v2668_v58  ;;  %v3391_v14 = vpop.eup %3390 }
 0x4eb   : > { %s3731_s2 = smov 16   ;;  %v2669_v28 = vmul.f32 %v3391_v14, %v6207_v36  ;;  %v3393_v7 = vpop.eup %3392  ;;  %s2791_s11 = sshll.u32 %s6282_s30, 4  ;;  %s6406_s11 = int_to_ptr.vmem [resolvable:$true] %s2791_s11 }
 0x4ec   : > { %3269 = dma.vmem_to_hbm [thread:$0]  (%p3949_p3), %s6326_s8, 512, %s6334_s16, %s2778_s17, %s3729_s29, %s3730_s20, %s3731_s2   ;;  %v2670_v8 = vmul.f32 %v3393_v7, %v6211_v6 }
 0x4ed   : > { %2701 = vst [vmem:[%s6282_s30 + $0x70] sm:$0xff] %v2669_v28  ;;  %s3042_s8 = sshll.u32 %s3796_s28, 12  ;;  %s2773_s18 = scalar_lea.sflag [#allocation5], %s4046_s15 }
 0x4ee   : > { %2702 = vst [vmem:[%s6282_s30 + $0x78] sm:$0xff] %v2670_v8  ;;  %s6404_s4 = scalar_lea.hbm %s6458_s6, %s3042_s8  ;;  %s3626_s10 = scalar_lea.vmem %s6406_s11, 4096 }
 0x4ef   : > { %p3627_p10 = scmp.ne.s32.totalorder %s6406_s11, %s3626_s10  ;;  %s3732_s28 = smov [#allocation14]  }
 0x4f0   : > { %s3630_s13 = sshll.u32 %s3732_s28, 4  ;;  %s3631_s13 = int_to_ptr.vmem [resolvable:$false] %s3630_s13 }
 0x4f1   : > { %p3628_p5 = pnand %p3627_p10, %p3949_p3  ;;  %s3632_s14 = scalar_lea.vmem %s3631_s13, 8192 }
 0x4f2   : > { %p3633_p8 = scmp.lt.s32.totalorder %s6406_s11, %s3631_s13  ;;  %p3634_p11 = scmp.lt.s32.totalorder %s3632_s14, %s3626_s10 }
 0x4f3   : > { %p3629_p9 = pneg %p3628_p5 }
 0x4f4   : > { %v2528_v35 = vpop.xlane.xlu1 %2527  ;;  %p3635_p7 = por %p3634_p11, %p3633_p8 }
 0x4f5   : > { %v2575_v60 = vmul.f32 0.125, %v2528_v35 }
 0x4f6   : > { %p3636_p12 = pnand %p3635_p7, %p3629_p9 }
 0x4f7   : > { %v2607_v38 = vadd.f32 0.01, %v2575_v60 }
 0x4f8   : > { %v2530_v4 = vpop.xlane.xlu0 %2529 }
 0x4f9   : > { %3394 = vrsqrt.f32 %v2607_v38  ;;  %v2576_v21 = vmul.f32 0.125, %v2530_v4 }
 0x4fb   : > { %v2608_v5 = vadd.f32 0.01, %v2576_v21 }
 0x4fc   : > { %v2532_v50 = vpop.xlane.xlu1 %2531 }
 0x4fd   : > { %3396 = vrsqrt.f32 %v2608_v5  ;;  %v2577_v52 = vmul.f32 0.125, %v2532_v50 }
 0x4ff   : > { %v2609_v19 = vadd.f32 0.01, %v2577_v52 }
 0x500   : > { %v2534_v56 = vpop.xlane.xlu0 %2533 }
 0x501   : > { %3398 = vrsqrt.f32 %v2609_v19  ;;  %v2578_v36 = vmul.f32 0.125, %v2534_v56 }
 0x503   : > { %v3395_v39 = vpop.eup %3394  ;;  %v2610_v53 = vadd.f32 0.01, %v2578_v36 }
 0x504   : > { %v2671_v6 = vmul.f32 %v3395_v39, %v6215_v47  ;;  %v2536_v44 = vpop.xlane.xlu1 %2535 }
 0x505   : > { %3400 = vrsqrt.f32 %v2610_v53  ;;  %v2579_v49 = vmul.f32 0.125, %v2536_v44 }
 0x506   : > { %2703 = vst [vmem:[%s6282_s30 + $0x80] sm:$0xff] %v2671_v6 }
 0x507   : > { %v3397_v43 = vpop.eup %3396  ;;  %v2611_v45 = vadd.f32 0.01, %v2579_v49 }
 0x508   : > { %v2672_v51 = vmul.f32 %v3397_v43, %v6219_v61  ;;  %v2538_v15 = vpop.xlane.xlu0 %2537 }
 0x509   : > { %3402 = vrsqrt.f32 %v2611_v45  ;;  %v2580_v32 = vmul.f32 0.125, %v2538_v15 }
 0x50a   : > { %2704 = vst [vmem:[%s6282_s30 + $0x88] sm:$0xff] %v2672_v51 }
 0x50b   : > { %v3399_v13 = vpop.eup %3398  ;;  %v2612_v9 = vadd.f32 0.01, %v2580_v32 }
 0x50c   : > { %v2673_v63 = vmul.f32 %v3399_v13, %v6223_v41  ;;  %v2540_v29 = vpop.xlane.xlu1 %2539 }
 0x50d   : > { %3404 = vrsqrt.f32 %v2612_v9  ;;  %v2581_v47 = vmul.f32 0.125, %v2540_v29 }
 0x50e   : > { %2705 = vst [vmem:[%s6282_s30 + $0x90] sm:$0xff] %v2673_v63 }
 0x50f   : > { %v3401_v1 = vpop.eup %3400  ;;  %v2613_v46 = vadd.f32 0.01, %v2581_v47 }
 0x510   : > { %v2674_v20 = vmul.f32 %v3401_v1, %v6227_v27  ;;  %v2542_v11 = vpop.xlane.xlu0 %2541 }
 0x511   : > { %3406 = vrsqrt.f32 %v2613_v46  ;;  %v2582_v61 = vmul.f32 0.125, %v2542_v11 }
 0x512   : > { %2706 = vst [vmem:[%s6282_s30 + $0x98] sm:$0xff] %v2674_v20 }
 0x513   : > { %v3403_v31 = vpop.eup %3402  ;;  %v2614_v30 = vadd.f32 0.01, %v2582_v61 }
 0x514   : > { %v2675_v34 = vmul.f32 %v3403_v31, %v6231_v10  ;;  %v2544_v25 = vpop.xlane.xlu1 %2543 }
 0x515   : > { %3408 = vrsqrt.f32 %v2614_v30  ;;  %v2583_v41 = vmul.f32 0.125, %v2544_v25 }
 0x516   : > { %2707 = vst [vmem:[%s6282_s30 + $0xa0] sm:$0xff] %v2675_v34 }
 0x517   : > { %v3405_v22 = vpop.eup %3404  ;;  %v2615_v3 = vadd.f32 0.01, %v2583_v41 }
 0x518   : > { %v2676_v42 = vmul.f32 %v3405_v22, %v6235_v48  ;;  %v2546_v40 = vpop.xlane.xlu0 %2545 }
 0x519   : > { %3410 = vrsqrt.f32 %v2615_v3  ;;  %v2584_v27 = vmul.f32 0.125, %v2546_v40 }
 0x51a   : > { %2708 = vst [vmem:[%s6282_s30 + $0xa8] sm:$0xff] %v2676_v42 }
 0x51b   : > { %v3407_v24 = vpop.eup %3406  ;;  %v2616_v57 = vadd.f32 0.01, %v2584_v27 }
 0x51c   : > { %v2677_v2 = vmul.f32 %v3407_v24, %v6239_v17  ;;  %v2548_v37 = vpop.xlane.xlu1 %2547 }
 0x51d   : > { %3412 = vrsqrt.f32 %v2616_v57  ;;  %v2585_v10 = vmul.f32 0.125, %v2548_v37 }
 0x51e   : > { %2709 = vst [vmem:[%s6282_s30 + $0xb0] sm:$0xff] %v2677_v2 }
 0x51f   : > { %v3409_v18 = vpop.eup %3408  ;;  %v2617_v12 = vadd.f32 0.01, %v2585_v10 }
 0x520   : > { %v2678_v58 = vmul.f32 %v3409_v18, %v6243_v33  ;;  %v2550_v14 = vpop.xlane.xlu0 %2549 }
 0x521   : > { %3414 = vrsqrt.f32 %v2617_v12  ;;  %v2586_v48 = vmul.f32 0.125, %v2550_v14 }
 0x522   : > { %2710 = vst [vmem:[%s6282_s30 + $0xb8] sm:$0xff] %v2678_v58 }
 0x523   : > { %v3411_v28 = vpop.eup %3410  ;;  %v2618_v7 = vadd.f32 0.01, %v2586_v48 }
 0x524   : > { %v2679_v8 = vmul.f32 %v3411_v28, %v6247_v62  ;;  %v2552_v35 = vpop.xlane.xlu1 %2551 }
 0x525   : > { %3416 = vrsqrt.f32 %v2618_v7  ;;  %v2587_v17 = vmul.f32 0.125, %v2552_v35 }
 0x526   : > { %2711 = vst [vmem:[%s6282_s30 + $0xc0] sm:$0xff] %v2679_v8 }
 0x527   : > { %v3413_v60 = vpop.eup %3412  ;;  %v2619_v38 = vadd.f32 0.01, %v2587_v17 }
 0x528   : > { %v2680_v4 = vmul.f32 %v3413_v60, %v6251_v0  ;;  %v2554_v21 = vpop.xlane.xlu0 %2553 }
 0x529   : > { %3418 = vrsqrt.f32 %v2619_v38  ;;  %v2588_v33 = vmul.f32 0.125, %v2554_v21 }
 0x52a   : > { %2712 = vst [vmem:[%s6282_s30 + $0xc8] sm:$0xff] %v2680_v4 }
 0x52b   : > { %v3415_v5 = vpop.eup %3414  ;;  %v2620_v50 = vadd.f32 0.01, %v2588_v33 }
 0x52c   : > { %v2681_v52 = vmul.f32 %v3415_v5, %v6255_v16  ;;  %v2556_v62 = vpop.xlane.xlu1 %2555 }
 0x52d   : > { %3420 = vrsqrt.f32 %v2620_v50  ;;  %v2589_v19 = vmul.f32 0.125, %v2556_v62 }
 0x52e   : > { %2713 = vst [vmem:[%s6282_s30 + $0xd0] sm:$0xff] %v2681_v52 }
 0x52f   : > { %v3417_v56 = vpop.eup %3416  ;;  %v2621_v36 = vadd.f32 0.01, %v2589_v19 }
 0x530   : > { %v2682_v0 = vmul.f32 %v3417_v56, %v6259_v26  ;;  %v2558_v39 = vpop.xlane.xlu0 %2557 }
 0x531   : > { %3422 = vrsqrt.f32 %v2621_v36  ;;  %v2590_v53 = vmul.f32 0.125, %v2558_v39 }
 0x532   : > { %2714 = vst [vmem:[%s6282_s30 + $0xd8] sm:$0xff] %v2682_v0 }
 0x533   : > { %v3419_v6 = vpop.eup %3418  ;;  %v2622_v44 = vadd.f32 0.01, %v2590_v53 }
 0x534   : > { %v2683_v16 = vmul.f32 %v3419_v6, %v6263_v54 }
 0x535   : > { %3424 = vrsqrt.f32 %v2622_v44 }
 0x536   : > { %2715 = vst [vmem:[%s6282_s30 + $0xe0] sm:$0xff] %v2683_v16 }
 0x537   : > { %v3421_v49 = vpop.eup %3420 }
 0x538   : > { %v2684_v43 = vmul.f32 %v3421_v49, %v6267_v23 }
 0x53a   : > { %2716 = vst [vmem:[%s6282_s30 + $0xe8] sm:$0xff] %v2684_v43 }
 0x53b   : > { %v3423_v26 = vpop.eup %3422 }
 0x53c   : > { %v2685_v45 = vmul.f32 %v3423_v26, %v6271_v55 }
 0x53e   : > { %2717 = vst [vmem:[%s6282_s30 + $0xf0] sm:$0xff] %v2685_v45 }
 0x53f   : > { %v3425_v51 = vpop.eup %3424 }
 0x540   : > { %v2686_v54 = vmul.f32 %v3425_v51, %v6275_v59 }
 0x542   : > { %2718 = vst [vmem:[%s6282_s30 + $0xf8] sm:$0xff] %v2686_v54 }
 0x543   : > { %3639 = shalt.err (!%p3636_p12)
}
 0x544   : > { %s3640_s30 = scalar_lea.hbm %s6404_s4, 4096  ;;  %s3644_s3 = scalar_lea.hbm %s6458_s6, 8192 }
 0x545   : > { %p3641_p1 = scmp.ne.s32.totalorder %s6404_s4, %s3640_s30  ;;  %p3645_p0 = scmp.lt.u32.totalorder %s6404_s4, %s6458_s6 }
 0x546   : > { %p3646_p4 = scmp.lt.u32.totalorder %s3644_s3, %s3640_s30  ;;  %p3648_p10 = scmp.lt.u32.totalorder %s3640_s30, %s6404_s4 }
 0x547   : > { %p3642_p2 = pnand %p3641_p1, %p3949_p3 }
 0x548   : > { %p3647_p6 = por %p3646_p4, %p3645_p0 }
 0x549   : > { %p3643_p13 = pneg %p3642_p2 }
 0x54a   : > { %p3649_p5 = por %p3648_p10, %p3647_p6 }
 0x54c   : > { %p3650_p9 = pnand %p3649_p5, %p3643_p13 }
 0x54e   : > { %3653 = shalt.err (!%p3650_p9)
}
 0x54f   : > { %s3733_s29 = smov 128   ;;  %s3734_s20 = smov 8  }
 0x550   : > { %3268 = dma.vmem_to_hbm [thread:$0]  (%p3949_p3), %s6406_s11, 4096, %s6404_s4, %s2773_s18, %s3733_s29, %s3733_s29, %s3734_s20  }
 0x551 PF: > { %s6986_s2 = sld [smem:[#allocation24_spill]]  ;;  %s2822_s8 = sand.u32 1, %s3700_s24  }
 0x552   : > { %p6988_p11 = scmp.ge.s32.totalorder %s3712_s27, 2  ;;  %s2823_s16 = scalar_lea.sflag [#allocation5], %s2822_s8 }
 0x557   : > { %p6987_p8 = scmp.ne.s32.totalorder %s6986_s2, 0 }
 0x559   : > { %p3293_p7 = pnand %p6988_p11, %p6987_p8 }
 0x55b   : > { %3691 = dma.done.wait (!%p3293_p7), %s2823_s16, 4096  }
 0x55c   : > { %3693 = vsyncadd (!%p3293_p7), %s2823_s16, 4294963200  ;;  %s2832_s17 = scalar_lea.sflag [#allocation16], %s2822_s8 }
 0x55d   : > { %3695 = dma.done.wait (!%p3293_p7), %s2832_s17, 512  }
 0x55e   : > { %3697 = vsyncadd (!%p3293_p7), %s2832_s17, 4294966784  ;;  %p29_p3 = scmp.ge.s32.totalorder %s3936_s19, 4   ;;  %s6989_s24 = smov %s3704_s25 }
 0x55f   : > { %s6990_s25 = smov %s3708_s26  ;;  %s6991_s26 = smov %s3945_s23 }
 0x560   : > { %s6992_s27 = smov %s3936_s19  ;;  %31 = sbr.rel (!%p29_p3) target bundleno = 16 (0x10), region = 135 }
 0x567   :  { %2837 = vsyncpa [#allocation4], 1 }
 0x568   :  { %2839 = vsyncpa [#allocation4 + $0x1], 1 }
 0x569   :  { %2840 = vsyncpa [#allocation7], 1 }
 0x56a   :  { %2842 = vsyncpa [#allocation7 + $0x1], 1 }
 0x56b   :  { %2843 = vsyncpa [#allocation10], 1 }
 0x56c   :  { %2844 = vsyncpa [#allocation13], 1 }
 0x56d   :  { %2845 = vsyncpa [#allocation5], 1 }
 0x56e   :  { %2847 = vsyncpa [#allocation5 + $0x1], 1 }
 0x56f   :  { %2848 = vsyncpa [#allocation16], 1 }
 0x570   :  { %2850 = vsyncpa [#allocation16 + $0x1], 1 }

</bundles_post_ra>
